<compile_context>
chip_gen: v7x
topology: tpu7x:2x2x1
jax: 0.10.0
libtpu: 0.0.40
codegen_flags: <defaults>
</compile_context>

<pallas_src>
import functools

import jax
import jax.numpy as jnp
from jax import lax
from jax.experimental import pallas as pl
from jax.experimental.pallas import tpu as pltpu

# ---- module config (the reference code reads a global `config`) -------------
config = dict(
    embed_dim=32,
    enc_hid_dim=32,
    dec_hid_dim=32,
    n_layers=2,
    bidirectional=True,
    dropout=0.0,
    merge_mode="concat",
)


# ---- fused encoder kernel ----------------------------------------------------
def _encoder_kernel(ids_ref, lens_ref, proj0_ref,
                    b0_ref, whh0_ref,
                    wih1_ref, b1_ref, whh1_ref,
                    fcw_ref, fcb_ref,
                    out_ref, hc_ref,
                    xw_sc, hsc,
                    *, T, Bp, H, V, B2p):
    """Whole encoder in one kernel.

    ids_ref:   (T*Bp, 1)  int32   token ids (row t*Bp + b), batch padded to Bp
    lens_ref:  (2Bp, 1)   int32   sequence lengths, tiled twice (fwd rows, bwd rows)
    proj0_ref: (V, 8H)    bf16    emb @ [W_ih0_fwd^T | W_ih0_bwd^T]  (lookup+proj fused)
    whhL_ref:  (2H, 4H)   bf16    [W_hh_fwd^T ; W_hh_bwd^T] (block-diag use)
    bL_ref:    (2, 4H)    f32     row0 = fwd bias (b_ih+b_hh), row1 = bwd bias
    wih1_ref:  (2H, 8H)   bf16    layer-1 input projection, stacked along N
    fcw_ref:   (2H, D)    bf16,  fcb_ref: (1, D) f32
    out_ref:   (T*Bp, 2H) f32     per-step hidden states, [fwd | bwd] on lanes
    hc_ref:    (2Bp, D)   f32     rows [:Bp] merged hidden, rows [Bp:] merged cell
    xw_sc:     (T*2Bp, 4H) f32    step-major staged input projections (reused per layer)
    hsc:       (2*T*Bp, H) f32    layer-0 outputs (fwd block then bwd block, time-major)
    """
    TBp = T * Bp
    f32 = jnp.float32
    bf16 = jnp.bfloat16

    # ---- hoisted constants / masks (computed once, off the serial chain) ----
    lens_cat = lens_ref[...]                                          # (2Bp, 1) i32
    g_lane = lax.broadcasted_iota(jnp.int32, (B2p, 4 * H), 1)
    g_is = (g_lane >= 2 * H) & (g_lane < 3 * H)                       # tanh (g) lanes
    gate_mul = jnp.where(g_is, 1.0, 0.5)                              # f32 (2Bp, 4H)
    gate_add = jnp.where(g_is, 0.0, 0.5)
    row2 = lax.broadcasted_iota(jnp.int32, (B2p, 2 * H), 0)
    col2 = lax.broadcasted_iota(jnp.int32, (B2p, 2 * H), 1)
    diag_mask = (row2 < Bp) == (col2 < H)                             # block-diag layout

    # all T length masks at once (packed-sequence semantics, fwd & bwd rows)
    step_i = lax.broadcasted_iota(jnp.int32, (T, B2p, H), 0)
    row_i = lax.broadcasted_iota(jnp.int32, (T, B2p, H), 1)
    time_i = jnp.where(row_i < Bp, step_i, (T - 1) - step_i)
    masks = time_i < lens_cat[None, :, :]                             # (T, 2Bp, H) bool

    # ---- embedding lookup fused with layer-0 projection: onehot @ (emb @ Wih0)
    ids = ids_ref[...]                                                # (T*Bp, 1)
    onehot = (ids == lax.broadcasted_iota(jnp.int32, (TBp, V), 1)).astype(bf16)
    xw0 = jnp.dot(onehot, proj0_ref[...], preferred_element_type=f32)  # (T*Bp, 8H) f32

    def run_layer(xw_full, b_ref, whh_ref, store_fn):
        """One bidirectional LSTM layer; both directions share one unrolled loop."""
        b = b_ref[...]                                                # (2, 4H) f32
        xw_f = xw_full[:, 0:4 * H] + b[0:1, :]                        # bias folded once
        xw_b = xw_full[:, 4 * H:8 * H] + b[1:2, :]
        # stage step-major: rows [s*2Bp, s*2Bp+Bp) = fwd@t=s, next Bp = bwd@t=T-1-s
        for t in range(T):
            xw_sc[pl.ds(t * B2p, Bp), :] = xw_f[t * Bp:(t + 1) * Bp, :]
            xw_sc[pl.ds((T - 1 - t) * B2p + Bp, Bp), :] = xw_b[t * Bp:(t + 1) * Bp, :]

        whh = whh_ref[...]                                            # (2H, 4H) bf16
        h = jnp.zeros((B2p, H), f32)                                  # rows [:Bp] fwd, [Bp:] bwd
        c = jnp.zeros((B2p, H), f32)
        for s in range(T):                                            # fully unrolled
            t_b = T - 1 - s
            xw_s = xw_sc[pl.ds(s * B2p, B2p), :]                      # (2Bp, 4H) aligned load
            # block-diagonal state so ONE bf16 matmul covers both directions
            h16 = h.astype(bf16)
            h_blk = jnp.where(diag_mask,
                              jnp.concatenate([h16, h16], axis=1), 0.0).astype(bf16)
            pre = xw_s + jnp.dot(h_blk, whh, preferred_element_type=f32)
            # single tanh pass: sigmoid(x) = 0.5*tanh(x/2) + 0.5 on i/f/o lanes
            act = jnp.tanh(pre * gate_mul) * gate_mul + gate_add
            i_g = act[:, 0:H]
            f_g = act[:, H:2 * H]
            g_g = act[:, 2 * H:3 * H]
            o_g = act[:, 3 * H:4 * H]
            c_new = f_g * c + i_g * g_g
            h_new = o_g * jnp.tanh(c_new)
            # packed-sequence semantics: freeze state & zero outputs past src_len
            m = masks[s]                                              # (2Bp, H) bool, hoisted
            h = jnp.where(m, h_new, h)
            c = jnp.where(m, c_new, c)
            h_out = jnp.where(m, h_new, 0.0)
            store_fn(s, t_b, h_out)                                   # direct per-step store
        return h, c

    # ---- layer 0: outputs staged direction-major/time-major in hsc ----------
    def store_l0(s, t_b, h_out):
        hsc[pl.ds(s * Bp, Bp), :] = h_out[0:Bp, :]                    # fwd @ time s
        hsc[pl.ds(TBp + t_b * Bp, Bp), :] = h_out[Bp:B2p, :]          # bwd @ time t_b
    run_layer(xw0, b0_ref, whh0_ref, store_l0)

    # ---- layer 1 input projection: split-K avoids any lane relayout of hsc --
    x1f = hsc[pl.ds(0, TBp), :].astype(bf16)
    x1b = hsc[pl.ds(TBp, TBp), :].astype(bf16)
    xw1 = (jnp.dot(x1f, wih1_ref[pl.ds(0, H), :], preferred_element_type=f32)
           + jnp.dot(x1b, wih1_ref[pl.ds(H, H), :], preferred_element_type=f32))

    # ---- layer 1: per-step stores go straight to out_ref --------------------
    def store_l1(s, t_b, h_out):
        out_ref[pl.ds(s * Bp, Bp), pl.ds(0, H)] = h_out[0:Bp, :]      # fwd lanes
        out_ref[pl.ds(t_b * Bp, Bp), pl.ds(H, H)] = h_out[Bp:B2p, :]  # bwd lanes
    h_fin, c_fin = run_layer(xw1, b1_ref, whh1_ref, store_l1)

    # ---- merge_hidden epilogue: hid & cell in ONE stacked fc matmul ---------
    h_cat = jnp.concatenate([h_fin[0:Bp, :], h_fin[Bp:B2p, :]], axis=1)   # (Bp, 2H)
    c_cat = jnp.concatenate([c_fin[0:Bp, :], c_fin[Bp:B2p, :]], axis=1)
    hc = jnp.concatenate([h_cat, c_cat], axis=0).astype(bf16)             # (2Bp, 2H)
    hc_ref[...] = jnp.tanh(
        jnp.dot(hc, fcw_ref[...], preferred_element_type=f32) + fcb_ref[...])


# ---- parameters --------------------------------------------------------------
def init_params(vocab_size, key):
    E, H, D = config["embed_dim"], config["enc_hid_dim"], config["dec_hid_dim"]
    ndir = 2 if config["bidirectional"] else 1
    n_keys = 3 + 3 * config["n_layers"] * ndir
    keys = iter(jax.random.split(key, n_keys))
    scale = 0.1
    params = {"embedding": scale * jax.random.normal(next(keys), (vocab_size, E), jnp.float32)}
    for l in range(config["n_layers"]):
        in_dim = E if l == 0 else H * ndir
        for name in ["fwd", "bwd"][:ndir]:
            params[f"l{l}_{name}"] = {
                "wih": scale * jax.random.normal(next(keys), (in_dim, 4 * H), jnp.float32),
                "whh": scale * jax.random.normal(next(keys), (H, 4 * H), jnp.float32),
                "b": scale * jax.random.normal(next(keys), (1, 4 * H), jnp.float32),
            }
    fc_in = H * 2 if config["bidirectional"] else H
    params["fc_w"] = scale * jax.random.normal(next(keys), (fc_in, D), jnp.float32)
    params["fc_b"] = scale * jax.random.normal(next(keys), (1, D), jnp.float32)
    return params


# ---- Encoder.forward (single pallas_call) ------------------------------------
def encoder_forward(params, src, src_len):
    """src: (T, B) int32; src_len: (B,) int32.  Returns (outputs, (hidden, cell))."""
    T, B = src.shape
    H, D = config["enc_hid_dim"], config["dec_hid_dim"]
    bf = jnp.bfloat16

    # pad batch (sublane) dim to 8 so every per-step tile is (8, *)-aligned
    Bp = ((B + 7) // 8) * 8
    B2p = 2 * Bp

    src_p = jnp.pad(src.astype(jnp.int32), ((0, 0), (0, Bp - B)))
    ids = src_p.reshape(T * Bp, 1)                                    # row t*Bp + b
    lens_p = jnp.pad(src_len.astype(jnp.int32), (0, Bp - B))
    lens_cat = jnp.concatenate([lens_p, lens_p], axis=0).reshape(B2p, 1)

    # pad vocab (lane / contraction) dim to a multiple of 128
    V = params["embedding"].shape[0]
    V_pad = ((V + 127) // 128) * 128
    emb_pad = jnp.pad(params["embedding"], ((0, V_pad - V), (0, 0)))

    def pack_layer(l):
        f, b = params[f"l{l}_fwd"], params[f"l{l}_bwd"]
        wih = jnp.concatenate([f["wih"], b["wih"]], axis=1)           # (in, 8H)
        whh = jnp.concatenate([f["whh"], b["whh"]], axis=0)           # (2H, 4H)
        bias = jnp.concatenate([f["b"], b["b"]], axis=0)              # (2, 4H)
        return wih, whh, bias

    wih0, whh0, b0 = pack_layer(0)
    wih1, whh1, b1 = pack_layer(1)

    # fuse embedding lookup with the layer-0 input projection (done once, off-kernel)
    proj0 = jnp.dot(emb_pad, wih0, precision=lax.Precision.HIGHEST).astype(bf)

    kernel = functools.partial(_encoder_kernel, T=T, Bp=Bp, H=H, V=V_pad, B2p=B2p)
    vmem = pl.BlockSpec(memory_space=pltpu.MemorySpace.VMEM)
    out_flat, hc = pl.pallas_call(
        kernel,
        out_shape=(
            jax.ShapeDtypeStruct((T * Bp, 2 * H), jnp.float32),
            jax.ShapeDtypeStruct((B2p, D), jnp.float32),
        ),
        in_specs=[vmem] * 10,
        out_specs=(vmem, vmem),
        scratch_shapes=[
            pltpu.VMEM((T * B2p, 4 * H), jnp.float32),                # step-major xw staging
            pltpu.VMEM((2 * T * Bp, H), jnp.float32),                 # layer-0 outputs
        ],
    )(ids, lens_cat, proj0,
      b0, whh0.astype(bf),
      wih1.astype(bf), b1, whh1.astype(bf),
      params["fc_w"].astype(bf), params["fc_b"])

    outputs = out_flat.reshape(T, Bp, 2 * H)[:, :B, :]                # (T, B, 2H)
    hidden = hc[0:B][None]                                            # (1, B, D)
    cell = hc[Bp:Bp + B][None]                                        # (1, B, D)
    return outputs, (hidden, cell)


# ---- pure-JAX reference (for numerical sanity check) --------------------------
def _reference_forward(params, src, src_len):
    H = config["enc_hid_dim"]
    T, B = src.shape
    hp = lax.Precision.HIGHEST
    emb = params["embedding"][src]
    lens = src_len.astype(jnp.int32)

    def run_dir(x, w, reverse):
        h = jnp.zeros((B, H), jnp.float32)
        c = jnp.zeros((B, H), jnp.float32)
        outs = [None] * T
        order = range(T - 1, -1, -1) if reverse else range(T)
        for t in order:
            gates = (jnp.dot(x[t], w["wih"], precision=hp)
                     + jnp.dot(h, w["whh"], precision=hp) + w["b"])
            i = jax.nn.sigmoid(gates[:, 0:H])
            f = jax.nn.sigmoid(gates[:, H:2 * H])
            g = jnp.tanh(gates[:, 2 * H:3 * H])
            o = jax.nn.sigmoid(gates[:, 3 * H:4 * H])
            c_new = f * c + i * g
            h_new = o * jnp.tanh(c_new)
            m = (t < lens)[:, None]
            h = jnp.where(m, h_new, h)
            c = jnp.where(m, c_new, c)
            outs[t] = jnp.where(m, h_new, 0.0)
        return jnp.stack(outs, axis=0), h, c

    layer_in = emb
    hf = hb = cf = cb = None
    for l in range(config["n_layers"]):
        of, hf, cf = run_dir(layer_in, params[f"l{l}_fwd"], False)
        ob, hb, cb = run_dir(layer_in, params[f"l{l}_bwd"], True)
        layer_in = jnp.concatenate([of, ob], axis=-1)
    hcat = jnp.concatenate([hf, hb], axis=1)
    ccat = jnp.concatenate([cf, cb], axis=1)
    hidden = jnp.tanh(jnp.dot(hcat, params["fc_w"], precision=hp) + params["fc_b"])[None]
    cell = jnp.tanh(jnp.dot(ccat, params["fc_w"], precision=hp) + params["fc_b"])[None]
    return layer_in, (hidden, cell)


# ---- main --------------------------------------------------------------------
if __name__ == "__main__":
    vocab_size = 50
    T, B = 8, 2

    key = jax.random.PRNGKey(0)
    k_params, k_src = jax.random.split(key)
    params = init_params(vocab_size, k_params)

    src = jax.random.randint(k_src, (T, B), 0, vocab_size, dtype=jnp.int32)
    src_len = jnp.array([T, 5], dtype=jnp.int32)   # max(src_len) == T (pad_packed shape)

    fwd = jax.jit(encoder_forward)
    outputs, (hidden, cell) = fwd(params, src, src_len)
    jax.block_until_ready((outputs, hidden, cell))

    assert outputs.shape == (T, B, 2 * config["enc_hid_dim"])
    assert hidden.shape == (1, B, config["dec_hid_dim"])
    assert cell.shape == (1, B, config["dec_hid_dim"])

    ro, (rh, rc) = jax.jit(_reference_forward)(params, src, src_len)
    assert float(jnp.max(jnp.abs(outputs - ro))) < 2e-2
    assert float(jnp.max(jnp.abs(hidden - rh))) < 2e-2
    assert float(jnp.max(jnp.abs(cell - rc))) < 2e-2

    print("KERNEL_OK")
</pallas_src>

<mosaic_0001>
module attributes {stable_mosaic.version = 11 : i64} {
  func.func @_encoder_kernel(%arg0: memref<64x1xi32, #tpu.memory_space<vmem>>, %arg1: memref<16x1xi32, #tpu.memory_space<vmem>>, %arg2: memref<128x256xbf16, #tpu.memory_space<vmem>>, %arg3: memref<2x128xf32, #tpu.memory_space<vmem>>, %arg4: memref<64x128xbf16, #tpu.memory_space<vmem>>, %arg5: memref<64x256xbf16, #tpu.memory_space<vmem>>, %arg6: memref<2x128xf32, #tpu.memory_space<vmem>>, %arg7: memref<64x128xbf16, #tpu.memory_space<vmem>>, %arg8: memref<64x32xbf16, #tpu.memory_space<vmem>>, %arg9: memref<1x32xf32, #tpu.memory_space<vmem>>, %arg10: memref<64x64xf32, #tpu.memory_space<vmem>>, %arg11: memref<16x32xf32, #tpu.memory_space<vmem>>, %arg12: memref<128x128xf32, #tpu.memory_space<vmem>>, %arg13: memref<128x32xf32, #tpu.memory_space<vmem>>) attributes {dimension_semantics = [], scalar_prefetch = 0 : i64, scratch_operands = 2 : i64, tpu.core_type = #tpu.core_type<tc>} {
    %c0 = arith.constant 0 : index
    %c0_0 = arith.constant 0 : index
    %0 = vector.load %arg1[%c0, %c0_0] : memref<16x1xi32, #tpu.memory_space<vmem>>, vector<16x1xi32>
    %1 = tpu.iota {dimensions = array<i32: 1>} : vector<16x128xi32>
    %c64_i32 = arith.constant 64 : i32
    %2 = vector.broadcast %c64_i32 : i32 to vector<16x128xi32>
    %3 = arith.cmpi sge, %1, %2 : vector<16x128xi32>
    %c96_i32 = arith.constant 96 : i32
    %4 = vector.broadcast %c96_i32 : i32 to vector<16x128xi32>
    %5 = arith.cmpi slt, %1, %4 : vector<16x128xi32>
    %6 = arith.andi %3, %5 : vector<16x128xi1>
    %cst = arith.constant 1.000000e+00 : f32
    %cst_1 = arith.constant 5.000000e-01 : f32
    %7 = vector.broadcast %cst : f32 to vector<16x128xf32>
    %8 = vector.broadcast %cst_1 : f32 to vector<16x128xf32>
    %9 = arith.select %6, %7, %8 : vector<16x128xi1>, vector<16x128xf32>
    %cst_2 = arith.constant 0.000000e+00 : f32
    %cst_3 = arith.constant 5.000000e-01 : f32
    %10 = vector.broadcast %cst_2 : f32 to vector<16x128xf32>
    %11 = vector.broadcast %cst_3 : f32 to vector<16x128xf32>
    %12 = arith.select %6, %10, %11 : vector<16x128xi1>, vector<16x128xf32>
    %13 = tpu.iota {dimensions = array<i32: 0>} : vector<16x64xi32>
    %14 = tpu.iota {dimensions = array<i32: 1>} : vector<16x64xi32>
    %c8_i32 = arith.constant 8 : i32
    %15 = vector.broadcast %c8_i32 : i32 to vector<16x64xi32>
    %16 = arith.cmpi slt, %13, %15 : vector<16x64xi32>
    %c32_i32 = arith.constant 32 : i32
    %17 = vector.broadcast %c32_i32 : i32 to vector<16x64xi32>
    %18 = arith.cmpi slt, %14, %17 : vector<16x64xi32>
    %19 = arith.xori %16, %18 : vector<16x64xi1>
    %cst_4 = arith.constant dense<true> : vector<16x64xi1>
    %20 = arith.xori %19, %cst_4 : vector<16x64xi1>
    %21 = tpu.iota {dimensions = array<i32: 0>} : vector<8x16x32xi32>
    %22 = tpu.iota {dimensions = array<i32: 1>} : vector<8x16x32xi32>
    %c8_i32_5 = arith.constant 8 : i32
    %23 = vector.broadcast %c8_i32_5 : i32 to vector<8x16x32xi32>
    %24 = arith.cmpi slt, %22, %23 : vector<8x16x32xi32>
    %c7_i32 = arith.constant 7 : i32
    %25 = vector.broadcast %c7_i32 : i32 to vector<8x16x32xi32>
    %26 = arith.subi %25, %21 : vector<8x16x32xi32>
    %27 = arith.select %24, %21, %26 : vector<8x16x32xi1>, vector<8x16x32xi32>
    %28 = vector.shape_cast %0 : vector<16x1xi32> to vector<1x16x1xi32>
    %29 = vector.broadcast %28 : vector<1x16x1xi32> to vector<8x16x32xi32>
    %30 = arith.cmpi slt, %27, %29 : vector<8x16x32xi32>
    %c0_6 = arith.constant 0 : index
    %c0_7 = arith.constant 0 : index
    %31 = vector.load %arg0[%c0_6, %c0_7] : memref<64x1xi32, #tpu.memory_space<vmem>>, vector<64x1xi32>
    %32 = tpu.iota {dimensions = array<i32: 1>} : vector<64x128xi32>
    %33 = vector.broadcast %31 : vector<64x1xi32> to vector<64x128xi32>
    %34 = arith.cmpi eq, %33, %32 : vector<64x128xi32>
    %35 = arith.extui %34 : vector<64x128xi1> to vector<64x128xi32>
    %36 = arith.sitofp %35 : vector<64x128xi32> to vector<64x128xf32>
    %37 = arith.truncf %36 : vector<64x128xf32> to vector<64x128xbf16>
    %c0_8 = arith.constant 0 : index
    %c0_9 = arith.constant 0 : index
    %38 = vector.load %arg2[%c0_8, %c0_9] : memref<128x256xbf16, #tpu.memory_space<vmem>>, vector<128x256xbf16>
    %cst_10 = arith.constant dense<0.000000e+00> : vector<64x256xf32>
    %39 = tpu.matmul %37, %38, %cst_10 {dimension_numbers = #tpu.dot_dimension_numbers<[1], [0], [0], [1], [0, 0, 1, 1], [], []>} : vector<64x128xbf16>, vector<128x256xbf16>, vector<64x256xf32> -> vector<64x256xf32>
    %c0_11 = arith.constant 0 : index
    %c0_12 = arith.constant 0 : index
    %40 = vector.load %arg3[%c0_11, %c0_12] : memref<2x128xf32, #tpu.memory_space<vmem>>, vector<2x128xf32>
    %41 = vector.extract_strided_slice %39 {offsets = [0, 0], sizes = [64, 128], strides = [1, 1]} : vector<64x256xf32> to vector<64x128xf32>
    %42 = vector.extract_strided_slice %40 {offsets = [0, 0], sizes = [1, 128], strides = [1, 1]} : vector<2x128xf32> to vector<1x128xf32>
    %43 = vector.broadcast %42 : vector<1x128xf32> to vector<64x128xf32>
    %44 = arith.addf %41, %43 : vector<64x128xf32>
    %45 = vector.extract_strided_slice %39 {offsets = [0, 128], sizes = [64, 128], strides = [1, 1]} : vector<64x256xf32> to vector<64x128xf32>
    %46 = vector.extract_strided_slice %40 {offsets = [1, 0], sizes = [1, 128], strides = [1, 1]} : vector<2x128xf32> to vector<1x128xf32>
    %47 = vector.broadcast %46 : vector<1x128xf32> to vector<64x128xf32>
    %48 = arith.addf %45, %47 : vector<64x128xf32>
    %49 = vector.extract_strided_slice %44 {offsets = [0, 0], sizes = [8, 128], strides = [1, 1]} : vector<64x128xf32> to vector<8x128xf32>
    %c0_13 = arith.constant 0 : index
    %c0_14 = arith.constant 0 : index
    %50 = vector.load %arg12[%c0_13, %c0_14] : memref<128x128xf32, #tpu.memory_space<vmem>>, vector<8x128xf32>
    tpu.vector_store %arg12[%c0_13, %c0_14], %49 {strides = array<i32>} : memref<128x128xf32, #tpu.memory_space<vmem>>, vector<8x128xf32>,
    %51 = vector.extract_strided_slice %48 {offsets = [0, 0], sizes = [8, 128], strides = [1, 1]} : vector<64x128xf32> to vector<8x128xf32>
    %c120 = arith.constant 120 : index
    %c0_15 = arith.constant 0 : index
    %52 = vector.load %arg12[%c120, %c0_15] : memref<128x128xf32, #tpu.memory_space<vmem>>, vector<8x128xf32>
    tpu.vector_store %arg12[%c120, %c0_15], %51 {strides = array<i32>} : memref<128x128xf32, #tpu.memory_space<vmem>>, vector<8x128xf32>,
    %53 = vector.extract_strided_slice %44 {offsets = [8, 0], sizes = [8, 128], strides = [1, 1]} : vector<64x128xf32> to vector<8x128xf32>
    %c16 = arith.constant 16 : index
    %c0_16 = arith.constant 0 : index
    %54 = vector.load %arg12[%c16, %c0_16] : memref<128x128xf32, #tpu.memory_space<vmem>>, vector<8x128xf32>
    tpu.vector_store %arg12[%c16, %c0_16], %53 {strides = array<i32>} : memref<128x128xf32, #tpu.memory_space<vmem>>, vector<8x128xf32>,
    %55 = vector.extract_strided_slice %48 {offsets = [8, 0], sizes = [8, 128], strides = [1, 1]} : vector<64x128xf32> to vector<8x128xf32>
    %c104 = arith.constant 104 : index
    %c0_17 = arith.constant 0 : index
    %56 = vector.load %arg12[%c104, %c0_17] : memref<128x128xf32, #tpu.memory_space<vmem>>, vector<8x128xf32>
    tpu.vector_store %arg12[%c104, %c0_17], %55 {strides = array<i32>} : memref<128x128xf32, #tpu.memory_space<vmem>>, vector<8x128xf32>,
    %57 = vector.extract_strided_slice %44 {offsets = [16, 0], sizes = [8, 128], strides = [1, 1]} : vector<64x128xf32> to vector<8x128xf32>
    %c32 = arith.constant 32 : index
    %c0_18 = arith.constant 0 : index
    %58 = vector.load %arg12[%c32, %c0_18] : memref<128x128xf32, #tpu.memory_space<vmem>>, vector<8x128xf32>
    tpu.vector_store %arg12[%c32, %c0_18], %57 {strides = array<i32>} : memref<128x128xf32, #tpu.memory_space<vmem>>, vector<8x128xf32>,
    %59 = vector.extract_strided_slice %48 {offsets = [16, 0], sizes = [8, 128], strides = [1, 1]} : vector<64x128xf32> to vector<8x128xf32>
    %c88 = arith.constant 88 : index
    %c0_19 = arith.constant 0 : index
    %60 = vector.load %arg12[%c88, %c0_19] : memref<128x128xf32, #tpu.memory_space<vmem>>, vector<8x128xf32>
    tpu.vector_store %arg12[%c88, %c0_19], %59 {strides = array<i32>} : memref<128x128xf32, #tpu.memory_space<vmem>>, vector<8x128xf32>,
    %61 = vector.extract_strided_slice %44 {offsets = [24, 0], sizes = [8, 128], strides = [1, 1]} : vector<64x128xf32> to vector<8x128xf32>
    %c48 = arith.constant 48 : index
    %c0_20 = arith.constant 0 : index
    %62 = vector.load %arg12[%c48, %c0_20] : memref<128x128xf32, #tpu.memory_space<vmem>>, vector<8x128xf32>
    tpu.vector_store %arg12[%c48, %c0_20], %61 {strides = array<i32>} : memref<128x128xf32, #tpu.memory_space<vmem>>, vector<8x128xf32>,
    %63 = vector.extract_strided_slice %48 {offsets = [24, 0], sizes = [8, 128], strides = [1, 1]} : vector<64x128xf32> to vector<8x128xf32>
    %c72 = arith.constant 72 : index
    %c0_21 = arith.constant 0 : index
    %64 = vector.load %arg12[%c72, %c0_21] : memref<128x128xf32, #tpu.memory_space<vmem>>, vector<8x128xf32>
    tpu.vector_store %arg12[%c72, %c0_21], %63 {strides = array<i32>} : memref<128x128xf32, #tpu.memory_space<vmem>>, vector<8x128xf32>,
    %65 = vector.extract_strided_slice %44 {offsets = [32, 0], sizes = [8, 128], strides = [1, 1]} : vector<64x128xf32> to vector<8x128xf32>
    %c64 = arith.constant 64 : index
    %c0_22 = arith.constant 0 : index
    %66 = vector.load %arg12[%c64, %c0_22] : memref<128x128xf32, #tpu.memory_space<vmem>>, vector<8x128xf32>
    tpu.vector_store %arg12[%c64, %c0_22], %65 {strides = array<i32>} : memref<128x128xf32, #tpu.memory_space<vmem>>, vector<8x128xf32>,
    %67 = vector.extract_strided_slice %48 {offsets = [32, 0], sizes = [8, 128], strides = [1, 1]} : vector<64x128xf32> to vector<8x128xf32>
    %c56 = arith.constant 56 : index
    %c0_23 = arith.constant 0 : index
    %68 = vector.load %arg12[%c56, %c0_23] : memref<128x128xf32, #tpu.memory_space<vmem>>, vector<8x128xf32>
    tpu.vector_store %arg12[%c56, %c0_23], %67 {strides = array<i32>} : memref<128x128xf32, #tpu.memory_space<vmem>>, vector<8x128xf32>,
    %69 = vector.extract_strided_slice %44 {offsets = [40, 0], sizes = [8, 128], strides = [1, 1]} : vector<64x128xf32> to vector<8x128xf32>
    %c80 = arith.constant 80 : index
    %c0_24 = arith.constant 0 : index
    %70 = vector.load %arg12[%c80, %c0_24] : memref<128x128xf32, #tpu.memory_space<vmem>>, vector<8x128xf32>
    tpu.vector_store %arg12[%c80, %c0_24], %69 {strides = array<i32>} : memref<128x128xf32, #tpu.memory_space<vmem>>, vector<8x128xf32>,
    %71 = vector.extract_strided_slice %48 {offsets = [40, 0], sizes = [8, 128], strides = [1, 1]} : vector<64x128xf32> to vector<8x128xf32>
    %c40 = arith.constant 40 : index
    %c0_25 = arith.constant 0 : index
    %72 = vector.load %arg12[%c40, %c0_25] : memref<128x128xf32, #tpu.memory_space<vmem>>, vector<8x128xf32>
    tpu.vector_store %arg12[%c40, %c0_25], %71 {strides = array<i32>} : memref<128x128xf32, #tpu.memory_space<vmem>>, vector<8x128xf32>,
    %73 = vector.extract_strided_slice %44 {offsets = [48, 0], sizes = [8, 128], strides = [1, 1]} : vector<64x128xf32> to vector<8x128xf32>
    %c96 = arith.constant 96 : index
    %c0_26 = arith.constant 0 : index
    %74 = vector.load %arg12[%c96, %c0_26] : memref<128x128xf32, #tpu.memory_space<vmem>>, vector<8x128xf32>
    tpu.vector_store %arg12[%c96, %c0_26], %73 {strides = array<i32>} : memref<128x128xf32, #tpu.memory_space<vmem>>, vector<8x128xf32>,
    %75 = vector.extract_strided_slice %48 {offsets = [48, 0], sizes = [8, 128], strides = [1, 1]} : vector<64x128xf32> to vector<8x128xf32>
    %c24 = arith.constant 24 : index
    %c0_27 = arith.constant 0 : index
    %76 = vector.load %arg12[%c24, %c0_27] : memref<128x128xf32, #tpu.memory_space<vmem>>, vector<8x128xf32>
    tpu.vector_store %arg12[%c24, %c0_27], %75 {strides = array<i32>} : memref<128x128xf32, #tpu.memory_space<vmem>>, vector<8x128xf32>,
    %77 = vector.extract_strided_slice %44 {offsets = [56, 0], sizes = [8, 128], strides = [1, 1]} : vector<64x128xf32> to vector<8x128xf32>
    %c112 = arith.constant 112 : index
    %c0_28 = arith.constant 0 : index
    %78 = vector.load %arg12[%c112, %c0_28] : memref<128x128xf32, #tpu.memory_space<vmem>>, vector<8x128xf32>
    tpu.vector_store %arg12[%c112, %c0_28], %77 {strides = array<i32>} : memref<128x128xf32, #tpu.memory_space<vmem>>, vector<8x128xf32>,
    %79 = vector.extract_strided_slice %48 {offsets = [56, 0], sizes = [8, 128], strides = [1, 1]} : vector<64x128xf32> to vector<8x128xf32>
    %c8 = arith.constant 8 : index
    %c0_29 = arith.constant 0 : index
    %80 = vector.load %arg12[%c8, %c0_29] : memref<128x128xf32, #tpu.memory_space<vmem>>, vector<8x128xf32>
    tpu.vector_store %arg12[%c8, %c0_29], %79 {strides = array<i32>} : memref<128x128xf32, #tpu.memory_space<vmem>>, vector<8x128xf32>,
    %c0_30 = arith.constant 0 : index
    %c0_31 = arith.constant 0 : index
    %81 = vector.load %arg4[%c0_30, %c0_31] : memref<64x128xbf16, #tpu.memory_space<vmem>>, vector<64x128xbf16>
    %cst_32 = arith.constant 0.000000e+00 : f32
    %82 = vector.broadcast %cst_32 : f32 to vector<16x32xf32>
    %cst_33 = arith.constant 0.000000e+00 : f32
    %83 = vector.broadcast %cst_33 : f32 to vector<16x32xf32>
    %c0_34 = arith.constant 0 : index
    %c0_35 = arith.constant 0 : index
    %84 = vector.load %arg12[%c0_34, %c0_35] : memref<128x128xf32, #tpu.memory_space<vmem>>, vector<16x128xf32>
    %85 = arith.truncf %82 : vector<16x32xf32> to vector<16x32xbf16>
    %86 = tpu.concatenate %85, %85 in 1 : vector<16x32xbf16>, vector<16x32xbf16> -> vector<16x64xbf16>
    %cst_36 = arith.constant 0.000000e+00 : f32
    %87 = arith.truncf %cst_36 : f32 to bf16
    %88 = vector.broadcast %87 : bf16 to vector<16x64xbf16>
    %89 = arith.select %20, %86, %88 : vector<16x64xi1>, vector<16x64xbf16>
    %cst_37 = arith.constant dense<0.000000e+00> : vector<16x128xf32>
    %90 = tpu.matmul %89, %81, %cst_37 {dimension_numbers = #tpu.dot_dimension_numbers<[1], [0], [0], [1], [0, 0, 1, 1], [], []>} : vector<16x64xbf16>, vector<64x128xbf16>, vector<16x128xf32> -> vector<16x128xf32>
    %91 = arith.addf %84, %90 : vector<16x128xf32>
    %92 = arith.mulf %91, %9 : vector<16x128xf32>
    %93 = math.tanh %92 : vector<16x128xf32>
    %94 = arith.mulf %93, %9 : vector<16x128xf32>
    %95 = arith.addf %94, %12 : vector<16x128xf32>
    %96 = vector.extract_strided_slice %95 {offsets = [0, 0], sizes = [16, 32], strides = [1, 1]} : vector<16x128xf32> to vector<16x32xf32>
    %97 = vector.extract_strided_slice %95 {offsets = [0, 32], sizes = [16, 32], strides = [1, 1]} : vector<16x128xf32> to vector<16x32xf32>
    %98 = vector.extract_strided_slice %95 {offsets = [0, 64], sizes = [16, 32], strides = [1, 1]} : vector<16x128xf32> to vector<16x32xf32>
    %99 = vector.extract_strided_slice %95 {offsets = [0, 96], sizes = [16, 32], strides = [1, 1]} : vector<16x128xf32> to vector<16x32xf32>
    %100 = arith.mulf %97, %83 : vector<16x32xf32>
    %101 = arith.mulf %96, %98 : vector<16x32xf32>
    %102 = arith.addf %100, %101 : vector<16x32xf32>
    %103 = math.tanh %102 : vector<16x32xf32>
    %104 = arith.mulf %99, %103 : vector<16x32xf32>
    %105 = vector.extract_strided_slice %30 {offsets = [0, 0, 0], sizes = [1, 16, 32], strides = [1, 1, 1]} : vector<8x16x32xi1> to vector<1x16x32xi1>
    %106 = vector.shape_cast %105 : vector<1x16x32xi1> to vector<16x32xi1>
    %107 = arith.select %106, %104, %82 : vector<16x32xi1>, vector<16x32xf32>
    %108 = arith.select %106, %102, %83 : vector<16x32xi1>, vector<16x32xf32>
    %cst_38 = arith.constant 0.000000e+00 : f32
    %109 = vector.broadcast %cst_38 : f32 to vector<16x32xf32>
    %110 = arith.select %106, %104, %109 : vector<16x32xi1>, vector<16x32xf32>
    %111 = vector.extract_strided_slice %110 {offsets = [0, 0], sizes = [8, 32], strides = [1, 1]} : vector<16x32xf32> to vector<8x32xf32>
    %c0_39 = arith.constant 0 : index
    %c0_40 = arith.constant 0 : index
    %112 = vector.load %arg13[%c0_39, %c0_40] : memref<128x32xf32, #tpu.memory_space<vmem>>, vector<8x32xf32>
    tpu.vector_store %arg13[%c0_39, %c0_40], %111 {strides = array<i32>} : memref<128x32xf32, #tpu.memory_space<vmem>>, vector<8x32xf32>,
    %113 = vector.extract_strided_slice %110 {offsets = [8, 0], sizes = [8, 32], strides = [1, 1]} : vector<16x32xf32> to vector<8x32xf32>
    %c120_41 = arith.constant 120 : index
    %c0_42 = arith.constant 0 : index
    %114 = vector.load %arg13[%c120_41, %c0_42] : memref<128x32xf32, #tpu.memory_space<vmem>>, vector<8x32xf32>
    tpu.vector_store %arg13[%c120_41, %c0_42], %113 {strides = array<i32>} : memref<128x32xf32, #tpu.memory_space<vmem>>, vector<8x32xf32>,
    %c16_43 = arith.constant 16 : index
    %c0_44 = arith.constant 0 : index
    %115 = vector.load %arg12[%c16_43, %c0_44] : memref<128x128xf32, #tpu.memory_space<vmem>>, vector<16x128xf32>
    %116 = arith.truncf %107 : vector<16x32xf32> to vector<16x32xbf16>
    %117 = tpu.concatenate %116, %116 in 1 : vector<16x32xbf16>, vector<16x32xbf16> -> vector<16x64xbf16>
    %cst_45 = arith.constant 0.000000e+00 : f32
    %118 = arith.truncf %cst_45 : f32 to bf16
    %119 = vector.broadcast %118 : bf16 to vector<16x64xbf16>
    %120 = arith.select %20, %117, %119 : vector<16x64xi1>, vector<16x64xbf16>
    %cst_46 = arith.constant dense<0.000000e+00> : vector<16x128xf32>
    %121 = tpu.matmul %120, %81, %cst_46 {dimension_numbers = #tpu.dot_dimension_numbers<[1], [0], [0], [1], [0, 0, 1, 1], [], []>} : vector<16x64xbf16>, vector<64x128xbf16>, vector<16x128xf32> -> vector<16x128xf32>
    %122 = arith.addf %115, %121 : vector<16x128xf32>
    %123 = arith.mulf %122, %9 : vector<16x128xf32>
    %124 = math.tanh %123 : vector<16x128xf32>
    %125 = arith.mulf %124, %9 : vector<16x128xf32>
    %126 = arith.addf %125, %12 : vector<16x128xf32>
    %127 = vector.extract_strided_slice %126 {offsets = [0, 0], sizes = [16, 32], strides = [1, 1]} : vector<16x128xf32> to vector<16x32xf32>
    %128 = vector.extract_strided_slice %126 {offsets = [0, 32], sizes = [16, 32], strides = [1, 1]} : vector<16x128xf32> to vector<16x32xf32>
    %129 = vector.extract_strided_slice %126 {offsets = [0, 64], sizes = [16, 32], strides = [1, 1]} : vector<16x128xf32> to vector<16x32xf32>
    %130 = vector.extract_strided_slice %126 {offsets = [0, 96], sizes = [16, 32], strides = [1, 1]} : vector<16x128xf32> to vector<16x32xf32>
    %131 = arith.mulf %128, %108 : vector<16x32xf32>
    %132 = arith.mulf %127, %129 : vector<16x32xf32>
    %133 = arith.addf %131, %132 : vector<16x32xf32>
    %134 = math.tanh %133 : vector<16x32xf32>
    %135 = arith.mulf %130, %134 : vector<16x32xf32>
    %136 = vector.extract_strided_slice %30 {offsets = [1, 0, 0], sizes = [1, 16, 32], strides = [1, 1, 1]} : vector<8x16x32xi1> to vector<1x16x32xi1>
    %137 = vector.shape_cast %136 : vector<1x16x32xi1> to vector<16x32xi1>
    %138 = arith.select %137, %135, %107 : vector<16x32xi1>, vector<16x32xf32>
    %139 = arith.select %137, %133, %108 : vector<16x32xi1>, vector<16x32xf32>
    %cst_47 = arith.constant 0.000000e+00 : f32
    %140 = vector.broadcast %cst_47 : f32 to vector<16x32xf32>
    %141 = arith.select %137, %135, %140 : vector<16x32xi1>, vector<16x32xf32>
    %142 = vector.extract_strided_slice %141 {offsets = [0, 0], sizes = [8, 32], strides = [1, 1]} : vector<16x32xf32> to vector<8x32xf32>
    %c8_48 = arith.constant 8 : index
    %c0_49 = arith.constant 0 : index
    %143 = vector.load %arg13[%c8_48, %c0_49] : memref<128x32xf32, #tpu.memory_space<vmem>>, vector<8x32xf32>
    tpu.vector_store %arg13[%c8_48, %c0_49], %142 {strides = array<i32>} : memref<128x32xf32, #tpu.memory_space<vmem>>, vector<8x32xf32>,
    %144 = vector.extract_strided_slice %141 {offsets = [8, 0], sizes = [8, 32], strides = [1, 1]} : vector<16x32xf32> to vector<8x32xf32>
    %c112_50 = arith.constant 112 : index
    %c0_51 = arith.constant 0 : index
    %145 = vector.load %arg13[%c112_50, %c0_51] : memref<128x32xf32, #tpu.memory_space<vmem>>, vector<8x32xf32>
    tpu.vector_store %arg13[%c112_50, %c0_51], %144 {strides = array<i32>} : memref<128x32xf32, #tpu.memory_space<vmem>>, vector<8x32xf32>,
    %c32_52 = arith.constant 32 : index
    %c0_53 = arith.constant 0 : index
    %146 = vector.load %arg12[%c32_52, %c0_53] : memref<128x128xf32, #tpu.memory_space<vmem>>, vector<16x128xf32>
    %147 = arith.truncf %138 : vector<16x32xf32> to vector<16x32xbf16>
    %148 = tpu.concatenate %147, %147 in 1 : vector<16x32xbf16>, vector<16x32xbf16> -> vector<16x64xbf16>
    %cst_54 = arith.constant 0.000000e+00 : f32
    %149 = arith.truncf %cst_54 : f32 to bf16
    %150 = vector.broadcast %149 : bf16 to vector<16x64xbf16>
    %151 = arith.select %20, %148, %150 : vector<16x64xi1>, vector<16x64xbf16>
    %cst_55 = arith.constant dense<0.000000e+00> : vector<16x128xf32>
    %152 = tpu.matmul %151, %81, %cst_55 {dimension_numbers = #tpu.dot_dimension_numbers<[1], [0], [0], [1], [0, 0, 1, 1], [], []>} : vector<16x64xbf16>, vector<64x128xbf16>, vector<16x128xf32> -> vector<16x128xf32>
    %153 = arith.addf %146, %152 : vector<16x128xf32>
    %154 = arith.mulf %153, %9 : vector<16x128xf32>
    %155 = math.tanh %154 : vector<16x128xf32>
    %156 = arith.mulf %155, %9 : vector<16x128xf32>
    %157 = arith.addf %156, %12 : vector<16x128xf32>
    %158 = vector.extract_strided_slice %157 {offsets = [0, 0], sizes = [16, 32], strides = [1, 1]} : vector<16x128xf32> to vector<16x32xf32>
    %159 = vector.extract_strided_slice %157 {offsets = [0, 32], sizes = [16, 32], strides = [1, 1]} : vector<16x128xf32> to vector<16x32xf32>
    %160 = vector.extract_strided_slice %157 {offsets = [0, 64], sizes = [16, 32], strides = [1, 1]} : vector<16x128xf32> to vector<16x32xf32>
    %161 = vector.extract_strided_slice %157 {offsets = [0, 96], sizes = [16, 32], strides = [1, 1]} : vector<16x128xf32> to vector<16x32xf32>
    %162 = arith.mulf %159, %139 : vector<16x32xf32>
    %163 = arith.mulf %158, %160 : vector<16x32xf32>
    %164 = arith.addf %162, %163 : vector<16x32xf32>
    %165 = math.tanh %164 : vector<16x32xf32>
    %166 = arith.mulf %161, %165 : vector<16x32xf32>
    %167 = vector.extract_strided_slice %30 {offsets = [2, 0, 0], sizes = [1, 16, 32], strides = [1, 1, 1]} : vector<8x16x32xi1> to vector<1x16x32xi1>
    %168 = vector.shape_cast %167 : vector<1x16x32xi1> to vector<16x32xi1>
    %169 = arith.select %168, %166, %138 : vector<16x32xi1>, vector<16x32xf32>
    %170 = arith.select %168, %164, %139 : vector<16x32xi1>, vector<16x32xf32>
    %cst_56 = arith.constant 0.000000e+00 : f32
    %171 = vector.broadcast %cst_56 : f32 to vector<16x32xf32>
    %172 = arith.select %168, %166, %171 : vector<16x32xi1>, vector<16x32xf32>
    %173 = vector.extract_strided_slice %172 {offsets = [0, 0], sizes = [8, 32], strides = [1, 1]} : vector<16x32xf32> to vector<8x32xf32>
    %c16_57 = arith.constant 16 : index
    %c0_58 = arith.constant 0 : index
    %174 = vector.load %arg13[%c16_57, %c0_58] : memref<128x32xf32, #tpu.memory_space<vmem>>, vector<8x32xf32>
    tpu.vector_store %arg13[%c16_57, %c0_58], %173 {strides = array<i32>} : memref<128x32xf32, #tpu.memory_space<vmem>>, vector<8x32xf32>,
    %175 = vector.extract_strided_slice %172 {offsets = [8, 0], sizes = [8, 32], strides = [1, 1]} : vector<16x32xf32> to vector<8x32xf32>
    %c104_59 = arith.constant 104 : index
    %c0_60 = arith.constant 0 : index
    %176 = vector.load %arg13[%c104_59, %c0_60] : memref<128x32xf32, #tpu.memory_space<vmem>>, vector<8x32xf32>
    tpu.vector_store %arg13[%c104_59, %c0_60], %175 {strides = array<i32>} : memref<128x32xf32, #tpu.memory_space<vmem>>, vector<8x32xf32>,
    %c48_61 = arith.constant 48 : index
    %c0_62 = arith.constant 0 : index
    %177 = vector.load %arg12[%c48_61, %c0_62] : memref<128x128xf32, #tpu.memory_space<vmem>>, vector<16x128xf32>
    %178 = arith.truncf %169 : vector<16x32xf32> to vector<16x32xbf16>
    %179 = tpu.concatenate %178, %178 in 1 : vector<16x32xbf16>, vector<16x32xbf16> -> vector<16x64xbf16>
    %cst_63 = arith.constant 0.000000e+00 : f32
    %180 = arith.truncf %cst_63 : f32 to bf16
    %181 = vector.broadcast %180 : bf16 to vector<16x64xbf16>
    %182 = arith.select %20, %179, %181 : vector<16x64xi1>, vector<16x64xbf16>
    %cst_64 = arith.constant dense<0.000000e+00> : vector<16x128xf32>
    %183 = tpu.matmul %182, %81, %cst_64 {dimension_numbers = #tpu.dot_dimension_numbers<[1], [0], [0], [1], [0, 0, 1, 1], [], []>} : vector<16x64xbf16>, vector<64x128xbf16>, vector<16x128xf32> -> vector<16x128xf32>
    %184 = arith.addf %177, %183 : vector<16x128xf32>
    %185 = arith.mulf %184, %9 : vector<16x128xf32>
    %186 = math.tanh %185 : vector<16x128xf32>
    %187 = arith.mulf %186, %9 : vector<16x128xf32>
    %188 = arith.addf %187, %12 : vector<16x128xf32>
    %189 = vector.extract_strided_slice %188 {offsets = [0, 0], sizes = [16, 32], strides = [1, 1]} : vector<16x128xf32> to vector<16x32xf32>
    %190 = vector.extract_strided_slice %188 {offsets = [0, 32], sizes = [16, 32], strides = [1, 1]} : vector<16x128xf32> to vector<16x32xf32>
    %191 = vector.extract_strided_slice %188 {offsets = [0, 64], sizes = [16, 32], strides = [1, 1]} : vector<16x128xf32> to vector<16x32xf32>
    %192 = vector.extract_strided_slice %188 {offsets = [0, 96], sizes = [16, 32], strides = [1, 1]} : vector<16x128xf32> to vector<16x32xf32>
    %193 = arith.mulf %190, %170 : vector<16x32xf32>
    %194 = arith.mulf %189, %191 : vector<16x32xf32>
    %195 = arith.addf %193, %194 : vector<16x32xf32>
    %196 = math.tanh %195 : vector<16x32xf32>
    %197 = arith.mulf %192, %196 : vector<16x32xf32>
    %198 = vector.extract_strided_slice %30 {offsets = [3, 0, 0], sizes = [1, 16, 32], strides = [1, 1, 1]} : vector<8x16x32xi1> to vector<1x16x32xi1>
    %199 = vector.shape_cast %198 : vector<1x16x32xi1> to vector<16x32xi1>
    %200 = arith.select %199, %197, %169 : vector<16x32xi1>, vector<16x32xf32>
    %201 = arith.select %199, %195, %170 : vector<16x32xi1>, vector<16x32xf32>
    %cst_65 = arith.constant 0.000000e+00 : f32
    %202 = vector.broadcast %cst_65 : f32 to vector<16x32xf32>
    %203 = arith.select %199, %197, %202 : vector<16x32xi1>, vector<16x32xf32>
    %204 = vector.extract_strided_slice %203 {offsets = [0, 0], sizes = [8, 32], strides = [1, 1]} : vector<16x32xf32> to vector<8x32xf32>
    %c24_66 = arith.constant 24 : index
    %c0_67 = arith.constant 0 : index
    %205 = vector.load %arg13[%c24_66, %c0_67] : memref<128x32xf32, #tpu.memory_space<vmem>>, vector<8x32xf32>
    tpu.vector_store %arg13[%c24_66, %c0_67], %204 {strides = array<i32>} : memref<128x32xf32, #tpu.memory_space<vmem>>, vector<8x32xf32>,
    %206 = vector.extract_strided_slice %203 {offsets = [8, 0], sizes = [8, 32], strides = [1, 1]} : vector<16x32xf32> to vector<8x32xf32>
    %c96_68 = arith.constant 96 : index
    %c0_69 = arith.constant 0 : index
    %207 = vector.load %arg13[%c96_68, %c0_69] : memref<128x32xf32, #tpu.memory_space<vmem>>, vector<8x32xf32>
    tpu.vector_store %arg13[%c96_68, %c0_69], %206 {strides = array<i32>} : memref<128x32xf32, #tpu.memory_space<vmem>>, vector<8x32xf32>,
    %c64_70 = arith.constant 64 : index
    %c0_71 = arith.constant 0 : index
    %208 = vector.load %arg12[%c64_70, %c0_71] : memref<128x128xf32, #tpu.memory_space<vmem>>, vector<16x128xf32>
    %209 = arith.truncf %200 : vector<16x32xf32> to vector<16x32xbf16>
    %210 = tpu.concatenate %209, %209 in 1 : vector<16x32xbf16>, vector<16x32xbf16> -> vector<16x64xbf16>
    %cst_72 = arith.constant 0.000000e+00 : f32
    %211 = arith.truncf %cst_72 : f32 to bf16
    %212 = vector.broadcast %211 : bf16 to vector<16x64xbf16>
    %213 = arith.select %20, %210, %212 : vector<16x64xi1>, vector<16x64xbf16>
    %cst_73 = arith.constant dense<0.000000e+00> : vector<16x128xf32>
    %214 = tpu.matmul %213, %81, %cst_73 {dimension_numbers = #tpu.dot_dimension_numbers<[1], [0], [0], [1], [0, 0, 1, 1], [], []>} : vector<16x64xbf16>, vector<64x128xbf16>, vector<16x128xf32> -> vector<16x128xf32>
    %215 = arith.addf %208, %214 : vector<16x128xf32>
    %216 = arith.mulf %215, %9 : vector<16x128xf32>
    %217 = math.tanh %216 : vector<16x128xf32>
    %218 = arith.mulf %217, %9 : vector<16x128xf32>
    %219 = arith.addf %218, %12 : vector<16x128xf32>
    %220 = vector.extract_strided_slice %219 {offsets = [0, 0], sizes = [16, 32], strides = [1, 1]} : vector<16x128xf32> to vector<16x32xf32>
    %221 = vector.extract_strided_slice %219 {offsets = [0, 32], sizes = [16, 32], strides = [1, 1]} : vector<16x128xf32> to vector<16x32xf32>
    %222 = vector.extract_strided_slice %219 {offsets = [0, 64], sizes = [16, 32], strides = [1, 1]} : vector<16x128xf32> to vector<16x32xf32>
    %223 = vector.extract_strided_slice %219 {offsets = [0, 96], sizes = [16, 32], strides = [1, 1]} : vector<16x128xf32> to vector<16x32xf32>
    %224 = arith.mulf %221, %201 : vector<16x32xf32>
    %225 = arith.mulf %220, %222 : vector<16x32xf32>
    %226 = arith.addf %224, %225 : vector<16x32xf32>
    %227 = math.tanh %226 : vector<16x32xf32>
    %228 = arith.mulf %223, %227 : vector<16x32xf32>
    %229 = vector.extract_strided_slice %30 {offsets = [4, 0, 0], sizes = [1, 16, 32], strides = [1, 1, 1]} : vector<8x16x32xi1> to vector<1x16x32xi1>
    %230 = vector.shape_cast %229 : vector<1x16x32xi1> to vector<16x32xi1>
    %231 = arith.select %230, %228, %200 : vector<16x32xi1>, vector<16x32xf32>
    %232 = arith.select %230, %226, %201 : vector<16x32xi1>, vector<16x32xf32>
    %cst_74 = arith.constant 0.000000e+00 : f32
    %233 = vector.broadcast %cst_74 : f32 to vector<16x32xf32>
    %234 = arith.select %230, %228, %233 : vector<16x32xi1>, vector<16x32xf32>
    %235 = vector.extract_strided_slice %234 {offsets = [0, 0], sizes = [8, 32], strides = [1, 1]} : vector<16x32xf32> to vector<8x32xf32>
    %c32_75 = arith.constant 32 : index
    %c0_76 = arith.constant 0 : index
    %236 = vector.load %arg13[%c32_75, %c0_76] : memref<128x32xf32, #tpu.memory_space<vmem>>, vector<8x32xf32>
    tpu.vector_store %arg13[%c32_75, %c0_76], %235 {strides = array<i32>} : memref<128x32xf32, #tpu.memory_space<vmem>>, vector<8x32xf32>,
    %237 = vector.extract_strided_slice %234 {offsets = [8, 0], sizes = [8, 32], strides = [1, 1]} : vector<16x32xf32> to vector<8x32xf32>
    %c88_77 = arith.constant 88 : index
    %c0_78 = arith.constant 0 : index
    %238 = vector.load %arg13[%c88_77, %c0_78] : memref<128x32xf32, #tpu.memory_space<vmem>>, vector<8x32xf32>
    tpu.vector_store %arg13[%c88_77, %c0_78], %237 {strides = array<i32>} : memref<128x32xf32, #tpu.memory_space<vmem>>, vector<8x32xf32>,
    %c80_79 = arith.constant 80 : index
    %c0_80 = arith.constant 0 : index
    %239 = vector.load %arg12[%c80_79, %c0_80] : memref<128x128xf32, #tpu.memory_space<vmem>>, vector<16x128xf32>
    %240 = arith.truncf %231 : vector<16x32xf32> to vector<16x32xbf16>
    %241 = tpu.concatenate %240, %240 in 1 : vector<16x32xbf16>, vector<16x32xbf16> -> vector<16x64xbf16>
    %cst_81 = arith.constant 0.000000e+00 : f32
    %242 = arith.truncf %cst_81 : f32 to bf16
    %243 = vector.broadcast %242 : bf16 to vector<16x64xbf16>
    %244 = arith.select %20, %241, %243 : vector<16x64xi1>, vector<16x64xbf16>
    %cst_82 = arith.constant dense<0.000000e+00> : vector<16x128xf32>
    %245 = tpu.matmul %244, %81, %cst_82 {dimension_numbers = #tpu.dot_dimension_numbers<[1], [0], [0], [1], [0, 0, 1, 1], [], []>} : vector<16x64xbf16>, vector<64x128xbf16>, vector<16x128xf32> -> vector<16x128xf32>
    %246 = arith.addf %239, %245 : vector<16x128xf32>
    %247 = arith.mulf %246, %9 : vector<16x128xf32>
    %248 = math.tanh %247 : vector<16x128xf32>
    %249 = arith.mulf %248, %9 : vector<16x128xf32>
    %250 = arith.addf %249, %12 : vector<16x128xf32>
    %251 = vector.extract_strided_slice %250 {offsets = [0, 0], sizes = [16, 32], strides = [1, 1]} : vector<16x128xf32> to vector<16x32xf32>
    %252 = vector.extract_strided_slice %250 {offsets = [0, 32], sizes = [16, 32], strides = [1, 1]} : vector<16x128xf32> to vector<16x32xf32>
    %253 = vector.extract_strided_slice %250 {offsets = [0, 64], sizes = [16, 32], strides = [1, 1]} : vector<16x128xf32> to vector<16x32xf32>
    %254 = vector.extract_strided_slice %250 {offsets = [0, 96], sizes = [16, 32], strides = [1, 1]} : vector<16x128xf32> to vector<16x32xf32>
    %255 = arith.mulf %252, %232 : vector<16x32xf32>
    %256 = arith.mulf %251, %253 : vector<16x32xf32>
    %257 = arith.addf %255, %256 : vector<16x32xf32>
    %258 = math.tanh %257 : vector<16x32xf32>
    %259 = arith.mulf %254, %258 : vector<16x32xf32>
    %260 = vector.extract_strided_slice %30 {offsets = [5, 0, 0], sizes = [1, 16, 32], strides = [1, 1, 1]} : vector<8x16x32xi1> to vector<1x16x32xi1>
    %261 = vector.shape_cast %260 : vector<1x16x32xi1> to vector<16x32xi1>
    %262 = arith.select %261, %259, %231 : vector<16x32xi1>, vector<16x32xf32>
    %263 = arith.select %261, %257, %232 : vector<16x32xi1>, vector<16x32xf32>
    %cst_83 = arith.constant 0.000000e+00 : f32
    %264 = vector.broadcast %cst_83 : f32 to vector<16x32xf32>
    %265 = arith.select %261, %259, %264 : vector<16x32xi1>, vector<16x32xf32>
    %266 = vector.extract_strided_slice %265 {offsets = [0, 0], sizes = [8, 32], strides = [1, 1]} : vector<16x32xf32> to vector<8x32xf32>
    %c40_84 = arith.constant 40 : index
    %c0_85 = arith.constant 0 : index
    %267 = vector.load %arg13[%c40_84, %c0_85] : memref<128x32xf32, #tpu.memory_space<vmem>>, vector<8x32xf32>
    tpu.vector_store %arg13[%c40_84, %c0_85], %266 {strides = array<i32>} : memref<128x32xf32, #tpu.memory_space<vmem>>, vector<8x32xf32>,
    %268 = vector.extract_strided_slice %265 {offsets = [8, 0], sizes = [8, 32], strides = [1, 1]} : vector<16x32xf32> to vector<8x32xf32>
    %c80_86 = arith.constant 80 : index
    %c0_87 = arith.constant 0 : index
    %269 = vector.load %arg13[%c80_86, %c0_87] : memref<128x32xf32, #tpu.memory_space<vmem>>, vector<8x32xf32>
    tpu.vector_store %arg13[%c80_86, %c0_87], %268 {strides = array<i32>} : memref<128x32xf32, #tpu.memory_space<vmem>>, vector<8x32xf32>,
    %c96_88 = arith.constant 96 : index
    %c0_89 = arith.constant 0 : index
    %270 = vector.load %arg12[%c96_88, %c0_89] : memref<128x128xf32, #tpu.memory_space<vmem>>, vector<16x128xf32>
    %271 = arith.truncf %262 : vector<16x32xf32> to vector<16x32xbf16>
    %272 = tpu.concatenate %271, %271 in 1 : vector<16x32xbf16>, vector<16x32xbf16> -> vector<16x64xbf16>
    %cst_90 = arith.constant 0.000000e+00 : f32
    %273 = arith.truncf %cst_90 : f32 to bf16
    %274 = vector.broadcast %273 : bf16 to vector<16x64xbf16>
    %275 = arith.select %20, %272, %274 : vector<16x64xi1>, vector<16x64xbf16>
    %cst_91 = arith.constant dense<0.000000e+00> : vector<16x128xf32>
    %276 = tpu.matmul %275, %81, %cst_91 {dimension_numbers = #tpu.dot_dimension_numbers<[1], [0], [0], [1], [0, 0, 1, 1], [], []>} : vector<16x64xbf16>, vector<64x128xbf16>, vector<16x128xf32> -> vector<16x128xf32>
    %277 = arith.addf %270, %276 : vector<16x128xf32>
    %278 = arith.mulf %277, %9 : vector<16x128xf32>
    %279 = math.tanh %278 : vector<16x128xf32>
    %280 = arith.mulf %279, %9 : vector<16x128xf32>
    %281 = arith.addf %280, %12 : vector<16x128xf32>
    %282 = vector.extract_strided_slice %281 {offsets = [0, 0], sizes = [16, 32], strides = [1, 1]} : vector<16x128xf32> to vector<16x32xf32>
    %283 = vector.extract_strided_slice %281 {offsets = [0, 32], sizes = [16, 32], strides = [1, 1]} : vector<16x128xf32> to vector<16x32xf32>
    %284 = vector.extract_strided_slice %281 {offsets = [0, 64], sizes = [16, 32], strides = [1, 1]} : vector<16x128xf32> to vector<16x32xf32>
    %285 = vector.extract_strided_slice %281 {offsets = [0, 96], sizes = [16, 32], strides = [1, 1]} : vector<16x128xf32> to vector<16x32xf32>
    %286 = arith.mulf %283, %263 : vector<16x32xf32>
    %287 = arith.mulf %282, %284 : vector<16x32xf32>
    %288 = arith.addf %286, %287 : vector<16x32xf32>
    %289 = math.tanh %288 : vector<16x32xf32>
    %290 = arith.mulf %285, %289 : vector<16x32xf32>
    %291 = vector.extract_strided_slice %30 {offsets = [6, 0, 0], sizes = [1, 16, 32], strides = [1, 1, 1]} : vector<8x16x32xi1> to vector<1x16x32xi1>
    %292 = vector.shape_cast %291 : vector<1x16x32xi1> to vector<16x32xi1>
    %293 = arith.select %292, %290, %262 : vector<16x32xi1>, vector<16x32xf32>
    %294 = arith.select %292, %288, %263 : vector<16x32xi1>, vector<16x32xf32>
    %cst_92 = arith.constant 0.000000e+00 : f32
    %295 = vector.broadcast %cst_92 : f32 to vector<16x32xf32>
    %296 = arith.select %292, %290, %295 : vector<16x32xi1>, vector<16x32xf32>
    %297 = vector.extract_strided_slice %296 {offsets = [0, 0], sizes = [8, 32], strides = [1, 1]} : vector<16x32xf32> to vector<8x32xf32>
    %c48_93 = arith.constant 48 : index
    %c0_94 = arith.constant 0 : index
    %298 = vector.load %arg13[%c48_93, %c0_94] : memref<128x32xf32, #tpu.memory_space<vmem>>, vector<8x32xf32>
    tpu.vector_store %arg13[%c48_93, %c0_94], %297 {strides = array<i32>} : memref<128x32xf32, #tpu.memory_space<vmem>>, vector<8x32xf32>,
    %299 = vector.extract_strided_slice %296 {offsets = [8, 0], sizes = [8, 32], strides = [1, 1]} : vector<16x32xf32> to vector<8x32xf32>
    %c72_95 = arith.constant 72 : index
    %c0_96 = arith.constant 0 : index
    %300 = vector.load %arg13[%c72_95, %c0_96] : memref<128x32xf32, #tpu.memory_space<vmem>>, vector<8x32xf32>
    tpu.vector_store %arg13[%c72_95, %c0_96], %299 {strides = array<i32>} : memref<128x32xf32, #tpu.memory_space<vmem>>, vector<8x32xf32>,
    %c112_97 = arith.constant 112 : index
    %c0_98 = arith.constant 0 : index
    %301 = vector.load %arg12[%c112_97, %c0_98] : memref<128x128xf32, #tpu.memory_space<vmem>>, vector<16x128xf32>
    %302 = arith.truncf %293 : vector<16x32xf32> to vector<16x32xbf16>
    %303 = tpu.concatenate %302, %302 in 1 : vector<16x32xbf16>, vector<16x32xbf16> -> vector<16x64xbf16>
    %cst_99 = arith.constant 0.000000e+00 : f32
    %304 = arith.truncf %cst_99 : f32 to bf16
    %305 = vector.broadcast %304 : bf16 to vector<16x64xbf16>
    %306 = arith.select %20, %303, %305 : vector<16x64xi1>, vector<16x64xbf16>
    %cst_100 = arith.constant dense<0.000000e+00> : vector<16x128xf32>
    %307 = tpu.matmul %306, %81, %cst_100 {dimension_numbers = #tpu.dot_dimension_numbers<[1], [0], [0], [1], [0, 0, 1, 1], [], []>} : vector<16x64xbf16>, vector<64x128xbf16>, vector<16x128xf32> -> vector<16x128xf32>
    %308 = arith.addf %301, %307 : vector<16x128xf32>
    %309 = arith.mulf %308, %9 : vector<16x128xf32>
    %310 = math.tanh %309 : vector<16x128xf32>
    %311 = arith.mulf %310, %9 : vector<16x128xf32>
    %312 = arith.addf %311, %12 : vector<16x128xf32>
    %313 = vector.extract_strided_slice %312 {offsets = [0, 0], sizes = [16, 32], strides = [1, 1]} : vector<16x128xf32> to vector<16x32xf32>
    %314 = vector.extract_strided_slice %312 {offsets = [0, 32], sizes = [16, 32], strides = [1, 1]} : vector<16x128xf32> to vector<16x32xf32>
    %315 = vector.extract_strided_slice %312 {offsets = [0, 64], sizes = [16, 32], strides = [1, 1]} : vector<16x128xf32> to vector<16x32xf32>
    %316 = vector.extract_strided_slice %312 {offsets = [0, 96], sizes = [16, 32], strides = [1, 1]} : vector<16x128xf32> to vector<16x32xf32>
    %317 = arith.mulf %314, %294 : vector<16x32xf32>
    %318 = arith.mulf %313, %315 : vector<16x32xf32>
    %319 = arith.addf %317, %318 : vector<16x32xf32>
    %320 = math.tanh %319 : vector<16x32xf32>
    %321 = arith.mulf %316, %320 : vector<16x32xf32>
    %322 = vector.extract_strided_slice %30 {offsets = [7, 0, 0], sizes = [1, 16, 32], strides = [1, 1, 1]} : vector<8x16x32xi1> to vector<1x16x32xi1>
    %323 = vector.shape_cast %322 : vector<1x16x32xi1> to vector<16x32xi1>
    %cst_101 = arith.constant 0.000000e+00 : f32
    %324 = vector.broadcast %cst_101 : f32 to vector<16x32xf32>
    %325 = arith.select %323, %321, %324 : vector<16x32xi1>, vector<16x32xf32>
    %326 = vector.extract_strided_slice %325 {offsets = [0, 0], sizes = [8, 32], strides = [1, 1]} : vector<16x32xf32> to vector<8x32xf32>
    %c56_102 = arith.constant 56 : index
    %c0_103 = arith.constant 0 : index
    %327 = vector.load %arg13[%c56_102, %c0_103] : memref<128x32xf32, #tpu.memory_space<vmem>>, vector<8x32xf32>
    tpu.vector_store %arg13[%c56_102, %c0_103], %326 {strides = array<i32>} : memref<128x32xf32, #tpu.memory_space<vmem>>, vector<8x32xf32>,
    %328 = vector.extract_strided_slice %325 {offsets = [8, 0], sizes = [8, 32], strides = [1, 1]} : vector<16x32xf32> to vector<8x32xf32>
    %c64_104 = arith.constant 64 : index
    %c0_105 = arith.constant 0 : index
    %329 = vector.load %arg13[%c64_104, %c0_105] : memref<128x32xf32, #tpu.memory_space<vmem>>, vector<8x32xf32>
    tpu.vector_store %arg13[%c64_104, %c0_105], %328 {strides = array<i32>} : memref<128x32xf32, #tpu.memory_space<vmem>>, vector<8x32xf32>,
    %c0_106 = arith.constant 0 : index
    %c0_107 = arith.constant 0 : index
    %330 = vector.load %arg13[%c0_106, %c0_107] : memref<128x32xf32, #tpu.memory_space<vmem>>, vector<64x32xf32>
    %331 = arith.truncf %330 : vector<64x32xf32> to vector<64x32xbf16>
    %c64_108 = arith.constant 64 : index
    %c0_109 = arith.constant 0 : index
    %332 = vector.load %arg13[%c64_108, %c0_109] : memref<128x32xf32, #tpu.memory_space<vmem>>, vector<64x32xf32>
    %333 = arith.truncf %332 : vector<64x32xf32> to vector<64x32xbf16>
    %c0_110 = arith.constant 0 : index
    %c0_111 = arith.constant 0 : index
    %334 = vector.load %arg5[%c0_110, %c0_111] : memref<64x256xbf16, #tpu.memory_space<vmem>>, vector<32x256xbf16>
    %cst_112 = arith.constant dense<0.000000e+00> : vector<64x256xf32>
    %335 = tpu.matmul %331, %334, %cst_112 {dimension_numbers = #tpu.dot_dimension_numbers<[1], [0], [0], [1], [0, 0, 1, 1], [], []>} : vector<64x32xbf16>, vector<32x256xbf16>, vector<64x256xf32> -> vector<64x256xf32>
    %c32_113 = arith.constant 32 : index
    %c0_114 = arith.constant 0 : index
    %336 = vector.load %arg5[%c32_113, %c0_114] : memref<64x256xbf16, #tpu.memory_space<vmem>>, vector<32x256xbf16>
    %cst_115 = arith.constant dense<0.000000e+00> : vector<64x256xf32>
    %337 = tpu.matmul %333, %336, %cst_115 {dimension_numbers = #tpu.dot_dimension_numbers<[1], [0], [0], [1], [0, 0, 1, 1], [], []>} : vector<64x32xbf16>, vector<32x256xbf16>, vector<64x256xf32> -> vector<64x256xf32>
    %338 = arith.addf %335, %337 : vector<64x256xf32>
    %c0_116 = arith.constant 0 : index
    %c0_117 = arith.constant 0 : index
    %339 = vector.load %arg6[%c0_116, %c0_117] : memref<2x128xf32, #tpu.memory_space<vmem>>, vector<2x128xf32>
    %340 = vector.extract_strided_slice %338 {offsets = [0, 0], sizes = [64, 128], strides = [1, 1]} : vector<64x256xf32> to vector<64x128xf32>
    %341 = vector.extract_strided_slice %339 {offsets = [0, 0], sizes = [1, 128], strides = [1, 1]} : vector<2x128xf32> to vector<1x128xf32>
    %342 = vector.broadcast %341 : vector<1x128xf32> to vector<64x128xf32>
    %343 = arith.addf %340, %342 : vector<64x128xf32>
    %344 = vector.extract_strided_slice %338 {offsets = [0, 128], sizes = [64, 128], strides = [1, 1]} : vector<64x256xf32> to vector<64x128xf32>
    %345 = vector.extract_strided_slice %339 {offsets = [1, 0], sizes = [1, 128], strides = [1, 1]} : vector<2x128xf32> to vector<1x128xf32>
    %346 = vector.broadcast %345 : vector<1x128xf32> to vector<64x128xf32>
    %347 = arith.addf %344, %346 : vector<64x128xf32>
    %348 = vector.extract_strided_slice %343 {offsets = [0, 0], sizes = [8, 128], strides = [1, 1]} : vector<64x128xf32> to vector<8x128xf32>
    %c0_118 = arith.constant 0 : index
    %c0_119 = arith.constant 0 : index
    %349 = vector.load %arg12[%c0_118, %c0_119] : memref<128x128xf32, #tpu.memory_space<vmem>>, vector<8x128xf32>
    tpu.vector_store %arg12[%c0_118, %c0_119], %348 {strides = array<i32>} : memref<128x128xf32, #tpu.memory_space<vmem>>, vector<8x128xf32>,
    %350 = vector.extract_strided_slice %347 {offsets = [0, 0], sizes = [8, 128], strides = [1, 1]} : vector<64x128xf32> to vector<8x128xf32>
    %c120_120 = arith.constant 120 : index
    %c0_121 = arith.constant 0 : index
    %351 = vector.load %arg12[%c120_120, %c0_121] : memref<128x128xf32, #tpu.memory_space<vmem>>, vector<8x128xf32>
    tpu.vector_store %arg12[%c120_120, %c0_121], %350 {strides = array<i32>} : memref<128x128xf32, #tpu.memory_space<vmem>>, vector<8x128xf32>,
    %352 = vector.extract_strided_slice %343 {offsets = [8, 0], sizes = [8, 128], strides = [1, 1]} : vector<64x128xf32> to vector<8x128xf32>
    %c16_122 = arith.constant 16 : index
    %c0_123 = arith.constant 0 : index
    %353 = vector.load %arg12[%c16_122, %c0_123] : memref<128x128xf32, #tpu.memory_space<vmem>>, vector<8x128xf32>
    tpu.vector_store %arg12[%c16_122, %c0_123], %352 {strides = array<i32>} : memref<128x128xf32, #tpu.memory_space<vmem>>, vector<8x128xf32>,
    %354 = vector.extract_strided_slice %347 {offsets = [8, 0], sizes = [8, 128], strides = [1, 1]} : vector<64x128xf32> to vector<8x128xf32>
    %c104_124 = arith.constant 104 : index
    %c0_125 = arith.constant 0 : index
    %355 = vector.load %arg12[%c104_124, %c0_125] : memref<128x128xf32, #tpu.memory_space<vmem>>, vector<8x128xf32>
    tpu.vector_store %arg12[%c104_124, %c0_125], %354 {strides = array<i32>} : memref<128x128xf32, #tpu.memory_space<vmem>>, vector<8x128xf32>,
    %356 = vector.extract_strided_slice %343 {offsets = [16, 0], sizes = [8, 128], strides = [1, 1]} : vector<64x128xf32> to vector<8x128xf32>
    %c32_126 = arith.constant 32 : index
    %c0_127 = arith.constant 0 : index
    %357 = vector.load %arg12[%c32_126, %c0_127] : memref<128x128xf32, #tpu.memory_space<vmem>>, vector<8x128xf32>
    tpu.vector_store %arg12[%c32_126, %c0_127], %356 {strides = array<i32>} : memref<128x128xf32, #tpu.memory_space<vmem>>, vector<8x128xf32>,
    %358 = vector.extract_strided_slice %347 {offsets = [16, 0], sizes = [8, 128], strides = [1, 1]} : vector<64x128xf32> to vector<8x128xf32>
    %c88_128 = arith.constant 88 : index
    %c0_129 = arith.constant 0 : index
    %359 = vector.load %arg12[%c88_128, %c0_129] : memref<128x128xf32, #tpu.memory_space<vmem>>, vector<8x128xf32>
    tpu.vector_store %arg12[%c88_128, %c0_129], %358 {strides = array<i32>} : memref<128x128xf32, #tpu.memory_space<vmem>>, vector<8x128xf32>,
    %360 = vector.extract_strided_slice %343 {offsets = [24, 0], sizes = [8, 128], strides = [1, 1]} : vector<64x128xf32> to vector<8x128xf32>
    %c48_130 = arith.constant 48 : index
    %c0_131 = arith.constant 0 : index
    %361 = vector.load %arg12[%c48_130, %c0_131] : memref<128x128xf32, #tpu.memory_space<vmem>>, vector<8x128xf32>
    tpu.vector_store %arg12[%c48_130, %c0_131], %360 {strides = array<i32>} : memref<128x128xf32, #tpu.memory_space<vmem>>, vector<8x128xf32>,
    %362 = vector.extract_strided_slice %347 {offsets = [24, 0], sizes = [8, 128], strides = [1, 1]} : vector<64x128xf32> to vector<8x128xf32>
    %c72_132 = arith.constant 72 : index
    %c0_133 = arith.constant 0 : index
    %363 = vector.load %arg12[%c72_132, %c0_133] : memref<128x128xf32, #tpu.memory_space<vmem>>, vector<8x128xf32>
    tpu.vector_store %arg12[%c72_132, %c0_133], %362 {strides = array<i32>} : memref<128x128xf32, #tpu.memory_space<vmem>>, vector<8x128xf32>,
    %364 = vector.extract_strided_slice %343 {offsets = [32, 0], sizes = [8, 128], strides = [1, 1]} : vector<64x128xf32> to vector<8x128xf32>
    %c64_134 = arith.constant 64 : index
    %c0_135 = arith.constant 0 : index
    %365 = vector.load %arg12[%c64_134, %c0_135] : memref<128x128xf32, #tpu.memory_space<vmem>>, vector<8x128xf32>
    tpu.vector_store %arg12[%c64_134, %c0_135], %364 {strides = array<i32>} : memref<128x128xf32, #tpu.memory_space<vmem>>, vector<8x128xf32>,
    %366 = vector.extract_strided_slice %347 {offsets = [32, 0], sizes = [8, 128], strides = [1, 1]} : vector<64x128xf32> to vector<8x128xf32>
    %c56_136 = arith.constant 56 : index
    %c0_137 = arith.constant 0 : index
    %367 = vector.load %arg12[%c56_136, %c0_137] : memref<128x128xf32, #tpu.memory_space<vmem>>, vector<8x128xf32>
    tpu.vector_store %arg12[%c56_136, %c0_137], %366 {strides = array<i32>} : memref<128x128xf32, #tpu.memory_space<vmem>>, vector<8x128xf32>,
    %368 = vector.extract_strided_slice %343 {offsets = [40, 0], sizes = [8, 128], strides = [1, 1]} : vector<64x128xf32> to vector<8x128xf32>
    %c80_138 = arith.constant 80 : index
    %c0_139 = arith.constant 0 : index
    %369 = vector.load %arg12[%c80_138, %c0_139] : memref<128x128xf32, #tpu.memory_space<vmem>>, vector<8x128xf32>
    tpu.vector_store %arg12[%c80_138, %c0_139], %368 {strides = array<i32>} : memref<128x128xf32, #tpu.memory_space<vmem>>, vector<8x128xf32>,
    %370 = vector.extract_strided_slice %347 {offsets = [40, 0], sizes = [8, 128], strides = [1, 1]} : vector<64x128xf32> to vector<8x128xf32>
    %c40_140 = arith.constant 40 : index
    %c0_141 = arith.constant 0 : index
    %371 = vector.load %arg12[%c40_140, %c0_141] : memref<128x128xf32, #tpu.memory_space<vmem>>, vector<8x128xf32>
    tpu.vector_store %arg12[%c40_140, %c0_141], %370 {strides = array<i32>} : memref<128x128xf32, #tpu.memory_space<vmem>>, vector<8x128xf32>,
    %372 = vector.extract_strided_slice %343 {offsets = [48, 0], sizes = [8, 128], strides = [1, 1]} : vector<64x128xf32> to vector<8x128xf32>
    %c96_142 = arith.constant 96 : index
    %c0_143 = arith.constant 0 : index
    %373 = vector.load %arg12[%c96_142, %c0_143] : memref<128x128xf32, #tpu.memory_space<vmem>>, vector<8x128xf32>
    tpu.vector_store %arg12[%c96_142, %c0_143], %372 {strides = array<i32>} : memref<128x128xf32, #tpu.memory_space<vmem>>, vector<8x128xf32>,
    %374 = vector.extract_strided_slice %347 {offsets = [48, 0], sizes = [8, 128], strides = [1, 1]} : vector<64x128xf32> to vector<8x128xf32>
    %c24_144 = arith.constant 24 : index
    %c0_145 = arith.constant 0 : index
    %375 = vector.load %arg12[%c24_144, %c0_145] : memref<128x128xf32, #tpu.memory_space<vmem>>, vector<8x128xf32>
    tpu.vector_store %arg12[%c24_144, %c0_145], %374 {strides = array<i32>} : memref<128x128xf32, #tpu.memory_space<vmem>>, vector<8x128xf32>,
    %376 = vector.extract_strided_slice %343 {offsets = [56, 0], sizes = [8, 128], strides = [1, 1]} : vector<64x128xf32> to vector<8x128xf32>
    %c112_146 = arith.constant 112 : index
    %c0_147 = arith.constant 0 : index
    %377 = vector.load %arg12[%c112_146, %c0_147] : memref<128x128xf32, #tpu.memory_space<vmem>>, vector<8x128xf32>
    tpu.vector_store %arg12[%c112_146, %c0_147], %376 {strides = array<i32>} : memref<128x128xf32, #tpu.memory_space<vmem>>, vector<8x128xf32>,
    %378 = vector.extract_strided_slice %347 {offsets = [56, 0], sizes = [8, 128], strides = [1, 1]} : vector<64x128xf32> to vector<8x128xf32>
    %c8_148 = arith.constant 8 : index
    %c0_149 = arith.constant 0 : index
    %379 = vector.load %arg12[%c8_148, %c0_149] : memref<128x128xf32, #tpu.memory_space<vmem>>, vector<8x128xf32>
    tpu.vector_store %arg12[%c8_148, %c0_149], %378 {strides = array<i32>} : memref<128x128xf32, #tpu.memory_space<vmem>>, vector<8x128xf32>,
    %c0_150 = arith.constant 0 : index
    %c0_151 = arith.constant 0 : index
    %380 = vector.load %arg7[%c0_150, %c0_151] : memref<64x128xbf16, #tpu.memory_space<vmem>>, vector<64x128xbf16>
    %cst_152 = arith.constant 0.000000e+00 : f32
    %381 = vector.broadcast %cst_152 : f32 to vector<16x32xf32>
    %cst_153 = arith.constant 0.000000e+00 : f32
    %382 = vector.broadcast %cst_153 : f32 to vector<16x32xf32>
    %c0_154 = arith.constant 0 : index
    %c0_155 = arith.constant 0 : index
    %383 = vector.load %arg12[%c0_154, %c0_155] : memref<128x128xf32, #tpu.memory_space<vmem>>, vector<16x128xf32>
    %384 = arith.truncf %381 : vector<16x32xf32> to vector<16x32xbf16>
    %385 = tpu.concatenate %384, %384 in 1 : vector<16x32xbf16>, vector<16x32xbf16> -> vector<16x64xbf16>
    %cst_156 = arith.constant 0.000000e+00 : f32
    %386 = arith.truncf %cst_156 : f32 to bf16
    %387 = vector.broadcast %386 : bf16 to vector<16x64xbf16>
    %388 = arith.select %20, %385, %387 : vector<16x64xi1>, vector<16x64xbf16>
    %cst_157 = arith.constant dense<0.000000e+00> : vector<16x128xf32>
    %389 = tpu.matmul %388, %380, %cst_157 {dimension_numbers = #tpu.dot_dimension_numbers<[1], [0], [0], [1], [0, 0, 1, 1], [], []>} : vector<16x64xbf16>, vector<64x128xbf16>, vector<16x128xf32> -> vector<16x128xf32>
    %390 = arith.addf %383, %389 : vector<16x128xf32>
    %391 = arith.mulf %390, %9 : vector<16x128xf32>
    %392 = math.tanh %391 : vector<16x128xf32>
    %393 = arith.mulf %392, %9 : vector<16x128xf32>
    %394 = arith.addf %393, %12 : vector<16x128xf32>
    %395 = vector.extract_strided_slice %394 {offsets = [0, 0], sizes = [16, 32], strides = [1, 1]} : vector<16x128xf32> to vector<16x32xf32>
    %396 = vector.extract_strided_slice %394 {offsets = [0, 32], sizes = [16, 32], strides = [1, 1]} : vector<16x128xf32> to vector<16x32xf32>
    %397 = vector.extract_strided_slice %394 {offsets = [0, 64], sizes = [16, 32], strides = [1, 1]} : vector<16x128xf32> to vector<16x32xf32>
    %398 = vector.extract_strided_slice %394 {offsets = [0, 96], sizes = [16, 32], strides = [1, 1]} : vector<16x128xf32> to vector<16x32xf32>
    %399 = arith.mulf %396, %382 : vector<16x32xf32>
    %400 = arith.mulf %395, %397 : vector<16x32xf32>
    %401 = arith.addf %399, %400 : vector<16x32xf32>
    %402 = math.tanh %401 : vector<16x32xf32>
    %403 = arith.mulf %398, %402 : vector<16x32xf32>
    %404 = vector.extract_strided_slice %30 {offsets = [0, 0, 0], sizes = [1, 16, 32], strides = [1, 1, 1]} : vector<8x16x32xi1> to vector<1x16x32xi1>
    %405 = vector.shape_cast %404 : vector<1x16x32xi1> to vector<16x32xi1>
    %406 = arith.select %405, %403, %381 : vector<16x32xi1>, vector<16x32xf32>
    %407 = arith.select %405, %401, %382 : vector<16x32xi1>, vector<16x32xf32>
    %cst_158 = arith.constant 0.000000e+00 : f32
    %408 = vector.broadcast %cst_158 : f32 to vector<16x32xf32>
    %409 = arith.select %405, %403, %408 : vector<16x32xi1>, vector<16x32xf32>
    %410 = vector.extract_strided_slice %409 {offsets = [0, 0], sizes = [8, 32], strides = [1, 1]} : vector<16x32xf32> to vector<8x32xf32>
    %c0_159 = arith.constant 0 : index
    %c0_160 = arith.constant 0 : index
    %411 = vector.load %arg10[%c0_159, %c0_160] : memref<64x64xf32, #tpu.memory_space<vmem>>, vector<8x32xf32>
    tpu.vector_store %arg10[%c0_159, %c0_160], %410 {strides = array<i32>} : memref<64x64xf32, #tpu.memory_space<vmem>>, vector<8x32xf32>,
    %412 = vector.extract_strided_slice %409 {offsets = [8, 0], sizes = [8, 32], strides = [1, 1]} : vector<16x32xf32> to vector<8x32xf32>
    %c56_161 = arith.constant 56 : index
    %c32_162 = arith.constant 32 : index
    %413 = vector.load %arg10[%c56_161, %c32_162] : memref<64x64xf32, #tpu.memory_space<vmem>>, vector<8x32xf32>
    tpu.vector_store %arg10[%c56_161, %c32_162], %412 {strides = array<i32>} : memref<64x64xf32, #tpu.memory_space<vmem>>, vector<8x32xf32>,
    %c16_163 = arith.constant 16 : index
    %c0_164 = arith.constant 0 : index
    %414 = vector.load %arg12[%c16_163, %c0_164] : memref<128x128xf32, #tpu.memory_space<vmem>>, vector<16x128xf32>
    %415 = arith.truncf %406 : vector<16x32xf32> to vector<16x32xbf16>
    %416 = tpu.concatenate %415, %415 in 1 : vector<16x32xbf16>, vector<16x32xbf16> -> vector<16x64xbf16>
    %cst_165 = arith.constant 0.000000e+00 : f32
    %417 = arith.truncf %cst_165 : f32 to bf16
    %418 = vector.broadcast %417 : bf16 to vector<16x64xbf16>
    %419 = arith.select %20, %416, %418 : vector<16x64xi1>, vector<16x64xbf16>
    %cst_166 = arith.constant dense<0.000000e+00> : vector<16x128xf32>
    %420 = tpu.matmul %419, %380, %cst_166 {dimension_numbers = #tpu.dot_dimension_numbers<[1], [0], [0], [1], [0, 0, 1, 1], [], []>} : vector<16x64xbf16>, vector<64x128xbf16>, vector<16x128xf32> -> vector<16x128xf32>
    %421 = arith.addf %414, %420 : vector<16x128xf32>
    %422 = arith.mulf %421, %9 : vector<16x128xf32>
    %423 = math.tanh %422 : vector<16x128xf32>
    %424 = arith.mulf %423, %9 : vector<16x128xf32>
    %425 = arith.addf %424, %12 : vector<16x128xf32>
    %426 = vector.extract_strided_slice %425 {offsets = [0, 0], sizes = [16, 32], strides = [1, 1]} : vector<16x128xf32> to vector<16x32xf32>
    %427 = vector.extract_strided_slice %425 {offsets = [0, 32], sizes = [16, 32], strides = [1, 1]} : vector<16x128xf32> to vector<16x32xf32>
    %428 = vector.extract_strided_slice %425 {offsets = [0, 64], sizes = [16, 32], strides = [1, 1]} : vector<16x128xf32> to vector<16x32xf32>
    %429 = vector.extract_strided_slice %425 {offsets = [0, 96], sizes = [16, 32], strides = [1, 1]} : vector<16x128xf32> to vector<16x32xf32>
    %430 = arith.mulf %427, %407 : vector<16x32xf32>
    %431 = arith.mulf %426, %428 : vector<16x32xf32>
    %432 = arith.addf %430, %431 : vector<16x32xf32>
    %433 = math.tanh %432 : vector<16x32xf32>
    %434 = arith.mulf %429, %433 : vector<16x32xf32>
    %435 = vector.extract_strided_slice %30 {offsets = [1, 0, 0], sizes = [1, 16, 32], strides = [1, 1, 1]} : vector<8x16x32xi1> to vector<1x16x32xi1>
    %436 = vector.shape_cast %435 : vector<1x16x32xi1> to vector<16x32xi1>
    %437 = arith.select %436, %434, %406 : vector<16x32xi1>, vector<16x32xf32>
    %438 = arith.select %436, %432, %407 : vector<16x32xi1>, vector<16x32xf32>
    %cst_167 = arith.constant 0.000000e+00 : f32
    %439 = vector.broadcast %cst_167 : f32 to vector<16x32xf32>
    %440 = arith.select %436, %434, %439 : vector<16x32xi1>, vector<16x32xf32>
    %441 = vector.extract_strided_slice %440 {offsets = [0, 0], sizes = [8, 32], strides = [1, 1]} : vector<16x32xf32> to vector<8x32xf32>
    %c8_168 = arith.constant 8 : index
    %c0_169 = arith.constant 0 : index
    %442 = vector.load %arg10[%c8_168, %c0_169] : memref<64x64xf32, #tpu.memory_space<vmem>>, vector<8x32xf32>
    tpu.vector_store %arg10[%c8_168, %c0_169], %441 {strides = array<i32>} : memref<64x64xf32, #tpu.memory_space<vmem>>, vector<8x32xf32>,
    %443 = vector.extract_strided_slice %440 {offsets = [8, 0], sizes = [8, 32], strides = [1, 1]} : vector<16x32xf32> to vector<8x32xf32>
    %c48_170 = arith.constant 48 : index
    %c32_171 = arith.constant 32 : index
    %444 = vector.load %arg10[%c48_170, %c32_171] : memref<64x64xf32, #tpu.memory_space<vmem>>, vector<8x32xf32>
    tpu.vector_store %arg10[%c48_170, %c32_171], %443 {strides = array<i32>} : memref<64x64xf32, #tpu.memory_space<vmem>>, vector<8x32xf32>,
    %c32_172 = arith.constant 32 : index
    %c0_173 = arith.constant 0 : index
    %445 = vector.load %arg12[%c32_172, %c0_173] : memref<128x128xf32, #tpu.memory_space<vmem>>, vector<16x128xf32>
    %446 = arith.truncf %437 : vector<16x32xf32> to vector<16x32xbf16>
    %447 = tpu.concatenate %446, %446 in 1 : vector<16x32xbf16>, vector<16x32xbf16> -> vector<16x64xbf16>
    %cst_174 = arith.constant 0.000000e+00 : f32
    %448 = arith.truncf %cst_174 : f32 to bf16
    %449 = vector.broadcast %448 : bf16 to vector<16x64xbf16>
    %450 = arith.select %20, %447, %449 : vector<16x64xi1>, vector<16x64xbf16>
    %cst_175 = arith.constant dense<0.000000e+00> : vector<16x128xf32>
    %451 = tpu.matmul %450, %380, %cst_175 {dimension_numbers = #tpu.dot_dimension_numbers<[1], [0], [0], [1], [0, 0, 1, 1], [], []>} : vector<16x64xbf16>, vector<64x128xbf16>, vector<16x128xf32> -> vector<16x128xf32>
    %452 = arith.addf %445, %451 : vector<16x128xf32>
    %453 = arith.mulf %452, %9 : vector<16x128xf32>
    %454 = math.tanh %453 : vector<16x128xf32>
    %455 = arith.mulf %454, %9 : vector<16x128xf32>
    %456 = arith.addf %455, %12 : vector<16x128xf32>
    %457 = vector.extract_strided_slice %456 {offsets = [0, 0], sizes = [16, 32], strides = [1, 1]} : vector<16x128xf32> to vector<16x32xf32>
    %458 = vector.extract_strided_slice %456 {offsets = [0, 32], sizes = [16, 32], strides = [1, 1]} : vector<16x128xf32> to vector<16x32xf32>
    %459 = vector.extract_strided_slice %456 {offsets = [0, 64], sizes = [16, 32], strides = [1, 1]} : vector<16x128xf32> to vector<16x32xf32>
    %460 = vector.extract_strided_slice %456 {offsets = [0, 96], sizes = [16, 32], strides = [1, 1]} : vector<16x128xf32> to vector<16x32xf32>
    %461 = arith.mulf %458, %438 : vector<16x32xf32>
    %462 = arith.mulf %457, %459 : vector<16x32xf32>
    %463 = arith.addf %461, %462 : vector<16x32xf32>
    %464 = math.tanh %463 : vector<16x32xf32>
    %465 = arith.mulf %460, %464 : vector<16x32xf32>
    %466 = vector.extract_strided_slice %30 {offsets = [2, 0, 0], sizes = [1, 16, 32], strides = [1, 1, 1]} : vector<8x16x32xi1> to vector<1x16x32xi1>
    %467 = vector.shape_cast %466 : vector<1x16x32xi1> to vector<16x32xi1>
    %468 = arith.select %467, %465, %437 : vector<16x32xi1>, vector<16x32xf32>
    %469 = arith.select %467, %463, %438 : vector<16x32xi1>, vector<16x32xf32>
    %cst_176 = arith.constant 0.000000e+00 : f32
    %470 = vector.broadcast %cst_176 : f32 to vector<16x32xf32>
    %471 = arith.select %467, %465, %470 : vector<16x32xi1>, vector<16x32xf32>
    %472 = vector.extract_strided_slice %471 {offsets = [0, 0], sizes = [8, 32], strides = [1, 1]} : vector<16x32xf32> to vector<8x32xf32>
    %c16_177 = arith.constant 16 : index
    %c0_178 = arith.constant 0 : index
    %473 = vector.load %arg10[%c16_177, %c0_178] : memref<64x64xf32, #tpu.memory_space<vmem>>, vector<8x32xf32>
    tpu.vector_store %arg10[%c16_177, %c0_178], %472 {strides = array<i32>} : memref<64x64xf32, #tpu.memory_space<vmem>>, vector<8x32xf32>,
    %474 = vector.extract_strided_slice %471 {offsets = [8, 0], sizes = [8, 32], strides = [1, 1]} : vector<16x32xf32> to vector<8x32xf32>
    %c40_179 = arith.constant 40 : index
    %c32_180 = arith.constant 32 : index
    %475 = vector.load %arg10[%c40_179, %c32_180] : memref<64x64xf32, #tpu.memory_space<vmem>>, vector<8x32xf32>
    tpu.vector_store %arg10[%c40_179, %c32_180], %474 {strides = array<i32>} : memref<64x64xf32, #tpu.memory_space<vmem>>, vector<8x32xf32>,
    %c48_181 = arith.constant 48 : index
    %c0_182 = arith.constant 0 : index
    %476 = vector.load %arg12[%c48_181, %c0_182] : memref<128x128xf32, #tpu.memory_space<vmem>>, vector<16x128xf32>
    %477 = arith.truncf %468 : vector<16x32xf32> to vector<16x32xbf16>
    %478 = tpu.concatenate %477, %477 in 1 : vector<16x32xbf16>, vector<16x32xbf16> -> vector<16x64xbf16>
    %cst_183 = arith.constant 0.000000e+00 : f32
    %479 = arith.truncf %cst_183 : f32 to bf16
    %480 = vector.broadcast %479 : bf16 to vector<16x64xbf16>
    %481 = arith.select %20, %478, %480 : vector<16x64xi1>, vector<16x64xbf16>
    %cst_184 = arith.constant dense<0.000000e+00> : vector<16x128xf32>
    %482 = tpu.matmul %481, %380, %cst_184 {dimension_numbers = #tpu.dot_dimension_numbers<[1], [0], [0], [1], [0, 0, 1, 1], [], []>} : vector<16x64xbf16>, vector<64x128xbf16>, vector<16x128xf32> -> vector<16x128xf32>
    %483 = arith.addf %476, %482 : vector<16x128xf32>
    %484 = arith.mulf %483, %9 : vector<16x128xf32>
    %485 = math.tanh %484 : vector<16x128xf32>
    %486 = arith.mulf %485, %9 : vector<16x128xf32>
    %487 = arith.addf %486, %12 : vector<16x128xf32>
    %488 = vector.extract_strided_slice %487 {offsets = [0, 0], sizes = [16, 32], strides = [1, 1]} : vector<16x128xf32> to vector<16x32xf32>
    %489 = vector.extract_strided_slice %487 {offsets = [0, 32], sizes = [16, 32], strides = [1, 1]} : vector<16x128xf32> to vector<16x32xf32>
    %490 = vector.extract_strided_slice %487 {offsets = [0, 64], sizes = [16, 32], strides = [1, 1]} : vector<16x128xf32> to vector<16x32xf32>
    %491 = vector.extract_strided_slice %487 {offsets = [0, 96], sizes = [16, 32], strides = [1, 1]} : vector<16x128xf32> to vector<16x32xf32>
    %492 = arith.mulf %489, %469 : vector<16x32xf32>
    %493 = arith.mulf %488, %490 : vector<16x32xf32>
    %494 = arith.addf %492, %493 : vector<16x32xf32>
    %495 = math.tanh %494 : vector<16x32xf32>
    %496 = arith.mulf %491, %495 : vector<16x32xf32>
    %497 = vector.extract_strided_slice %30 {offsets = [3, 0, 0], sizes = [1, 16, 32], strides = [1, 1, 1]} : vector<8x16x32xi1> to vector<1x16x32xi1>
    %498 = vector.shape_cast %497 : vector<1x16x32xi1> to vector<16x32xi1>
    %499 = arith.select %498, %496, %468 : vector<16x32xi1>, vector<16x32xf32>
    %500 = arith.select %498, %494, %469 : vector<16x32xi1>, vector<16x32xf32>
    %cst_185 = arith.constant 0.000000e+00 : f32
    %501 = vector.broadcast %cst_185 : f32 to vector<16x32xf32>
    %502 = arith.select %498, %496, %501 : vector<16x32xi1>, vector<16x32xf32>
    %503 = vector.extract_strided_slice %502 {offsets = [0, 0], sizes = [8, 32], strides = [1, 1]} : vector<16x32xf32> to vector<8x32xf32>
    %c24_186 = arith.constant 24 : index
    %c0_187 = arith.constant 0 : index
    %504 = vector.load %arg10[%c24_186, %c0_187] : memref<64x64xf32, #tpu.memory_space<vmem>>, vector<8x32xf32>
    tpu.vector_store %arg10[%c24_186, %c0_187], %503 {strides = array<i32>} : memref<64x64xf32, #tpu.memory_space<vmem>>, vector<8x32xf32>,
    %505 = vector.extract_strided_slice %502 {offsets = [8, 0], sizes = [8, 32], strides = [1, 1]} : vector<16x32xf32> to vector<8x32xf32>
    %c32_188 = arith.constant 32 : index
    %c32_189 = arith.constant 32 : index
    %506 = vector.load %arg10[%c32_188, %c32_189] : memref<64x64xf32, #tpu.memory_space<vmem>>, vector<8x32xf32>
    tpu.vector_store %arg10[%c32_188, %c32_189], %505 {strides = array<i32>} : memref<64x64xf32, #tpu.memory_space<vmem>>, vector<8x32xf32>,
    %c64_190 = arith.constant 64 : index
    %c0_191 = arith.constant 0 : index
    %507 = vector.load %arg12[%c64_190, %c0_191] : memref<128x128xf32, #tpu.memory_space<vmem>>, vector<16x128xf32>
    %508 = arith.truncf %499 : vector<16x32xf32> to vector<16x32xbf16>
    %509 = tpu.concatenate %508, %508 in 1 : vector<16x32xbf16>, vector<16x32xbf16> -> vector<16x64xbf16>
    %cst_192 = arith.constant 0.000000e+00 : f32
    %510 = arith.truncf %cst_192 : f32 to bf16
    %511 = vector.broadcast %510 : bf16 to vector<16x64xbf16>
    %512 = arith.select %20, %509, %511 : vector<16x64xi1>, vector<16x64xbf16>
    %cst_193 = arith.constant dense<0.000000e+00> : vector<16x128xf32>
    %513 = tpu.matmul %512, %380, %cst_193 {dimension_numbers = #tpu.dot_dimension_numbers<[1], [0], [0], [1], [0, 0, 1, 1], [], []>} : vector<16x64xbf16>, vector<64x128xbf16>, vector<16x128xf32> -> vector<16x128xf32>
    %514 = arith.addf %507, %513 : vector<16x128xf32>
    %515 = arith.mulf %514, %9 : vector<16x128xf32>
    %516 = math.tanh %515 : vector<16x128xf32>
    %517 = arith.mulf %516, %9 : vector<16x128xf32>
    %518 = arith.addf %517, %12 : vector<16x128xf32>
    %519 = vector.extract_strided_slice %518 {offsets = [0, 0], sizes = [16, 32], strides = [1, 1]} : vector<16x128xf32> to vector<16x32xf32>
    %520 = vector.extract_strided_slice %518 {offsets = [0, 32], sizes = [16, 32], strides = [1, 1]} : vector<16x128xf32> to vector<16x32xf32>
    %521 = vector.extract_strided_slice %518 {offsets = [0, 64], sizes = [16, 32], strides = [1, 1]} : vector<16x128xf32> to vector<16x32xf32>
    %522 = vector.extract_strided_slice %518 {offsets = [0, 96], sizes = [16, 32], strides = [1, 1]} : vector<16x128xf32> to vector<16x32xf32>
    %523 = arith.mulf %520, %500 : vector<16x32xf32>
    %524 = arith.mulf %519, %521 : vector<16x32xf32>
    %525 = arith.addf %523, %524 : vector<16x32xf32>
    %526 = math.tanh %525 : vector<16x32xf32>
    %527 = arith.mulf %522, %526 : vector<16x32xf32>
    %528 = vector.extract_strided_slice %30 {offsets = [4, 0, 0], sizes = [1, 16, 32], strides = [1, 1, 1]} : vector<8x16x32xi1> to vector<1x16x32xi1>
    %529 = vector.shape_cast %528 : vector<1x16x32xi1> to vector<16x32xi1>
    %530 = arith.select %529, %527, %499 : vector<16x32xi1>, vector<16x32xf32>
    %531 = arith.select %529, %525, %500 : vector<16x32xi1>, vector<16x32xf32>
    %cst_194 = arith.constant 0.000000e+00 : f32
    %532 = vector.broadcast %cst_194 : f32 to vector<16x32xf32>
    %533 = arith.select %529, %527, %532 : vector<16x32xi1>, vector<16x32xf32>
    %534 = vector.extract_strided_slice %533 {offsets = [0, 0], sizes = [8, 32], strides = [1, 1]} : vector<16x32xf32> to vector<8x32xf32>
    %c32_195 = arith.constant 32 : index
    %c0_196 = arith.constant 0 : index
    %535 = vector.load %arg10[%c32_195, %c0_196] : memref<64x64xf32, #tpu.memory_space<vmem>>, vector<8x32xf32>
    tpu.vector_store %arg10[%c32_195, %c0_196], %534 {strides = array<i32>} : memref<64x64xf32, #tpu.memory_space<vmem>>, vector<8x32xf32>,
    %536 = vector.extract_strided_slice %533 {offsets = [8, 0], sizes = [8, 32], strides = [1, 1]} : vector<16x32xf32> to vector<8x32xf32>
    %c24_197 = arith.constant 24 : index
    %c32_198 = arith.constant 32 : index
    %537 = vector.load %arg10[%c24_197, %c32_198] : memref<64x64xf32, #tpu.memory_space<vmem>>, vector<8x32xf32>
    tpu.vector_store %arg10[%c24_197, %c32_198], %536 {strides = array<i32>} : memref<64x64xf32, #tpu.memory_space<vmem>>, vector<8x32xf32>,
    %c80_199 = arith.constant 80 : index
    %c0_200 = arith.constant 0 : index
    %538 = vector.load %arg12[%c80_199, %c0_200] : memref<128x128xf32, #tpu.memory_space<vmem>>, vector<16x128xf32>
    %539 = arith.truncf %530 : vector<16x32xf32> to vector<16x32xbf16>
    %540 = tpu.concatenate %539, %539 in 1 : vector<16x32xbf16>, vector<16x32xbf16> -> vector<16x64xbf16>
    %cst_201 = arith.constant 0.000000e+00 : f32
    %541 = arith.truncf %cst_201 : f32 to bf16
    %542 = vector.broadcast %541 : bf16 to vector<16x64xbf16>
    %543 = arith.select %20, %540, %542 : vector<16x64xi1>, vector<16x64xbf16>
    %cst_202 = arith.constant dense<0.000000e+00> : vector<16x128xf32>
    %544 = tpu.matmul %543, %380, %cst_202 {dimension_numbers = #tpu.dot_dimension_numbers<[1], [0], [0], [1], [0, 0, 1, 1], [], []>} : vector<16x64xbf16>, vector<64x128xbf16>, vector<16x128xf32> -> vector<16x128xf32>
    %545 = arith.addf %538, %544 : vector<16x128xf32>
    %546 = arith.mulf %545, %9 : vector<16x128xf32>
    %547 = math.tanh %546 : vector<16x128xf32>
    %548 = arith.mulf %547, %9 : vector<16x128xf32>
    %549 = arith.addf %548, %12 : vector<16x128xf32>
    %550 = vector.extract_strided_slice %549 {offsets = [0, 0], sizes = [16, 32], strides = [1, 1]} : vector<16x128xf32> to vector<16x32xf32>
    %551 = vector.extract_strided_slice %549 {offsets = [0, 32], sizes = [16, 32], strides = [1, 1]} : vector<16x128xf32> to vector<16x32xf32>
    %552 = vector.extract_strided_slice %549 {offsets = [0, 64], sizes = [16, 32], strides = [1, 1]} : vector<16x128xf32> to vector<16x32xf32>
    %553 = vector.extract_strided_slice %549 {offsets = [0, 96], sizes = [16, 32], strides = [1, 1]} : vector<16x128xf32> to vector<16x32xf32>
    %554 = arith.mulf %551, %531 : vector<16x32xf32>
    %555 = arith.mulf %550, %552 : vector<16x32xf32>
    %556 = arith.addf %554, %555 : vector<16x32xf32>
    %557 = math.tanh %556 : vector<16x32xf32>
    %558 = arith.mulf %553, %557 : vector<16x32xf32>
    %559 = vector.extract_strided_slice %30 {offsets = [5, 0, 0], sizes = [1, 16, 32], strides = [1, 1, 1]} : vector<8x16x32xi1> to vector<1x16x32xi1>
    %560 = vector.shape_cast %559 : vector<1x16x32xi1> to vector<16x32xi1>
    %561 = arith.select %560, %558, %530 : vector<16x32xi1>, vector<16x32xf32>
    %562 = arith.select %560, %556, %531 : vector<16x32xi1>, vector<16x32xf32>
    %cst_203 = arith.constant 0.000000e+00 : f32
    %563 = vector.broadcast %cst_203 : f32 to vector<16x32xf32>
    %564 = arith.select %560, %558, %563 : vector<16x32xi1>, vector<16x32xf32>
    %565 = vector.extract_strided_slice %564 {offsets = [0, 0], sizes = [8, 32], strides = [1, 1]} : vector<16x32xf32> to vector<8x32xf32>
    %c40_204 = arith.constant 40 : index
    %c0_205 = arith.constant 0 : index
    %566 = vector.load %arg10[%c40_204, %c0_205] : memref<64x64xf32, #tpu.memory_space<vmem>>, vector<8x32xf32>
    tpu.vector_store %arg10[%c40_204, %c0_205], %565 {strides = array<i32>} : memref<64x64xf32, #tpu.memory_space<vmem>>, vector<8x32xf32>,
    %567 = vector.extract_strided_slice %564 {offsets = [8, 0], sizes = [8, 32], strides = [1, 1]} : vector<16x32xf32> to vector<8x32xf32>
    %c16_206 = arith.constant 16 : index
    %c32_207 = arith.constant 32 : index
    %568 = vector.load %arg10[%c16_206, %c32_207] : memref<64x64xf32, #tpu.memory_space<vmem>>, vector<8x32xf32>
    tpu.vector_store %arg10[%c16_206, %c32_207], %567 {strides = array<i32>} : memref<64x64xf32, #tpu.memory_space<vmem>>, vector<8x32xf32>,
    %c96_208 = arith.constant 96 : index
    %c0_209 = arith.constant 0 : index
    %569 = vector.load %arg12[%c96_208, %c0_209] : memref<128x128xf32, #tpu.memory_space<vmem>>, vector<16x128xf32>
    %570 = arith.truncf %561 : vector<16x32xf32> to vector<16x32xbf16>
    %571 = tpu.concatenate %570, %570 in 1 : vector<16x32xbf16>, vector<16x32xbf16> -> vector<16x64xbf16>
    %cst_210 = arith.constant 0.000000e+00 : f32
    %572 = arith.truncf %cst_210 : f32 to bf16
    %573 = vector.broadcast %572 : bf16 to vector<16x64xbf16>
    %574 = arith.select %20, %571, %573 : vector<16x64xi1>, vector<16x64xbf16>
    %cst_211 = arith.constant dense<0.000000e+00> : vector<16x128xf32>
    %575 = tpu.matmul %574, %380, %cst_211 {dimension_numbers = #tpu.dot_dimension_numbers<[1], [0], [0], [1], [0, 0, 1, 1], [], []>} : vector<16x64xbf16>, vector<64x128xbf16>, vector<16x128xf32> -> vector<16x128xf32>
    %576 = arith.addf %569, %575 : vector<16x128xf32>
    %577 = arith.mulf %576, %9 : vector<16x128xf32>
    %578 = math.tanh %577 : vector<16x128xf32>
    %579 = arith.mulf %578, %9 : vector<16x128xf32>
    %580 = arith.addf %579, %12 : vector<16x128xf32>
    %581 = vector.extract_strided_slice %580 {offsets = [0, 0], sizes = [16, 32], strides = [1, 1]} : vector<16x128xf32> to vector<16x32xf32>
    %582 = vector.extract_strided_slice %580 {offsets = [0, 32], sizes = [16, 32], strides = [1, 1]} : vector<16x128xf32> to vector<16x32xf32>
    %583 = vector.extract_strided_slice %580 {offsets = [0, 64], sizes = [16, 32], strides = [1, 1]} : vector<16x128xf32> to vector<16x32xf32>
    %584 = vector.extract_strided_slice %580 {offsets = [0, 96], sizes = [16, 32], strides = [1, 1]} : vector<16x128xf32> to vector<16x32xf32>
    %585 = arith.mulf %582, %562 : vector<16x32xf32>
    %586 = arith.mulf %581, %583 : vector<16x32xf32>
    %587 = arith.addf %585, %586 : vector<16x32xf32>
    %588 = math.tanh %587 : vector<16x32xf32>
    %589 = arith.mulf %584, %588 : vector<16x32xf32>
    %590 = vector.extract_strided_slice %30 {offsets = [6, 0, 0], sizes = [1, 16, 32], strides = [1, 1, 1]} : vector<8x16x32xi1> to vector<1x16x32xi1>
    %591 = vector.shape_cast %590 : vector<1x16x32xi1> to vector<16x32xi1>
    %592 = arith.select %591, %589, %561 : vector<16x32xi1>, vector<16x32xf32>
    %593 = arith.select %591, %587, %562 : vector<16x32xi1>, vector<16x32xf32>
    %cst_212 = arith.constant 0.000000e+00 : f32
    %594 = vector.broadcast %cst_212 : f32 to vector<16x32xf32>
    %595 = arith.select %591, %589, %594 : vector<16x32xi1>, vector<16x32xf32>
    %596 = vector.extract_strided_slice %595 {offsets = [0, 0], sizes = [8, 32], strides = [1, 1]} : vector<16x32xf32> to vector<8x32xf32>
    %c48_213 = arith.constant 48 : index
    %c0_214 = arith.constant 0 : index
    %597 = vector.load %arg10[%c48_213, %c0_214] : memref<64x64xf32, #tpu.memory_space<vmem>>, vector<8x32xf32>
    tpu.vector_store %arg10[%c48_213, %c0_214], %596 {strides = array<i32>} : memref<64x64xf32, #tpu.memory_space<vmem>>, vector<8x32xf32>,
    %598 = vector.extract_strided_slice %595 {offsets = [8, 0], sizes = [8, 32], strides = [1, 1]} : vector<16x32xf32> to vector<8x32xf32>
    %c8_215 = arith.constant 8 : index
    %c32_216 = arith.constant 32 : index
    %599 = vector.load %arg10[%c8_215, %c32_216] : memref<64x64xf32, #tpu.memory_space<vmem>>, vector<8x32xf32>
    tpu.vector_store %arg10[%c8_215, %c32_216], %598 {strides = array<i32>} : memref<64x64xf32, #tpu.memory_space<vmem>>, vector<8x32xf32>,
    %c112_217 = arith.constant 112 : index
    %c0_218 = arith.constant 0 : index
    %600 = vector.load %arg12[%c112_217, %c0_218] : memref<128x128xf32, #tpu.memory_space<vmem>>, vector<16x128xf32>
    %601 = arith.truncf %592 : vector<16x32xf32> to vector<16x32xbf16>
    %602 = tpu.concatenate %601, %601 in 1 : vector<16x32xbf16>, vector<16x32xbf16> -> vector<16x64xbf16>
    %cst_219 = arith.constant 0.000000e+00 : f32
    %603 = arith.truncf %cst_219 : f32 to bf16
    %604 = vector.broadcast %603 : bf16 to vector<16x64xbf16>
    %605 = arith.select %20, %602, %604 : vector<16x64xi1>, vector<16x64xbf16>
    %cst_220 = arith.constant dense<0.000000e+00> : vector<16x128xf32>
    %606 = tpu.matmul %605, %380, %cst_220 {dimension_numbers = #tpu.dot_dimension_numbers<[1], [0], [0], [1], [0, 0, 1, 1], [], []>} : vector<16x64xbf16>, vector<64x128xbf16>, vector<16x128xf32> -> vector<16x128xf32>
    %607 = arith.addf %600, %606 : vector<16x128xf32>
    %608 = arith.mulf %607, %9 : vector<16x128xf32>
    %609 = math.tanh %608 : vector<16x128xf32>
    %610 = arith.mulf %609, %9 : vector<16x128xf32>
    %611 = arith.addf %610, %12 : vector<16x128xf32>
    %612 = vector.extract_strided_slice %611 {offsets = [0, 0], sizes = [16, 32], strides = [1, 1]} : vector<16x128xf32> to vector<16x32xf32>
    %613 = vector.extract_strided_slice %611 {offsets = [0, 32], sizes = [16, 32], strides = [1, 1]} : vector<16x128xf32> to vector<16x32xf32>
    %614 = vector.extract_strided_slice %611 {offsets = [0, 64], sizes = [16, 32], strides = [1, 1]} : vector<16x128xf32> to vector<16x32xf32>
    %615 = vector.extract_strided_slice %611 {offsets = [0, 96], sizes = [16, 32], strides = [1, 1]} : vector<16x128xf32> to vector<16x32xf32>
    %616 = arith.mulf %613, %593 : vector<16x32xf32>
    %617 = arith.mulf %612, %614 : vector<16x32xf32>
    %618 = arith.addf %616, %617 : vector<16x32xf32>
    %619 = math.tanh %618 : vector<16x32xf32>
    %620 = arith.mulf %615, %619 : vector<16x32xf32>
    %621 = vector.extract_strided_slice %30 {offsets = [7, 0, 0], sizes = [1, 16, 32], strides = [1, 1, 1]} : vector<8x16x32xi1> to vector<1x16x32xi1>
    %622 = vector.shape_cast %621 : vector<1x16x32xi1> to vector<16x32xi1>
    %623 = arith.select %622, %620, %592 : vector<16x32xi1>, vector<16x32xf32>
    %624 = arith.select %622, %618, %593 : vector<16x32xi1>, vector<16x32xf32>
    %cst_221 = arith.constant 0.000000e+00 : f32
    %625 = vector.broadcast %cst_221 : f32 to vector<16x32xf32>
    %626 = arith.select %622, %620, %625 : vector<16x32xi1>, vector<16x32xf32>
    %627 = vector.extract_strided_slice %626 {offsets = [0, 0], sizes = [8, 32], strides = [1, 1]} : vector<16x32xf32> to vector<8x32xf32>
    %c56_222 = arith.constant 56 : index
    %c0_223 = arith.constant 0 : index
    %628 = vector.load %arg10[%c56_222, %c0_223] : memref<64x64xf32, #tpu.memory_space<vmem>>, vector<8x32xf32>
    tpu.vector_store %arg10[%c56_222, %c0_223], %627 {strides = array<i32>} : memref<64x64xf32, #tpu.memory_space<vmem>>, vector<8x32xf32>,
    %629 = vector.extract_strided_slice %626 {offsets = [8, 0], sizes = [8, 32], strides = [1, 1]} : vector<16x32xf32> to vector<8x32xf32>
    %c0_224 = arith.constant 0 : index
    %c32_225 = arith.constant 32 : index
    %630 = vector.load %arg10[%c0_224, %c32_225] : memref<64x64xf32, #tpu.memory_space<vmem>>, vector<8x32xf32>
    tpu.vector_store %arg10[%c0_224, %c32_225], %629 {strides = array<i32>} : memref<64x64xf32, #tpu.memory_space<vmem>>, vector<8x32xf32>,
    %631 = vector.extract_strided_slice %623 {offsets = [0, 0], sizes = [8, 32], strides = [1, 1]} : vector<16x32xf32> to vector<8x32xf32>
    %632 = vector.extract_strided_slice %623 {offsets = [8, 0], sizes = [8, 32], strides = [1, 1]} : vector<16x32xf32> to vector<8x32xf32>
    %633 = tpu.concatenate %631, %632 in 1 : vector<8x32xf32>, vector<8x32xf32> -> vector<8x64xf32>
    %634 = vector.extract_strided_slice %624 {offsets = [0, 0], sizes = [8, 32], strides = [1, 1]} : vector<16x32xf32> to vector<8x32xf32>
    %635 = vector.extract_strided_slice %624 {offsets = [8, 0], sizes = [8, 32], strides = [1, 1]} : vector<16x32xf32> to vector<8x32xf32>
    %636 = tpu.concatenate %634, %635 in 1 : vector<8x32xf32>, vector<8x32xf32> -> vector<8x64xf32>
    %637 = tpu.concatenate %633, %636 in 0 : vector<8x64xf32>, vector<8x64xf32> -> vector<16x64xf32>
    %638 = arith.truncf %637 : vector<16x64xf32> to vector<16x64xbf16>
    %c0_226 = arith.constant 0 : index
    %c0_227 = arith.constant 0 : index
    %639 = vector.load %arg8[%c0_226, %c0_227] : memref<64x32xbf16, #tpu.memory_space<vmem>>, vector<64x32xbf16>
    %cst_228 = arith.constant dense<0.000000e+00> : vector<16x32xf32>
    %640 = tpu.matmul %638, %639, %cst_228 {dimension_numbers = #tpu.dot_dimension_numbers<[1], [0], [0], [1], [0, 0, 1, 1], [], []>} : vector<16x64xbf16>, vector<64x32xbf16>, vector<16x32xf32> -> vector<16x32xf32>
    %c0_229 = arith.constant 0 : index
    %c0_230 = arith.constant 0 : index
    %641 = vector.load %arg9[%c0_229, %c0_230] : memref<1x32xf32, #tpu.memory_space<vmem>>, vector<1x32xf32>
    %642 = vector.broadcast %641 : vector<1x32xf32> to vector<16x32xf32>
    %643 = arith.addf %640, %642 : vector<16x32xf32>
    %644 = math.tanh %643 : vector<16x32xf32>
    %c0_231 = arith.constant 0 : index
    %c0_232 = arith.constant 0 : index
    %645 = vector.load %arg11[%c0_231, %c0_232] : memref<16x32xf32, #tpu.memory_space<vmem>>, vector<16x32xf32>
    tpu.vector_store %arg11[%c0_231, %c0_232], %644 {strides = array<i32>} : memref<16x32xf32, #tpu.memory_space<vmem>>, vector<16x32xf32>,
    return
  }
}

</mosaic_0001>

<bundles_post_ra>
// kernel: encoder_forward.1
= control target key start
LH: loop header
LB: loop body
LE: loop exit
PB: predicated region body
PF: predicated region fallthrough
CT: control target
= control target key end

     0   :  { %v3256_v0 = vmov 0   ;;  %v3257_v5 = vmov 0.0   ;;  %vm3258_vm0 = vmmov 0   ;;  %v40_v30 = vlaneseq  ;;  %s3262_s14 = smov 32   ;;  %s4607_s0 = inlined_call_operand.vmem [shape: s32[64,1], index: 0, kind: input, shape index: {}]   ;;  %s4608_s2 = inlined_call_operand.vmem [shape: bf16[128,256], index: 2, kind: input, shape index: {}]   ;;  %s4609_s4 = inlined_call_operand.vmem [shape: bf16[64,128], index: 4, kind: input, shape index: {}]   ;;  %s4610_s3 = inlined_call_operand.vmem [shape: f32[2,128], index: 3, kind: input, shape index: {}]   ;;  %s4611_s1 = inlined_call_operand.vmem [shape: s32[16,1], index: 1, kind: input, shape index: {}]   ;;  %s4612_s5 = inlined_call_operand.vmem [shape: bf16[64,256], index: 5, kind: input, shape index: {}]   ;;  %s4613_s7 = inlined_call_operand.vmem [shape: bf16[64,128], index: 7, kind: input, shape index: {}]   ;;  %s4614_s6 = inlined_call_operand.vmem [shape: f32[2,128], index: 6, kind: input, shape index: {}]   ;;  %s4615_s8 = inlined_call_operand.vmem [shape: bf16[64,32], index: 8, kind: input, shape index: {}]   ;;  %s4616_s10 = inlined_call_operand.vmem [shape: f32[64,64], index: 10, kind: output, shape index: {0}]   ;;  %s4617_s9 = inlined_call_operand.vmem [shape: f32[1,32], index: 9, kind: input, shape index: {}]   ;;  %s4618_s11 = inlined_call_operand.vmem [shape: f32[16,32], index: 11, kind: output, shape index: {1}]  }
   0x1   :  { %3075 = vset.pattern.permute.xlu1 %v3256_v0  ;;  %3074 = vset.pattern.permute.xlu0 %v3256_v0  ;;  %v97_v1 = vld [vmem:[%s4607_s0 + $0x10] sm:$0xff]  ;;  %v95_v2 = vld [vmem:[%s4607_s0] sm:$0xff]  ;;  %v98_v3 = vld [vmem:[%s4607_s0 + $0x18] sm:$0xff]  ;;  %v3259_v35 = vmov 1.0|1.0   ;;  %v3260_v55 = vmov 0.5  }
   0x2   :  { %110 = vperm.xlu1 %3075, %v97_v1   ;;  %104 = vperm.xlu0 %3074, %v95_v2   ;;  %v96_v4 = vld [vmem:[%s4607_s0 + $0x8] sm:$0xff]  ;;  %v3079_v8 = vld [vmem:[%s4608_s2 + $0x14] ss:$8 sps:$4 sm:$0xff]   ;;  %v99_v10 = vld [vmem:[%s4607_s0 + $0x20] sm:$0xff]  ;;  %v3443_v32 = vand.u32 127, %v40_v30  ;;  %v3466_v45 = vshrl.u32 %v40_v30, 7 }
   0x3   :  { %2845 = vmatprep.subr.bf16.mxu1 %v3257_v5  ;;  %283 = vmatprep.mubr.bf16.mxu0 %v3256_v0  ;;  %v3076_v6 = vld [vmem:[%s4608_s2 + $0x4] ss:$8 sps:$4 sm:$0xff]   ;;  %v3078_v7 = vld [vmem:[%s4608_s2] ss:$8 sps:$4 sm:$0xff]   ;;  %v3081_v11 = vld [vmem:[%s4608_s2 + $0x10] ss:$8 sps:$4 sm:$0xff]  }
   0x4   :  { %v100_v9 = vld [vmem:[%s4607_s0 + $0x28] sm:$0xff]  ;;  %251 = vmatprep.subr.bf16.mxu0 %v3076_v6  ;;  %v102_v12 = vld [vmem:[%s4607_s0 + $0x38] sm:$0xff]  ;;  %v101_v14 = vld [vmem:[%s4607_s0 + $0x30] sm:$0xff]  ;;  %2853 = vmatprep.mubr.msk.bf16.mxu1 %vm3258_vm0, %v3257_v5  ;;  %v327_v46 = vsub.s32 0, %v3466_v45  ;;  %v339_v48 = vsub.s32 1, %v3466_v45  ;;  %vm42_vm13 = vcmp.ge.s32.totalorder %v3443_v32, 64 }
   0x5   :  { %252 = vmatpush1.bf16.msra.mxu0 %v3078_v7  ;;  %v3082_v13 = vld [vmem:[%s4608_s2 + $0x24] ss:$8 sps:$4 sm:$0xff]   ;;  %v3084_v16 = vld [vmem:[%s4608_s2 + $0x20] ss:$8 sps:$4 sm:$0xff]   ;;  %v3085_v17 = vld [vmem:[%s4608_s2 + $0x34] ss:$8 sps:$4 sm:$0xff]  }
   0x6   :  { %113 = vperm.xlu1 %3075, %v98_v3   ;;  %107 = vperm.xlu0 %3074, %v96_v4   ;;  %v3371_v15 = vld [vmem:[%s4609_s4] sm:$0xff]   ;;  %v3385_v18 = vld [vmem:[%s4609_s4 + $0x8] sm:$0xff]   ;;  %v3087_v19 = vld [vmem:[%s4608_s2 + $0x30] ss:$8 sps:$4 sm:$0xff]   ;;  %vm43_vm14 = vcmp.lt.s32.totalorder %v3443_v32, 96 }
   0x7   :  { %253 = vmatprep.subr.bf16.mxu0 %v3079_v8  ;;  %2846 = vmatpush3.bf16.msra.mxu1 %v3371_v15  ;;  %v3088_v20 = vld [vmem:[%s4608_s2 + $0x44] ss:$8 sps:$4 sm:$0xff]   ;;  %v3398_v21 = vld [vmem:[%s4609_s4 + $0x10] sm:$0xff]   ;;  %v3090_v22 = vld [vmem:[%s4608_s2 + $0x40] ss:$8 sps:$4 sm:$0xff]  }
   0x8   :  { %2847 = vmatprep.subr.bf16.mxu1 %v3257_v5  ;;  %v3092_v23 = vld [vmem:[%s4608_s2 + $0x54] ss:$8 sps:$4 sm:$0xff]   ;;  %v3094_v25 = vld [vmem:[%s4608_s2 + $0x50] ss:$8 sps:$4 sm:$0xff]   ;;  %v3096_v26 = vld [vmem:[%s4608_s2 + $0x64] ss:$8 sps:$4 sm:$0xff]  }
   0x9   :  { %254 = vmatpush1.bf16.msra.mxu0 %v3081_v11  ;;  %v3411_v24 = vld [vmem:[%s4609_s4 + $0x18] sm:$0xff]   ;;  %v3098_v27 = vld [vmem:[%s4608_s2 + $0x60] ss:$8 sps:$4 sm:$0xff]   ;;  %vm3479_vm15 = vmand %vm42_vm13, %vm43_vm14 }
   0xa   :  { %119 = vperm.xlu1 %3075, %v100_v9   ;;  %116 = vperm.xlu0 %3074, %v99_v10   ;;  %v3100_v28 = vld [vmem:[%s4608_s2 + $0x74] ss:$8 sps:$4 sm:$0xff]   ;;  %v3102_v29 = vld [vmem:[%s4608_s2 + $0x70] ss:$8 sps:$4 sm:$0xff]   ;;  %v324_v47 = vld [vmem:[%s4610_s3] sm:$0x3] }
   0xb   :  { %255 = vmatprep.subr.bf16.mxu0 %v3082_v13  ;;  %2848 = vmatpush3.bf16.msra.mxu1 %v3385_v18  ;;  %v328_v49 = vrot.slane %v324_v47, %v327_v46  ;;  %v340_v50 = vrot.slane %v324_v47, %v339_v48  ;;  %v3485_v56 = vsel %vm3479_vm15, 1.0, %v3260_v55  ;;  %s3261_s3 = smov 64   ;;  %v39_v47 = vld [vmem:[%s4611_s1 + $0x8] sm:$0xff] }
   0xc   :  { %2849 = vmatprep.subr.bf16.mxu1 %v3257_v5 }
   0xd   :  { %256 = vmatpush1.bf16.msra.mxu0 %v3084_v16 }
   0xe   :  { %125 = vperm.xlu1 %3075, %v102_v12   ;;  %122 = vperm.xlu0 %3074, %v101_v14   ;;  %v3504_v12 = vsel %vm3479_vm15, 0.0, %v3260_v55 }
   0xf   :  { %257 = vmatprep.subr.bf16.mxu0 %v3085_v17  ;;  %2850 = vmatpush3.bf16.msra.mxu1 %v3398_v21 }
  0x10   :  { %2851 = vmatprep.subr.bf16.mxu1 %v3257_v5 }
  0x11   :  { %258 = vmatpush1.bf16.msra.mxu0 %v3087_v19 }
  0x12   :  { %259 = vmatprep.subr.bf16.mxu0 %v3088_v20 }
  0x13   :  { %2852 = vmatpush3.bf16.msra.mxu1 %v3411_v24 }
  0x14   :  { %2857 = vmatprep.subr.bf16.mxu1 %v3257_v5 }
  0x15   :  { %260 = vmatpush1.bf16.msra.mxu0 %v3090_v22 }
  0x16   :  { %261 = vmatprep.subr.bf16.mxu0 %v3092_v23  ;;  %2854 = vmatmul.mubr.bf16.vlgmr.msra.gmra.mrb[0].mxu1 %v3256_v0 }
  0x17   :  { %2858 = vmatpush3.bf16.msra.mxu1 %v3371_v15  ;;  %2865 = vmatprep.mubr.msk.bf16.mxu1 %vm3258_vm0, %v3257_v5 }
  0x18   :  { %2859 = vmatprep.subr.bf16.mxu1 %v3257_v5 }
  0x19   :  { %262 = vmatpush1.bf16.msra.mxu0 %v3094_v25 }
  0x1a   :  { %263 = vmatprep.subr.bf16.mxu0 %v3096_v26 }
  0x1b   :  { %2860 = vmatpush3.bf16.msra.mxu1 %v3385_v18 }
  0x1c   :  { %2861 = vmatprep.subr.bf16.mxu1 %v3257_v5 }
  0x1d   :  { %264 = vmatpush1.bf16.msra.mxu0 %v3098_v27 }
  0x1e   :  { %265 = vmatprep.subr.bf16.mxu0 %v3100_v28 }
  0x1f   :  { %2862 = vmatpush3.bf16.msra.mxu1 %v3398_v21 }
  0x20   :  { %2863 = vmatprep.subr.bf16.mxu1 %v3257_v5 }
  0x21   :  { %266 = vmatpush1.bf16.msra.mxu0 %v3102_v29 }
  0x22   :  { %2881 = vmatprep.subr.bf16.mxu0 %v3257_v5 }
  0x23   :  { %2864 = vmatpush3.bf16.msra.mxu1 %v3411_v24 }
  0x24   :  { %2869 = vmatprep.subr.bf16.mxu1 %v3257_v5 }
  0x81   :  { %v105_v31 = vpop.permute.xlu0 %104  ;;  %v111_v34 = vpop.permute.xlu1 %110 }
  0x82   :  { %vm127_vm2 = vcmp.eq.s32.totalorder %v105_v31, %v3443_v32  ;;  %vm129_vm4 = vcmp.eq.s32.totalorder %v111_v34, %v3443_v32 }
  0x85   :  { %v108_v33 = vpop.permute.xlu0 %107  ;;  %v114_v36 = vpop.permute.xlu1 %113 }
  0x86   :  { %vm128_vm1 = vcmp.eq.s32.totalorder %v108_v33, %v3443_v32  ;;  %vm130_vm5 = vcmp.eq.s32.totalorder %v114_v36, %v3443_v32 }
  0x87   :  { %vm2708_vm3 = vmpackc.low %vm128_vm1, %vm127_vm2 }
  0x88   :  { %2709 = vmatmul.mubr.msk.bf16.vlgmr.msra.gmra.mrb[0].mxu0 %vm2708_vm3, %v3259_v35  ;;  %vm2710_vm6 = vmpackc.low %vm130_vm5, %vm129_vm4  ;;  %vm52_vm3 = vcmp.lt.s32.totalorder %v3443_v32, 32  ;;  %vm3263_vm4 = vmmov 1  }
  0x89   :  { %293 = vmatprep.mubr.bf16.mxu0 %v3256_v0  ;;  %2882 = vmatpush3.bf16.msra.mxu0 %v3371_v15  ;;  %v120_v37 = vpop.permute.xlu1 %119  ;;  %v117_v38 = vpop.permute.xlu0 %116  ;;  %vm53_vm5 = vmxor %vm3263_vm4, %vm52_vm3 }
  0x8a   :  { %2883 = vmatprep.subr.bf16.mxu0 %v3257_v5  ;;  %vm132_vm7 = vcmp.eq.s32.totalorder %v120_v37, %v3443_v32  ;;  %vm131_vm8 = vcmp.eq.s32.totalorder %v117_v38, %v3443_v32 }
  0x8b   :  { %vm2712_vm9 = vmpackc.low %vm132_vm7, %vm131_vm8  ;;  %vm375_vm8 = vcmask 261120  }
  0x8c   :  { %vm56_vm7 = vmxor %vm52_vm3, %vm3263_vm4 }
  0x8d   :  { %2884 = vmatpush3.bf16.msra.mxu0 %v3385_v18  ;;  %v126_v39 = vpop.permute.xlu1 %125  ;;  %v123_v40 = vpop.permute.xlu0 %122 }
  0x8e   :  { %2885 = vmatprep.subr.bf16.mxu0 %v3257_v5  ;;  %vm134_vm10 = vcmp.eq.s32.totalorder %v126_v39, %v3443_v32  ;;  %vm133_vm11 = vcmp.eq.s32.totalorder %v123_v40, %v3443_v32 }
  0x8f   :  { %vm2714_vm12 = vmpackc.low %vm134_vm10, %vm133_vm11  ;;  %vm404_vm10 = vcmask 523264  }
  0x90   :  { %2711 = vmatmul.mubr.msk.bf16.gmra.mrb[4].mxu0 %vm2710_vm6, %v3259_v35  ;;  %vm55_vm6 = vmxor %vm53_vm5, %vm3263_vm4 }
  0x91   :  { %303 = vmatprep.mubr.bf16.mxu0 %v3256_v0  ;;  %2886 = vmatpush3.bf16.msra.mxu0 %v3398_v21 }
  0x92   :  { %2887 = vmatprep.subr.bf16.mxu0 %v3257_v5 }
  0x95   :  { %2888 = vmatpush3.bf16.msra.mxu0 %v3411_v24 }
  0x96   :  { %2905 = vmatprep.subr.bf16.mxu0 %v3257_v5 }
  0x98   :  { %2713 = vmatmul.mubr.msk.bf16.gmra.mrb[8].mxu0 %vm2712_vm9, %v3259_v35  ;;  %vm3562_vm9 = vmpackc.low %vm56_vm7, %vm55_vm6 }
  0x99   :  { %313 = vmatprep.mubr.bf16.mxu0 %v3256_v0 }
  0xa0   :  { %2715 = vmatmul.mubr.msk.bf16.gmra.mrb[12].mxu0 %vm2714_vm12, %v3259_v35 }
  0xa1   :  { %2889 = vmatprep.mubr.msk.bf16.mxu0 %vm3258_vm0, %v3257_v5 }
  0xe9   :  { %v442_v41 = vpop.f32.mrb[0].mxu1 }
  0xea   :  { %v2855_v42 = vpop.f32.mrb[1].mxu1 }
  0xeb   :  { %v445_v43 = vpop.f32.mrb[2].mxu1  ;;  %v38_v42 = vld [vmem:[%s4611_s1] sm:$0xff] }
  0xec   :  { %v2856_v44 = vpop.f32.mrb[3].mxu1 }
 0x15b   :  { %v285_v52 = vpop.f32.mrb[0].mxu0 }
 0x15c   :  { %v329_v53 = vadd.f32 %v328_v49, %v285_v52  ;;  %v287_v54 = vpop.f32.mrb[1].mxu0 }
 0x15d   :  { %v3487_v57 = vadd.f32 %v340_v50, %v287_v54  ;;  %v289_v58 = vpop.f32.mrb[2].mxu0 }
 0x15e   :  { %v3489_v59 = vadd.f32 %v328_v49, %v289_v58  ;;  %v449_v60 = vadd.f32 %v442_v41, %v329_v53  ;;  %v291_v61 = vpop.f32.mrb[3].mxu0 }
 0x15f   :  { %v3491_v62 = vadd.f32 %v340_v50, %v291_v61 }
 0x160   :  { %v451_v63 = vmul.f32 %v449_v60, %v3485_v56 }
 0x162   :  { %3124 = vtanh.f32 %v451_v63 }
 0x163   :  { %v295_v1 = vpop.f32.mrb[4].mxu0 }
 0x164   :  { %v3494_v2 = vadd.f32 %v328_v49, %v295_v1  ;;  %v297_v3 = vpop.f32.mrb[5].mxu0 }
 0x165   :  { %v3496_v4 = vadd.f32 %v340_v50, %v297_v3  ;;  %v299_v6 = vpop.f32.mrb[6].mxu0 }
 0x166   :  { %v3498_v7 = vadd.f32 %v328_v49, %v299_v6  ;;  %v301_v8 = vpop.f32.mrb[7].mxu0 }
 0x167   :  { %v3500_v9 = vadd.f32 %v340_v50, %v301_v8 }
 0x16b   :  { %v305_v10 = vpop.f32.mrb[8].mxu0 }
 0x16c   :  { %v3125_v11 = vpop.eup %3124  ;;  %v3506_v13 = vadd.f32 %v328_v49, %v305_v10  ;;  %v307_v14 = vpop.f32.mrb[9].mxu0 }
 0x16d   :  { %v3508_v16 = vadd.f32 %v340_v50, %v307_v14  ;;  %v309_v17 = vpop.f32.mrb[10].mxu0  ;;  %v455_v19 = vmul.f32 %v3125_v11, %v3485_v56 }
 0x16e   :  { %v3511_v20 = vadd.f32 %v328_v49, %v309_v17  ;;  %v311_v22 = vpop.f32.mrb[11].mxu0 }
 0x16f   :  { %v3513_v23 = vadd.f32 %v340_v50, %v311_v22  ;;  %v457_v25 = vadd.f32 %v455_v19, %v3504_v12 }
 0x171   :  { %463 = vrot.lane.b32.xlu0 %v457_v25, %s3261_s3 }
 0x173   :  { %v315_v26 = vpop.f32.mrb[12].mxu0 }
 0x174   :  { %v3517_v27 = vadd.f32 %v328_v49, %v315_v26  ;;  %v317_v28 = vpop.f32.mrb[13].mxu0 }
 0x175   :  { %v3519_v29 = vadd.f32 %v340_v50, %v317_v28  ;;  %v319_v30 = vpop.f32.mrb[14].mxu0 }
 0x176   :  { %v3521_v31 = vadd.f32 %v328_v49, %v319_v30  ;;  %v321_v33 = vpop.f32.mrb[15].mxu0  ;;  %v459_v49 = vmul.f32 0.0, %v457_v25 }
 0x177   :  { %v348_v34 = vadd.f32 %v340_v50, %v321_v33 }
 0x179   :  { %v450_v35 = vadd.f32 %v445_v43, %v348_v34 }
 0x17b   :  { %v452_v36 = vmul.f32 %v450_v35, %v3485_v56 }
 0x17d   :  { %3126 = vtanh.f32 %v452_v36 }
 0x187   :  { %v3127_v37 = vpop.eup %3126 }
 0x188   :  { %v456_v38 = vmul.f32 %v3127_v37, %v3485_v56 }
 0x18a   :  { %v458_v39 = vadd.f32 %v456_v38, %v3504_v12 }
 0x18c   :  { %465 = vrot.lane.b32.xlu1 %v458_v39, %s3261_s3  ;;  %v460_v53 = vmul.f32 0.0, %v458_v39 }
 0x1e3   :  { %v464_v40 = vpop.permute.xlu0 %463 }
 0x1e4   :  { %v469_v41 = vmul.f32 %v464_v40, %v457_v25 }
 0x1e6   :  { %473 = vrot.lane.b32.xlu0 %v469_v41, %s3262_s14 }
 0x1ea   :  { %74 = vperm.xlu0 %3074, %v38_v42  }
 0x1fe   :  { %v466_v43 = vpop.permute.xlu1 %465 }
 0x1ff   :  { %v470_v44 = vmul.f32 %v466_v43, %v458_v39 }
 0x201   :  { %475 = vrot.lane.b32.xlu1 %v470_v44, %s3262_s14 }
 0x205   :  { %77 = vperm.xlu1 %3075, %v39_v47  }
 0x258   :  { %v474_v50 = vpop.permute.xlu0 %473 }
 0x259   :  { %v3535_v51 = vadd.f32 %v474_v50, %v459_v49 }
 0x25b   :  { %3128 = vtanh.f32 %v3535_v51 }
 0x265   :  { %v3129_v52 = vpop.eup %3128 }
 0x266   :  { %485 = vrot.lane.b32.xlu0 %v3129_v52, %s3261_s3 }
 0x269   :  { %v3543_v60 = vpop.permute.xlu0 %74 }
 0x26a   :  { %vm4620_vm1 = vcmp.gt.s32.totalorder %v3543_v60, 0  ;;  %vm2670_vm11 = vcmp.gt.s32.totalorder %v3543_v60, 1  ;;  %vm2672_vm13 = vcmp.gt.s32.totalorder %v3543_v60, 2  ;;  %vm2674_vm15 = vcmp.gt.s32.totalorder %v3543_v60, 3 }
 0x26b   :  { %v3595_v47 = vsel %vm4620_vm1, %v3535_v51, 0.0  ;;  %vm2676_vm4 = vcmp.gt.s32.totalorder %v3543_v60, 4  ;;  %vm2678_vm6 = vcmp.gt.s32.totalorder %v3543_v60, 5 }
 0x273   :  { %v476_v54 = vpop.permute.xlu1 %475 }
 0x274   :  { %v3539_v55 = vadd.f32 %v476_v54, %v460_v53 }
 0x276   :  { %3130 = vtanh.f32 %v3539_v55 }
 0x280   :  { %v3131_v58 = vpop.eup %3130 }
 0x281   :  { %487 = vrot.lane.b32.xlu1 %v3131_v58, %s3261_s3 }
 0x284   :  { %v3545_v61 = vpop.permute.xlu1 %77 }
 0x285   :  { %vm4619_vm2 = vcmp.gt.s32.totalorder %v3545_v61, 7  ;;  %vm2671_vm12 = vcmp.gt.s32.totalorder %v3545_v61, 6  ;;  %vm2673_vm14 = vcmp.gt.s32.totalorder %v3545_v61, 5  ;;  %vm2675_vm3 = vcmp.gt.s32.totalorder %v3545_v61, 4 }
 0x286   :  { %v3601_v52 = vsel %vm4619_vm2, %v3539_v55, 0.0  ;;  %vm2677_vm5 = vcmp.gt.s32.totalorder %v3545_v61, 3  ;;  %vm2679_vm7 = vcmp.gt.s32.totalorder %v3545_v61, 2 }
 0x2d8   :  { %v486_v63 = vpop.permute.xlu0 %485 }
 0x2d9   :  { %v491_v1 = vmul.f32 %v486_v63, %v457_v25 }
 0x2db   :  { %v3551_v8 = vsel %vm4620_vm1, %v491_v1, 0.0  ;;  %vm4621_vm1 = vcmp.gt.s32.totalorder %v3545_v61, 1 }
 0x2f3   :  { %v488_v3 = vpop.permute.xlu1 %487 }
 0x2f4   :  { %v492_v6 = vmul.f32 %v488_v3, %v458_v39 }
 0x2f6   :  { %v3555_v10 = vsel %vm4619_vm2, %v492_v6, 0.0  ;;  %vm4624_vm2 = vcmp.gt.s32.totalorder %v3543_v60, 6 }
 0x2f7   :  { %v509_v11 = vpack.c.bf16 %v3555_v10, %v3551_v8 }
 0x2f9   :  { %513 = vrot.lane.b32.xlu1 %v509_v11, %s3261_s3  ;;  %511 = vrot.lane.b32.xlu0 %v509_v11, %s3262_s14 }
 0x36b   :  { %v514_v17 = vpop.permute.xlu1 %513  ;;  %v512_v19 = vpop.permute.xlu0 %511 }
 0x36c   :  { %v517_v22 = vsel %vm375_vm8, %v512_v19, %v514_v17 }
 0x36d   :  { %v519_v25 = vsel %vm3562_vm9, %v517_v22, 0 }
 0x36e   :  { %2866 = vmatmul.mubr.msk.bf16.vlgmr.msra.gmra.mrb[4].mxu1 %vm404_vm10, %v519_v25 }
 0x36f   :  { %2870 = vmatpush3.bf16.msra.mxu1 %v3371_v15  ;;  %2877 = vmatprep.mubr.msk.bf16.mxu1 %vm3258_vm0, %v3257_v5 }
 0x370   :  { %2871 = vmatprep.subr.bf16.mxu1 %v3257_v5 }
 0x373   :  { %2872 = vmatpush3.bf16.msra.mxu1 %v3385_v18 }
 0x374   :  { %2873 = vmatprep.subr.bf16.mxu1 %v3257_v5 }
 0x377   :  { %2874 = vmatpush3.bf16.msra.mxu1 %v3398_v21 }
 0x378   :  { %2875 = vmatprep.subr.bf16.mxu1 %v3257_v5 }
 0x37b   :  { %2876 = vmatpush3.bf16.msra.mxu1 %v3411_v24 }
 0x37c   :  { %2893 = vmatprep.subr.bf16.mxu1 %v3257_v5 }
 0x441   :  { %v557_v32 = vpop.f32.mrb[4].mxu1 }
 0x442   :  { %v564_v26 = vadd.f32 %v557_v32, %v3489_v59  ;;  %v2867_v28 = vpop.f32.mrb[5].mxu1 }
 0x443   :  { %v560_v30 = vpop.f32.mrb[6].mxu1 }
 0x444   :  { %v566_v33 = vmul.f32 %v564_v26, %v3485_v56  ;;  %v565_v34 = vadd.f32 %v560_v30, %v3519_v29  ;;  %v2868_v35 = vpop.f32.mrb[7].mxu1 }
 0x446   :  { %3132 = vtanh.f32 %v566_v33  ;;  %v567_v36 = vmul.f32 %v565_v34, %v3485_v56 }
 0x448   :  { %3134 = vtanh.f32 %v567_v36 }
 0x450   :  { %v3133_v37 = vpop.eup %3132 }
 0x451   :  { %v570_v38 = vmul.f32 %v3133_v37, %v3485_v56 }
 0x452   :  { %v3135_v39 = vpop.eup %3134 }
 0x453   :  { %v572_v40 = vadd.f32 %v570_v38, %v3504_v12  ;;  %v571_v41 = vmul.f32 %v3135_v39, %v3485_v56 }
 0x455   :  { %578 = vrot.lane.b32.xlu0 %v572_v40, %s3261_s3  ;;  %v573_v59 = vadd.f32 %v571_v41, %v3504_v12  ;;  %v574_v49 = vmul.f32 %v572_v40, %v3595_v47 }
 0x457   :  { %580 = vrot.lane.b32.xlu1 %v573_v59, %s3261_s3  ;;  %v575_v54 = vmul.f32 %v573_v59, %v3601_v52 }
 0x4c7   :  { %v579_v29 = vpop.permute.xlu0 %578 }
 0x4c8   :  { %v584_v42 = vmul.f32 %v579_v29, %v572_v40 }
 0x4c9   :  { %v581_v43 = vpop.permute.xlu1 %580 }
 0x4ca   :  { %v585_v44 = vmul.f32 %v581_v43, %v573_v59  ;;  %588 = vrot.lane.b32.xlu0 %v584_v42, %s3262_s14 }
 0x4cc   :  { %590 = vrot.lane.b32.xlu1 %v585_v44, %s3262_s14 }
 0x53c   :  { %v589_v50 = vpop.permute.xlu0 %588 }
 0x53d   :  { %v594_v53 = vadd.f32 %v589_v50, %v574_v49 }
 0x53e   :  { %v591_v58 = vpop.permute.xlu1 %590 }
 0x53f   :  { %3136 = vtanh.f32 %v594_v53  ;;  %v595_v63 = vadd.f32 %v591_v58, %v575_v54  ;;  %v3657_v50 = vsel %vm2670_vm11, %v594_v53, %v3595_v47 }
 0x541   :  { %3138 = vtanh.f32 %v595_v63 }
 0x549   :  { %v3137_v1 = vpop.eup %3136 }
 0x54a   :  { %600 = vrot.lane.b32.xlu0 %v3137_v1, %s3261_s3  ;;  %v3663_v1 = vsel %vm2671_vm12, %v595_v63, %v3601_v52 }
 0x54b   :  { %v3139_v51 = vpop.eup %3138 }
 0x54c   :  { %602 = vrot.lane.b32.xlu1 %v3139_v51, %s3261_s3 }
 0x5bc   :  { %v601_v3 = vpop.permute.xlu0 %600 }
 0x5bd   :  { %v3606_v6 = vmul.f32 %v601_v3, %v572_v40 }
 0x5be   :  { %v603_v11 = vpop.permute.xlu1 %602 }
 0x5bf   :  { %v3608_v17 = vmul.f32 %v603_v11, %v573_v59  ;;  %v3616_v55 = vsel %vm2670_vm11, %v3606_v6, %v3551_v8 }
 0x5c1   :  { %v3622_v19 = vsel %vm2671_vm12, %v3608_v17, %v3555_v10 }
 0x5c2   :  { %v626_v22 = vpack.c.bf16 %v3622_v19, %v3616_v55 }
 0x5c4   :  { %630 = vrot.lane.b32.xlu1 %v626_v22, %s3261_s3  ;;  %628 = vrot.lane.b32.xlu0 %v626_v22, %s3262_s14 }
 0x636   :  { %v631_v25 = vpop.permute.xlu1 %630  ;;  %v629_v32 = vpop.permute.xlu0 %628 }
 0x637   :  { %v634_v26 = vsel %vm375_vm8, %v629_v32, %v631_v25 }
 0x638   :  { %v636_v28 = vsel %vm3562_vm9, %v634_v26, 0 }
 0x639   :  { %2878 = vmatmul.mubr.msk.bf16.vlgmr.msra.gmra.mrb[8].mxu1 %vm404_vm10, %v636_v28 }
 0x63a   :  { %2894 = vmatpush3.bf16.msra.mxu1 %v3371_v15  ;;  %2901 = vmatprep.mubr.msk.bf16.mxu1 %vm3258_vm0, %v3257_v5 }
 0x63b   :  { %2895 = vmatprep.subr.bf16.mxu1 %v3257_v5 }
 0x63e   :  { %2896 = vmatpush3.bf16.msra.mxu1 %v3385_v18 }
 0x63f   :  { %2897 = vmatprep.subr.bf16.mxu1 %v3257_v5 }
 0x642   :  { %2898 = vmatpush3.bf16.msra.mxu1 %v3398_v21 }
 0x643   :  { %2899 = vmatprep.subr.bf16.mxu1 %v3257_v5 }
 0x646   :  { %2900 = vmatpush3.bf16.msra.mxu1 %v3411_v24 }
 0x647   :  { %2917 = vmatprep.subr.bf16.mxu1 %v3257_v5 }
 0x70c   :  { %v674_v30 = vpop.f32.mrb[8].mxu1 }
 0x70d   :  { %v681_v33 = vadd.f32 %v674_v30, %v3494_v2  ;;  %v2879_v34 = vpop.f32.mrb[9].mxu1 }
 0x70e   :  { %v677_v35 = vpop.f32.mrb[10].mxu1 }
 0x70f   :  { %v683_v36 = vmul.f32 %v681_v33, %v3485_v56  ;;  %v682_v37 = vadd.f32 %v677_v35, %v3513_v23  ;;  %v2880_v38 = vpop.f32.mrb[11].mxu1 }
 0x711   :  { %3140 = vtanh.f32 %v683_v36  ;;  %v684_v39 = vmul.f32 %v682_v37, %v3485_v56 }
 0x713   :  { %3142 = vtanh.f32 %v684_v39 }
 0x71b   :  { %v3141_v40 = vpop.eup %3140 }
 0x71c   :  { %v687_v41 = vmul.f32 %v3141_v40, %v3485_v56 }
 0x71d   :  { %v3143_v59 = vpop.eup %3142 }
 0x71e   :  { %v689_v29 = vadd.f32 %v687_v41, %v3504_v12  ;;  %v688_v42 = vmul.f32 %v3143_v59, %v3485_v56 }
 0x720   :  { %695 = vrot.lane.b32.xlu0 %v689_v29, %s3261_s3  ;;  %v690_v2 = vadd.f32 %v688_v42, %v3504_v12  ;;  %v691_v54 = vmul.f32 %v689_v29, %v3657_v50 }
 0x722   :  { %697 = vrot.lane.b32.xlu1 %v690_v2, %s3261_s3  ;;  %v692_v3 = vmul.f32 %v690_v2, %v3663_v1 }
 0x792   :  { %v696_v23 = vpop.permute.xlu0 %695 }
 0x793   :  { %v701_v43 = vmul.f32 %v696_v23, %v689_v29 }
 0x794   :  { %v698_v44 = vpop.permute.xlu1 %697 }
 0x795   :  { %v702_v49 = vmul.f32 %v698_v44, %v690_v2  ;;  %705 = vrot.lane.b32.xlu0 %v701_v43, %s3262_s14 }
 0x797   :  { %707 = vrot.lane.b32.xlu1 %v702_v49, %s3262_s14 }
 0x807   :  { %v706_v58 = vpop.permute.xlu0 %705 }
 0x808   :  { %v711_v51 = vadd.f32 %v706_v58, %v691_v54 }
 0x809   :  { %v708_v11 = vpop.permute.xlu1 %707 }
 0x80a   :  { %3144 = vtanh.f32 %v711_v51  ;;  %v712_v22 = vadd.f32 %v708_v11, %v692_v3  ;;  %v3719_v58 = vsel %vm2672_vm13, %v711_v51, %v3657_v50 }
 0x80c   :  { %3146 = vtanh.f32 %v712_v22 }
 0x814   :  { %v3145_v25 = vpop.eup %3144 }
 0x815   :  { %717 = vrot.lane.b32.xlu0 %v3145_v25, %s3261_s3  ;;  %v3725_v25 = vsel %vm2673_vm14, %v712_v22, %v3663_v1 }
 0x816   :  { %v3147_v47 = vpop.eup %3146 }
 0x817   :  { %719 = vrot.lane.b32.xlu1 %v3147_v47, %s3261_s3 }
 0x887   :  { %v718_v53 = vpop.permute.xlu0 %717 }
 0x888   :  { %v3668_v32 = vmul.f32 %v718_v53, %v689_v29 }
 0x889   :  { %v720_v26 = vpop.permute.xlu1 %719 }
 0x88a   :  { %v3670_v28 = vmul.f32 %v720_v26, %v690_v2  ;;  %v3678_v52 = vsel %vm2672_vm13, %v3668_v32, %v3616_v55 }
 0x88c   :  { %v3684_v63 = vsel %vm2673_vm14, %v3670_v28, %v3622_v19 }
 0x88d   :  { %v743_v30 = vpack.c.bf16 %v3684_v63, %v3678_v52 }
 0x88f   :  { %747 = vrot.lane.b32.xlu1 %v743_v30, %s3261_s3  ;;  %745 = vrot.lane.b32.xlu0 %v743_v30, %s3262_s14 }
 0x901   :  { %v748_v33 = vpop.permute.xlu1 %747  ;;  %v746_v34 = vpop.permute.xlu0 %745 }
 0x902   :  { %v751_v35 = vsel %vm375_vm8, %v746_v34, %v748_v33 }
 0x903   :  { %v753_v55 = vsel %vm3562_vm9, %v751_v35, 0 }
 0x904   :  { %2890 = vmatmul.mubr.msk.bf16.vlgmr.msra.gmra.mrb[16].mxu0 %vm404_vm10, %v753_v55 }
 0x905   :  { %2906 = vmatpush3.bf16.msra.mxu0 %v3371_v15  ;;  %2913 = vmatprep.mubr.msk.bf16.mxu0 %vm3258_vm0, %v3257_v5 }
 0x906   :  { %2907 = vmatprep.subr.bf16.mxu0 %v3257_v5 }
 0x909   :  { %2908 = vmatpush3.bf16.msra.mxu0 %v3385_v18 }
 0x90a   :  { %2909 = vmatprep.subr.bf16.mxu0 %v3257_v5 }
 0x90d   :  { %2910 = vmatpush3.bf16.msra.mxu0 %v3398_v21 }
 0x90e   :  { %2911 = vmatprep.subr.bf16.mxu0 %v3257_v5 }
 0x911   :  { %2912 = vmatpush3.bf16.msra.mxu0 %v3411_v24 }
 0x912   :  { %2929 = vmatprep.subr.bf16.mxu0 %v3257_v5 }
 0x9d7   :  { %v791_v19 = vpop.f32.mrb[16].mxu0 }
 0x9d8   :  { %v798_v36 = vadd.f32 %v791_v19, %v3498_v7  ;;  %v2891_v37 = vpop.f32.mrb[17].mxu0 }
 0x9d9   :  { %v794_v38 = vpop.f32.mrb[18].mxu0 }
 0x9da   :  { %v800_v39 = vmul.f32 %v798_v36, %v3485_v56  ;;  %v799_v40 = vadd.f32 %v794_v38, %v3508_v16  ;;  %v2892_v41 = vpop.f32.mrb[19].mxu0 }
 0x9dc   :  { %3148 = vtanh.f32 %v800_v39  ;;  %v801_v59 = vmul.f32 %v799_v40, %v3485_v56 }
 0x9de   :  { %3150 = vtanh.f32 %v801_v59 }
 0x9e6   :  { %v3149_v29 = vpop.eup %3148 }
 0x9e7   :  { %v804_v42 = vmul.f32 %v3149_v29, %v3485_v56 }
 0x9e8   :  { %v3151_v2 = vpop.eup %3150 }
 0x9e9   :  { %v806_v23 = vadd.f32 %v804_v42, %v3504_v12  ;;  %v805_v43 = vmul.f32 %v3151_v2, %v3485_v56 }
 0x9eb   :  { %812 = vrot.lane.b32.xlu0 %v806_v23, %s3261_s3  ;;  %v807_v7 = vadd.f32 %v805_v43, %v3504_v12  ;;  %v808_v3 = vmul.f32 %v806_v23, %v3719_v58 }
 0x9ed   :  { %814 = vrot.lane.b32.xlu1 %v807_v7, %s3261_s3  ;;  %v809_v53 = vmul.f32 %v807_v7, %v3725_v25 }
 0xa5d   :  { %v813_v16 = vpop.permute.xlu0 %812 }
 0xa5e   :  { %v818_v44 = vmul.f32 %v813_v16, %v806_v23 }
 0xa5f   :  { %v815_v49 = vpop.permute.xlu1 %814 }
 0xa60   :  { %v819_v54 = vmul.f32 %v815_v49, %v807_v7  ;;  %822 = vrot.lane.b32.xlu0 %v818_v44, %s3262_s14 }
 0xa62   :  { %824 = vrot.lane.b32.xlu1 %v819_v54, %s3262_s14 }
 0xad2   :  { %v823_v11 = vpop.permute.xlu0 %822 }
 0xad3   :  { %v828_v47 = vadd.f32 %v823_v11, %v808_v3 }
 0xad4   :  { %v825_v26 = vpop.permute.xlu1 %824 }
 0xad5   :  { %3152 = vtanh.f32 %v828_v47  ;;  %v829_v30 = vadd.f32 %v825_v26, %v809_v53  ;;  %v3780_v11 = vsel %vm2674_vm15, %v828_v47, %v3719_v58 }
 0xad7   :  { %3154 = vtanh.f32 %v829_v30 }
 0xadf   :  { %v3153_v33 = vpop.eup %3152 }
 0xae0   :  { %834 = vrot.lane.b32.xlu0 %v3153_v33, %s3261_s3  ;;  %v3786_v33 = vsel %vm2675_vm3, %v829_v30, %v3725_v25 }
 0xae1   :  { %v3155_v50 = vpop.eup %3154 }
 0xae2   :  { %836 = vrot.lane.b32.xlu1 %v3155_v50, %s3261_s3 }
 0xb52   :  { %v835_v51 = vpop.permute.xlu0 %834 }
 0xb53   :  { %v3730_v34 = vmul.f32 %v835_v51, %v806_v23 }
 0xb54   :  { %v837_v35 = vpop.permute.xlu1 %836 }
 0xb55   :  { %v3732_v55 = vmul.f32 %v837_v35, %v807_v7  ;;  %v3740_v1 = vsel %vm2674_vm15, %v3730_v34, %v3678_v52 }
 0xb57   :  { %v3746_v22 = vsel %vm2675_vm3, %v3732_v55, %v3684_v63 }
 0xb58   :  { %v860_v19 = vpack.c.bf16 %v3746_v22, %v3740_v1 }
 0xb5a   :  { %864 = vrot.lane.b32.xlu1 %v860_v19, %s3261_s3  ;;  %862 = vrot.lane.b32.xlu0 %v860_v19, %s3262_s14 }
 0xbcc   :  { %v865_v36 = vpop.permute.xlu1 %864  ;;  %v863_v37 = vpop.permute.xlu0 %862 }
 0xbcd   :  { %v868_v38 = vsel %vm375_vm8, %v863_v37, %v865_v36 }
 0xbce   :  { %v870_v52 = vsel %vm3562_vm9, %v868_v38, 0 }
 0xbcf   :  { %2902 = vmatmul.mubr.msk.bf16.vlgmr.msra.gmra.mrb[12].mxu1 %vm404_vm10, %v870_v52 }
 0xbd0   :  { %2918 = vmatpush3.bf16.msra.mxu1 %v3371_v15  ;;  %2925 = vmatprep.mubr.msk.bf16.mxu1 %vm3258_vm0, %v3257_v5 }
 0xbd1   :  { %2919 = vmatprep.subr.bf16.mxu1 %v3257_v5 }
 0xbd4   :  { %2920 = vmatpush3.bf16.msra.mxu1 %v3385_v18 }
 0xbd5   :  { %2921 = vmatprep.subr.bf16.mxu1 %v3257_v5 }
 0xbd8   :  { %2922 = vmatpush3.bf16.msra.mxu1 %v3398_v21 }
 0xbd9   :  { %2923 = vmatprep.subr.bf16.mxu1 %v3257_v5 }
 0xbdc   :  { %2924 = vmatpush3.bf16.msra.mxu1 %v3411_v24 }
 0xca2   :  { %v908_v63 = vpop.f32.mrb[12].mxu1 }
 0xca3   :  { %v915_v39 = vadd.f32 %v908_v63, %v3506_v13  ;;  %v2903_v40 = vpop.f32.mrb[13].mxu1 }
 0xca4   :  { %v911_v41 = vpop.f32.mrb[14].mxu1 }
 0xca5   :  { %v917_v59 = vmul.f32 %v915_v39, %v3485_v56  ;;  %v916_v29 = vadd.f32 %v911_v41, %v3500_v9  ;;  %v2904_v42 = vpop.f32.mrb[15].mxu1 }
 0xca7   :  { %3156 = vtanh.f32 %v917_v59  ;;  %v918_v2 = vmul.f32 %v916_v29, %v3485_v56 }
 0xca9   :  { %3158 = vtanh.f32 %v918_v2 }
 0xcb1   :  { %v3157_v23 = vpop.eup %3156 }
 0xcb2   :  { %v921_v43 = vmul.f32 %v3157_v23, %v3485_v56 }
 0xcb3   :  { %v3159_v7 = vpop.eup %3158 }
 0xcb4   :  { %v923_v16 = vadd.f32 %v921_v43, %v3504_v12  ;;  %v922_v44 = vmul.f32 %v3159_v7, %v3485_v56 }
 0xcb6   :  { %929 = vrot.lane.b32.xlu0 %v923_v16, %s3261_s3  ;;  %v924_v13 = vadd.f32 %v922_v44, %v3504_v12  ;;  %v925_v53 = vmul.f32 %v923_v16, %v3780_v11 }
 0xcb8   :  { %931 = vrot.lane.b32.xlu1 %v924_v13, %s3261_s3  ;;  %v926_v51 = vmul.f32 %v924_v13, %v3786_v33 }
 0xd28   :  { %v930_v9 = vpop.permute.xlu0 %929 }
 0xd29   :  { %v935_v49 = vmul.f32 %v930_v9, %v923_v16 }
 0xd2a   :  { %v932_v54 = vpop.permute.xlu1 %931 }
 0xd2b   :  { %v936_v3 = vmul.f32 %v932_v54, %v924_v13  ;;  %939 = vrot.lane.b32.xlu0 %v935_v49, %s3262_s14 }
 0xd2d   :  { %941 = vrot.lane.b32.xlu1 %v936_v3, %s3262_s14 }
 0xd9d   :  { %v940_v26 = vpop.permute.xlu0 %939 }
 0xd9e   :  { %v945_v50 = vadd.f32 %v940_v26, %v925_v53 }
 0xd9f   :  { %v942_v35 = vpop.permute.xlu1 %941 }
 0xda0   :  { %3160 = vtanh.f32 %v945_v50  ;;  %v946_v19 = vadd.f32 %v942_v35, %v926_v51  ;;  %v961_v49 = vsel %vm2676_vm4, %v945_v50, %v3780_v11 }
 0xda2   :  { %3162 = vtanh.f32 %v946_v19  ;;  %v962_v53 = vsel %vm2677_vm5, %v946_v19, %v3786_v33 }
 0xdaa   :  { %v3161_v36 = vpop.eup %3160 }
 0xdab   :  { %951 = vrot.lane.b32.xlu0 %v3161_v36, %s3261_s3 }
 0xdac   :  { %v3163_v58 = vpop.eup %3162 }
 0xdad   :  { %953 = vrot.lane.b32.xlu1 %v3163_v58, %s3261_s3 }
 0xe1d   :  { %v952_v47 = vpop.permute.xlu0 %951 }
 0xe1e   :  { %v3791_v37 = vmul.f32 %v952_v47, %v923_v16 }
 0xe1f   :  { %v954_v38 = vpop.permute.xlu1 %953 }
 0xe20   :  { %v3793_v52 = vmul.f32 %v954_v38, %v924_v13  ;;  %v3801_v25 = vsel %vm2676_vm4, %v3791_v37, %v3740_v1 }
 0xe22   :  { %v3807_v30 = vsel %vm2677_vm5, %v3793_v52, %v3746_v22 }
 0xe23   :  { %v977_v63 = vpack.c.bf16 %v3807_v30, %v3801_v25 }
 0xe25   :  { %981 = vrot.lane.b32.xlu1 %v977_v63, %s3261_s3  ;;  %979 = vrot.lane.b32.xlu0 %v977_v63, %s3262_s14 }
 0xe97   :  { %v982_v39 = vpop.permute.xlu1 %981  ;;  %v980_v40 = vpop.permute.xlu0 %979 }
 0xe98   :  { %v985_v41 = vsel %vm375_vm8, %v980_v40, %v982_v39 }
 0xe99   :  { %v987_v1 = vsel %vm3562_vm9, %v985_v41, 0 }
 0xe9a   :  { %2914 = vmatmul.mubr.msk.bf16.vlgmr.msra.gmra.mrb[20].mxu0 %vm404_vm10, %v987_v1 }
 0xe9b   :  { %2930 = vmatpush3.bf16.msra.mxu0 %v3371_v15  ;;  %2937 = vmatprep.mubr.msk.bf16.mxu0 %vm3258_vm0, %v3257_v5 }
 0xe9c   :  { %2931 = vmatprep.subr.bf16.mxu0 %v3257_v5 }
 0xe9f   :  { %2932 = vmatpush3.bf16.msra.mxu0 %v3385_v18 }
 0xea0   :  { %2933 = vmatprep.subr.bf16.mxu0 %v3257_v5 }
 0xea3   :  { %2934 = vmatpush3.bf16.msra.mxu0 %v3398_v21 }
 0xea4   :  { %2935 = vmatprep.subr.bf16.mxu0 %v3257_v5 }
 0xea7   :  { %2936 = vmatpush3.bf16.msra.mxu0 %v3411_v24 }
 0xea8   :  { %2941 = vmatprep.subr.bf16.mxu0 %v3257_v5 }
 0xf6d   :  { %v1025_v22 = vpop.f32.mrb[20].mxu0 }
 0xf6e   :  { %v1032_v15 = vadd.f32 %v1025_v22, %v3511_v20  ;;  %v2915_v59 = vpop.f32.mrb[21].mxu0 }
 0xf6f   :  { %v1028_v29 = vpop.f32.mrb[22].mxu0 }
 0xf70   :  { %v1034_v42 = vmul.f32 %v1032_v15, %v3485_v56  ;;  %v1033_v2 = vadd.f32 %v1028_v29, %v3496_v4  ;;  %v2916_v18 = vpop.f32.mrb[23].mxu0 }
 0xf72   :  { %3164 = vtanh.f32 %v1034_v42  ;;  %v1035_v23 = vmul.f32 %v1033_v2, %v3485_v56 }
 0xf74   :  { %3166 = vtanh.f32 %v1035_v23 }
 0xf7c   :  { %v3165_v21 = vpop.eup %3164 }
 0xf7d   :  { %v1038_v43 = vmul.f32 %v3165_v21, %v3485_v56 }
 0xf7e   :  { %v3167_v24 = vpop.eup %3166 }
 0xf7f   :  { %v1040_v7 = vadd.f32 %v1038_v43, %v3504_v12  ;;  %v1039_v16 = vmul.f32 %v3167_v24, %v3485_v56 }
 0xf81   :  { %1046 = vrot.lane.b32.xlu0 %v1040_v7, %s3261_s3  ;;  %v1041_v20 = vadd.f32 %v1039_v16, %v3504_v12  ;;  %v1042_v54 = vmul.f32 %v1040_v7, %v961_v49 }
 0xf83   :  { %1048 = vrot.lane.b32.xlu1 %v1041_v20, %s3261_s3  ;;  %v1043_v51 = vmul.f32 %v1041_v20, %v962_v53 }
 0xff3   :  { %v1047_v4 = vpop.permute.xlu0 %1046 }
 0xff4   :  { %v1052_v44 = vmul.f32 %v1047_v4, %v1040_v7 }
 0xff5   :  { %v1049_v13 = vpop.permute.xlu1 %1048 }
 0xff6   :  { %v1053_v9 = vmul.f32 %v1049_v13, %v1041_v20  ;;  %1056 = vrot.lane.b32.xlu0 %v1052_v44, %s3262_s14 }
 0xff8   :  { %1058 = vrot.lane.b32.xlu1 %v1053_v9, %s3262_s14 }
0x1068   :  { %v1057_v3 = vpop.permute.xlu0 %1056 }
0x1069   :  { %v1062_v26 = vadd.f32 %v1057_v3, %v1042_v54 }
0x106a   :  { %v1059_v35 = vpop.permute.xlu1 %1058 }
0x106b   :  { %3168 = vtanh.f32 %v1062_v26  ;;  %v1063_v36 = vadd.f32 %v1059_v35, %v1043_v51  ;;  %v1078_v44 = vsel %vm2678_vm6, %v1062_v26, %v961_v49 }
0x106d   :  { %3170 = vtanh.f32 %v1063_v36  ;;  %v1079_v54 = vsel %vm2679_vm7, %v1063_v36, %v962_v53 }
0x1075   :  { %v3169_v58 = vpop.eup %3168 }
0x1076   :  { %1068 = vrot.lane.b32.xlu0 %v3169_v58, %s3261_s3 }
0x1077   :  { %v3171_v47 = vpop.eup %3170 }
0x1078   :  { %1070 = vrot.lane.b32.xlu1 %v3171_v47, %s3261_s3 }
0x10e8   :  { %v1069_v38 = vpop.permute.xlu0 %1068 }
0x10e9   :  { %v3847_v11 = vmul.f32 %v1069_v38, %v1040_v7 }
0x10ea   :  { %v1071_v50 = vpop.permute.xlu1 %1070 }
0x10eb   :  { %v3849_v63 = vmul.f32 %v1071_v50, %v1041_v20  ;;  %v1076_v33 = vsel %vm2678_vm6, %v3847_v11, %v3801_v25 }
0x10ed   :  { %v1077_v19 = vsel %vm2679_vm7, %v3849_v63, %v3807_v30 }
0x10ee   :  { %v1094_v39 = vpack.c.bf16 %v1077_v19, %v1076_v33 }
0x10f0   :  { %1098 = vrot.lane.b32.xlu1 %v1094_v39, %s3261_s3  ;;  %1096 = vrot.lane.b32.xlu0 %v1094_v39, %s3262_s14 }
0x1162   :  { %v1099_v40 = vpop.permute.xlu1 %1098  ;;  %v1097_v41 = vpop.permute.xlu0 %1096 }
0x1163   :  { %v1102_v1 = vsel %vm375_vm8, %v1097_v41, %v1099_v40 }
0x1164   :  { %v1104_v22 = vsel %vm3562_vm9, %v1102_v1, 0 }
0x1165   :  { %2926 = vmatmul.mubr.msk.bf16.vlgmr.msra.gmra.mrb[16].mxu1 %vm404_vm10, %v1104_v22 }
0x1166   :  { %1418 = vmatprep.mubr.bf16.mxu1 %v3256_v0 }
0x1238   :  { %v1142_v25 = vpop.f32.mrb[16].mxu1 }
0x1239   :  { %v1149_v15 = vadd.f32 %v1142_v25, %v3517_v27  ;;  %v2927_v30 = vpop.f32.mrb[17].mxu1 }
0x123a   :  { %v1145_v59 = vpop.f32.mrb[18].mxu1 }
0x123b   :  { %v1151_v29 = vmul.f32 %v1149_v15, %v3485_v56  ;;  %v1150_v42 = vadd.f32 %v1145_v59, %v3491_v62  ;;  %v2928_v2 = vpop.f32.mrb[19].mxu1 }
0x123d   :  { %3172 = vtanh.f32 %v1151_v29  ;;  %v1152_v18 = vmul.f32 %v1150_v42, %v3485_v56 }
0x123f   :  { %3174 = vtanh.f32 %v1152_v18 }
0x1247   :  { %v3173_v23 = vpop.eup %3172 }
0x1248   :  { %v1155_v21 = vmul.f32 %v3173_v23, %v3485_v56 }
0x1249   :  { %v3175_v43 = vpop.eup %3174 }
0x124a   :  { %v1157_v24 = vadd.f32 %v1155_v21, %v3504_v12  ;;  %v1156_v7 = vmul.f32 %v3175_v43, %v3485_v56 }
0x124c   :  { %1163 = vrot.lane.b32.xlu0 %v1157_v24, %s3261_s3  ;;  %v1158_v27 = vadd.f32 %v1156_v7, %v3504_v12  ;;  %v1159_v13 = vmul.f32 %v1157_v24, %v1078_v44 }
0x124e   :  { %1165 = vrot.lane.b32.xlu1 %v1158_v27, %s3261_s3  ;;  %v1160_v51 = vmul.f32 %v1158_v27, %v1079_v54 }
0x12be   :  { %v1164_v62 = vpop.permute.xlu0 %1163 }
0x12bf   :  { %v1169_v16 = vmul.f32 %v1164_v62, %v1157_v24 }
0x12c0   :  { %v1166_v20 = vpop.permute.xlu1 %1165 }
0x12c1   :  { %v1170_v4 = vmul.f32 %v1166_v20, %v1158_v27  ;;  %1173 = vrot.lane.b32.xlu0 %v1169_v16, %s3262_s14 }
0x12c3   :  { %1175 = vrot.lane.b32.xlu1 %v1170_v4, %s3262_s14 }
0x1333   :  { %v1174_v9 = vpop.permute.xlu0 %1173 }
0x1334   :  { %v1179_v3 = vadd.f32 %v1174_v9, %v1159_v13 }
0x1335   :  { %v1176_v35 = vpop.permute.xlu1 %1175 }
0x1336   :  { %3176 = vtanh.f32 %v1179_v3  ;;  %v1180_v58 = vadd.f32 %v1176_v35, %v1160_v51  ;;  %v1195_v16 = vsel %vm4624_vm2, %v1179_v3, %v1078_v44  ;;  %v730_v3 = vsel %vm2673_vm14, %v3670_v28, 0.0 }
0x1338   :  { %3178 = vtanh.f32 %v1180_v58  ;;  %v1196_v13 = vsel %vm4621_vm1, %v1180_v58, %v1079_v54  ;;  %v964_v54 = vsel %vm2677_vm5, %v3793_v52, 0.0  ;;  %v729_v58 = vsel %vm2672_vm13, %v3668_v32, 0.0  ;;  %v3109_v32 = vld [vmem:[%s4612_s5 + $0x34] ss:$8 sps:$4 sm:$0xff]  }
0x1339   :  { %v963_v52 = vsel %vm2676_vm4, %v3791_v37, 0.0  ;;  %v3107_v37 = vld [vmem:[%s4612_s5 + $0x30] ss:$8 sps:$4 sm:$0xff]  }
0x1340   :  { %v3177_v47 = vpop.eup %3176 }
0x1341   :  { %1185 = vrot.lane.b32.xlu0 %v3177_v47, %s3261_s3 }
0x1342   :  { %v3179_v38 = vpop.eup %3178 }
0x1343   :  { %1187 = vrot.lane.b32.xlu1 %v3179_v38, %s3261_s3 }
0x13b3   :  { %v1186_v50 = vpop.permute.xlu0 %1185 }
0x13b4   :  { %v3886_v39 = vmul.f32 %v1186_v50, %v1157_v24 }
0x13b5   :  { %v1188_v49 = vpop.permute.xlu1 %1187 }
0x13b6   :  { %v1192_v26 = vmul.f32 %v1188_v49, %v1158_v27  ;;  %v1193_v53 = vsel %vm4624_vm2, %v3886_v39, %v1076_v33  ;;  %v1197_v28 = vsel %vm4624_vm2, %v3886_v39, 0.0  ;;  %v3112_v39 = vld [vmem:[%s4612_s5 + $0x4] ss:$8 sps:$4 sm:$0xff]   ;;  %vm4630_vm2 = vcmp.gt.s32.totalorder %v3545_v61, 7 }
0x13b8   :  { %v1194_v36 = vsel %vm4621_vm1, %v1192_v26, %v1077_v19  ;;  %v1198_v44 = vsel %vm4621_vm1, %v1192_v26, 0.0  ;;  %vm4622_vm1 = vcmp.gt.s32.totalorder %v3545_v61, 0 }
0x13b9   :  { %v1211_v40 = vpack.c.bf16 %v1194_v36, %v1193_v53 }
0x13bb   :  { %1215 = vrot.lane.b32.xlu1 %v1211_v40, %s3261_s3  ;;  %1213 = vrot.lane.b32.xlu0 %v1211_v40, %s3262_s14  ;;  %v1081_v40 = vsel %vm2679_vm7, %v3849_v63, 0.0 }
0x142d   :  { %v1216_v41 = vpop.permute.xlu1 %1215  ;;  %v1214_v1 = vpop.permute.xlu0 %1213 }
0x142e   :  { %v1219_v22 = vsel %vm375_vm8, %v1214_v1, %v1216_v41  ;;  %v847_v1 = vsel %vm2675_vm3, %v3732_v55, 0.0 }
0x142f   :  { %v1221_v25 = vsel %vm3562_vm9, %v1219_v22, 0 }
0x1430   :  { %2938 = vmatmul.mubr.msk.bf16.vlgmr.msra.gmra.mrb[24].mxu0 %vm404_vm10, %v1221_v25  ;;  %v613_v25 = vsel %vm2671_vm12, %v3608_v17, 0.0  ;;  %v846_v17 = vsel %vm2674_vm15, %v3730_v34, 0.0  ;;  %v1080_v34 = vsel %vm2678_vm6, %v3847_v11, 0.0  ;;  %v4030_v11 = vld [vmem:[%s4613_s7 + $0x18] sm:$0xff]  }
0x1431   :  { %2949 = vmatprep.mubr.msk.bf16.mxu0 %vm3258_vm0, %v3257_v5 }
0x1503   :  { %v1259_v33 = vpop.f32.mrb[24].mxu0 }
0x1504   :  { %v1266_v19 = vadd.f32 %v1259_v33, %v3521_v31  ;;  %v2939_v15 = vpop.f32.mrb[25].mxu0  ;;  %v612_v33 = vsel %vm2670_vm11, %v3606_v6, 0.0  ;;  %v4005_v6 = vld [vmem:[%s4613_s7 + $0x8] sm:$0xff]  }
0x1505   :  { %v1262_v30 = vpop.f32.mrb[26].mxu0 }
0x1506   :  { %v1268_v59 = vmul.f32 %v1266_v19, %v3485_v56  ;;  %v1267_v29 = vadd.f32 %v1262_v30, %v3487_v57  ;;  %v2940_v42 = vpop.f32.mrb[27].mxu0  ;;  %v3996_v19 = vld [vmem:[%s4613_s7] sm:$0xff]  }
0x1507   :  { %2942 = vmatpush3.bf16.msra.mxu0 %v3996_v19 }
0x1508   :  { %3180 = vtanh.f32 %v1268_v59  ;;  %v1269_v2 = vmul.f32 %v1267_v29, %v3485_v56  ;;  %2943 = vmatprep.subr.bf16.mxu0 %v3257_v5  ;;  %v4018_v29 = vld [vmem:[%s4613_s7 + $0x10] sm:$0xff]  }
0x150a   :  { %3182 = vtanh.f32 %v1269_v2 }
0x150b   :  { %2944 = vmatpush3.bf16.msra.mxu0 %v4005_v6 }
0x150c   :  { %2945 = vmatprep.subr.bf16.mxu0 %v3257_v5 }
0x150f   :  { %2946 = vmatpush3.bf16.msra.mxu0 %v4018_v29 }
0x1510   :  { %2947 = vmatprep.subr.bf16.mxu0 %v3257_v5 }
0x1512   :  { %v3181_v18 = vpop.eup %3180 }
0x1513   :  { %v1272_v23 = vmul.f32 %v3181_v18, %v3485_v56  ;;  %2948 = vmatpush3.bf16.msra.mxu0 %v4030_v11 }
0x1514   :  { %v3183_v21 = vpop.eup %3182  ;;  %2953 = vmatprep.subr.bf16.mxu0 %v3257_v5 }
0x1515   :  { %v3909_v43 = vadd.f32 %v1272_v23, %v3504_v12  ;;  %v1273_v31 = vmul.f32 %v3183_v21, %v3485_v56 }
0x1516   :  { %2950 = vmatmul.mubr.bf16.vlgmr.msra.gmra.mrb[28].mxu0 %v3256_v0 }
0x1517   :  { %1280 = vrot.lane.b32.xlu1 %v3909_v43, %s3261_s3  ;;  %v1275_v24 = vadd.f32 %v1273_v31, %v3504_v12  ;;  %v1276_v20 = vmul.f32 %v3909_v43, %v1195_v16  ;;  %2954 = vmatpush3.bf16.msra.mxu0 %v3996_v19  ;;  %v3110_v31 = vld [vmem:[%s4612_s5] ss:$8 sps:$4 sm:$0xff]   ;;  %v3113_v16 = vld [vmem:[%s4612_s5 + $0x10] ss:$8 sps:$4 sm:$0xff]  }
0x1518   :  { %2961 = vmatprep.mubr.msk.bf16.mxu0 %vm3258_vm0, %v3257_v5  ;;  %2955 = vmatprep.subr.bf16.mxu0 %v3257_v5 }
0x1519   :  { %1282 = vrot.lane.b32.xlu0 %v1275_v24, %s3261_s3  ;;  %v1277_v51 = vmul.f32 %v1275_v24, %v1196_v13 }
0x151b   :  { %2956 = vmatpush3.bf16.msra.mxu0 %v4005_v6 }
0x151c   :  { %2957 = vmatprep.subr.bf16.mxu0 %v3257_v5 }
0x151f   :  { %2958 = vmatpush3.bf16.msra.mxu0 %v4018_v29 }
0x1520   :  { %2959 = vmatprep.subr.bf16.mxu0 %v3257_v5 }
0x1523   :  { %2960 = vmatpush3.bf16.msra.mxu0 %v4030_v11 }
0x1524   :  { %2965 = vmatprep.subr.bf16.mxu0 %v3257_v5 }
0x1589   :  { %v1281_v57 = vpop.permute.xlu1 %1280 }
0x158a   :  { %v1286_v7 = vmul.f32 %v1281_v57, %v3909_v43 }
0x158b   :  { %v1283_v27 = vpop.permute.xlu0 %1282 }
0x158c   :  { %v1287_v62 = vmul.f32 %v1283_v27, %v1275_v24  ;;  %1290 = vrot.lane.b32.xlu1 %v1286_v7, %s3262_s14  ;;  %v3115_v27 = vld [vmem:[%s4612_s5 + $0x14] ss:$8 sps:$4 sm:$0xff]  }
0x158e   :  { %1292 = vrot.lane.b32.xlu0 %v1287_v62, %s3262_s14 }
0x15fe   :  { %v1291_v4 = vpop.permute.xlu1 %1290 }
0x15ff   :  { %v1296_v9 = vadd.f32 %v1291_v4, %v1276_v20 }
0x1600   :  { %v1293_v35 = vpop.permute.xlu0 %1292 }
0x1601   :  { %3184 = vtanh.f32 %v1296_v9  ;;  %v1297_v47 = vadd.f32 %v1293_v35, %v1277_v51 }
0x1603   :  { %3186 = vtanh.f32 %v1297_v47 }
0x160b   :  { %v3185_v38 = vpop.eup %3184 }
0x160c   :  { %1302 = vrot.lane.b32.xlu1 %v3185_v38, %s3261_s3 }
0x160d   :  { %v3187_v50 = vpop.eup %3186 }
0x160e   :  { %1304 = vrot.lane.b32.xlu0 %v3187_v50, %s3261_s3 }
0x1612   :  { %1205 = vrot.lane.b32.xlu0 %v1198_v44, %s3262_s14 }
0x1616   :  { %971 = vrot.lane.b32.xlu0 %v964_v54, %s3262_s14 }
0x161a   :  { %737 = vrot.lane.b32.xlu0 %v730_v3, %s3262_s14 }
0x161e   :  { %503 = vrot.lane.b32.xlu0 %v3555_v10, %s3262_s14  ;;  %v3106_v10 = vld [vmem:[%s4612_s5 + $0x24] ss:$8 sps:$4 sm:$0xff]  }
0x161f   :  { %1386 = vmatprep.subr.bf16.mxu1 %v3106_v10 }
0x1622   :  { %498 = vrot.lane.b32.xlu0 %v3551_v8, %s3262_s14  ;;  %v3104_v8 = vld [vmem:[%s4612_s5 + $0x20] ss:$8 sps:$4 sm:$0xff]  }
0x1623   :  { %1387 = vmatpush1.bf16.msra.mxu1 %v3104_v8 }
0x1624   :  { %1388 = vmatprep.subr.bf16.mxu1 %v3109_v32 }
0x1626   :  { %732 = vrot.lane.b32.xlu0 %v729_v58, %s3262_s14 }
0x1627   :  { %1389 = vmatpush1.bf16.msra.mxu1 %v3107_v37 }
0x1628   :  { %1491 = vmatprep.subr.bf16.mxu1 %v3112_v39 }
0x162a   :  { %966 = vrot.lane.b32.xlu0 %v963_v52, %s3262_s14 }
0x162e   :  { %1200 = vrot.lane.b32.xlu0 %v1197_v28, %s3262_s14 }
0x167e   :  { %v1303_v15 = vpop.permute.xlu1 %1302 }
0x167f   :  { %v1308_v59 = vmul.f32 %v1303_v15, %v3909_v43 }
0x1680   :  { %v1305_v49 = vpop.permute.xlu0 %1304 }
0x1681   :  { %v1309_v26 = vmul.f32 %v1305_v49, %v1275_v24 }
0x1683   :  { %v1311_v53 = vsel %vm4622_vm1, %v1309_v26, 0.0  ;;  %vm4623_vm1 = vcmp.gt.s32.totalorder %v3543_v60, 7 }
0x1684   :  { %1318 = vrot.lane.b32.xlu1 %v1311_v53, %s3262_s14  ;;  %v1206_v36 = vpop.permute.xlu0 %1205  ;;  %v1310_v2 = vsel %vm4623_vm1, %v1308_v59, 0.0  ;;  %vm4629_vm1 = vcmp.gt.s32.totalorder %v3543_v60, 0 }
0x1685   :  { %1208 = vst.msk [vmem:[#allocation3 + $0x48] sm:$0xff] %vm375_vm8, %v1206_v36 }
0x1688   :  { %1088 = vrot.lane.b32.xlu1 %v1081_v40, %s3262_s14  ;;  %v972_v41 = vpop.permute.xlu0 %971 }
0x1689   :  { %974 = vst.msk [vmem:[#allocation3 + $0x58] sm:$0xff] %vm375_vm8, %v972_v41  ;;  %v1673_v41 = vpop.f32.mrb[28].mxu0 }
0x168c   :  { %854 = vrot.lane.b32.xlu1 %v847_v1, %s3262_s14  ;;  %v738_v22 = vpop.permute.xlu0 %737  ;;  %v1335_v57 = vld [vmem:[#allocation3 + $0x48] sm:$0xff]  ;;  %v2951_v1 = vpop.f32.mrb[29].mxu0 }
0x168d   :  { %740 = vst.msk [vmem:[#allocation3 + $0x68] sm:$0xff] %vm375_vm8, %v738_v22  ;;  %v1676_v22 = vpop.f32.mrb[30].mxu0 }
0x1690   :  { %620 = vrot.lane.b32.xlu1 %v613_v25, %s3262_s14  ;;  %v504_v63 = vpop.permute.xlu0 %503  ;;  %v1337_v13 = vld [vmem:[#allocation3 + $0x58] sm:$0xff]  ;;  %v2952_v25 = vpop.f32.mrb[31].mxu0 }
0x1691   :  { %506 = vst.msk [vmem:[#allocation3 + $0x78] sm:$0xff] %vm375_vm8, %v504_v63  ;;  %v1564_v63 = vld [vmem:[%s4614_s6] sm:$0x3] }
0x1694   :  { %615 = vrot.lane.b32.xlu1 %v612_v33, %s3262_s14  ;;  %v499_v55 = vpop.permute.xlu0 %498  ;;  %v1339_v38 = vld [vmem:[#allocation3 + $0x68] sm:$0xff]  ;;  %v1568_v33 = vrot.slane %v1564_v63, %v327_v46 }
0x1695   :  { %501 = vst.msk [vmem:[#allocation3] sm:$0xff] %vm375_vm8, %v499_v55 }
0x1698   :  { %849 = vrot.lane.b32.xlu1 %v846_v17, %s3262_s14  ;;  %v733_v30 = vpop.permute.xlu0 %732  ;;  %v1341_v3 = vld [vmem:[#allocation3 + $0x78] sm:$0xff] }
0x1699   :  { %735 = vst.msk [vmem:[#allocation3 + $0x10] sm:$0xff] %vm375_vm8, %v733_v30 }
0x169c   :  { %1083 = vrot.lane.b32.xlu1 %v1080_v34, %s3262_s14  ;;  %v967_v42 = vpop.permute.xlu0 %966  ;;  %v1322_v28 = vld [vmem:[#allocation3] sm:$0xff] }
0x169d   :  { %969 = vst.msk [vmem:[#allocation3 + $0x20] sm:$0xff] %vm375_vm8, %v967_v42 }
0x16a0   :  { %1313 = vrot.lane.b32.xlu1 %v1310_v2, %s3262_s14  ;;  %v1201_v18 = vpop.permute.xlu0 %1200  ;;  %v1324_v32 = vld [vmem:[#allocation3 + $0x10] sm:$0xff] }
0x16a1   :  { %1203 = vst.msk [vmem:[#allocation3 + $0x30] sm:$0xff] %vm375_vm8, %v1201_v18 }
0x16a4   :  { %v1326_v49 = vld [vmem:[#allocation3 + $0x20] sm:$0xff] }
0x16a8   :  { %v1328_v36 = vld [vmem:[#allocation3 + $0x30] sm:$0xff] }
0x16f6   :  { %v1319_v23 = vpop.permute.xlu1 %1318 }
0x16f7   :  { %1321 = vst.msk [vmem:[#allocation3 + $0x40] sm:$0xff] %vm375_vm8, %v1319_v23 }
0x16fa   :  { %v1089_v21 = vpop.permute.xlu1 %1088 }
0x16fb   :  { %1091 = vst.msk [vmem:[#allocation3 + $0x50] sm:$0xff] %vm375_vm8, %v1089_v21 }
0x16fe   :  { %v855_v43 = vpop.permute.xlu1 %854  ;;  %v1334_v24 = vld [vmem:[#allocation3 + $0x40] sm:$0xff] }
0x16ff   :  { %857 = vst.msk [vmem:[#allocation3 + $0x60] sm:$0xff] %vm375_vm8, %v855_v43  ;;  %v1342_v7 = vpack.c.bf16 %v1335_v57, %v1334_v24 }
0x1701   :  { %2731 = vmatmul.mubr.msk.bf16.vlgmr.msra.gmra.mrb[20].mxu1 %vm375_vm8, %v1342_v7 }
0x1702   :  { %1492 = vmatpush1.bf16.msra.mxu1 %v3110_v31  ;;  %v621_v62 = vpop.permute.xlu1 %620  ;;  %1428 = vmatprep.mubr.bf16.mxu1 %v3256_v0  ;;  %v1336_v20 = vld [vmem:[#allocation3 + $0x50] sm:$0xff] }
0x1703   :  { %623 = vst.msk [vmem:[#allocation3 + $0x70] sm:$0xff] %vm375_vm8, %v621_v62  ;;  %1493 = vmatprep.subr.bf16.mxu1 %v3115_v27  ;;  %v1343_v9 = vpack.c.bf16 %v1337_v13, %v1336_v20 }
0x1706   :  { %v616_v4 = vpop.permute.xlu1 %615  ;;  %1494 = vmatpush1.bf16.msra.mxu1 %v3113_v16  ;;  %v1338_v35 = vld [vmem:[#allocation3 + $0x60] sm:$0xff] }
0x1707   :  { %618 = vst.msk [vmem:[#allocation3 + $0x8] sm:$0xff] %vm375_vm8, %v616_v4  ;;  %2977 = vmatprep.subr.bf16.mxu1 %v3257_v5  ;;  %v1344_v50 = vpack.c.bf16 %v1339_v38, %v1338_v35 }
0x1709   :  { %2732 = vmatmul.mubr.msk.bf16.gmra.mrb[24].mxu1 %vm375_vm8, %v1343_v9 }
0x170a   :  { %v850_v51 = vpop.permute.xlu1 %849  ;;  %1438 = vmatprep.mubr.bf16.mxu1 %v3256_v0  ;;  %v1340_v54 = vld [vmem:[#allocation3 + $0x70] sm:$0xff] }
0x170b   :  { %852 = vst.msk [vmem:[#allocation3 + $0x18] sm:$0xff] %vm375_vm8, %v850_v51  ;;  %v1345_v58 = vpack.c.bf16 %v1341_v3, %v1340_v54 }
0x170e   :  { %v1084_v47 = vpop.permute.xlu1 %1083  ;;  %v1323_v52 = vld [vmem:[#allocation3 + $0x8] sm:$0xff] }
0x170f   :  { %1086 = vst.msk [vmem:[#allocation3 + $0x28] sm:$0xff] %vm375_vm8, %v1084_v47  ;;  %v1330_v8 = vpack.c.bf16 %v1323_v52, %v1322_v28 }
0x1711   :  { %2733 = vmatmul.mubr.msk.bf16.gmra.mrb[28].mxu1 %vm375_vm8, %v1344_v50 }
0x1712   :  { %v1314_v44 = vpop.permute.xlu1 %1313  ;;  %1448 = vmatprep.mubr.bf16.mxu1 %v3256_v0  ;;  %v1325_v10 = vld [vmem:[#allocation3 + $0x18] sm:$0xff] }
0x1713   :  { %1316 = vst.msk [vmem:[#allocation3 + $0x38] sm:$0xff] %vm375_vm8, %v1314_v44  ;;  %v1331_v37 = vpack.c.bf16 %v1325_v10, %v1324_v32 }
0x1716   :  { %v1327_v39 = vld [vmem:[#allocation3 + $0x28] sm:$0xff] }
0x1717   :  { %v1332_v26 = vpack.c.bf16 %v1327_v39, %v1326_v49 }
0x1719   :  { %2734 = vmatmul.mubr.msk.bf16.gmra.mrb[32].mxu1 %vm375_vm8, %v1345_v58 }
0x171a   :  { %1523 = vmatprep.mubr.bf16.mxu1 %v3256_v0  ;;  %v1329_v53 = vld [vmem:[#allocation3 + $0x38] sm:$0xff] }
0x171b   :  { %v1333_v40 = vpack.c.bf16 %v1329_v53, %v1328_v36 }
0x1721   :  { %2739 = vmatmul.mubr.msk.bf16.vlgmr.msra.gmra.mrb[20].mxu1 %vm375_vm8, %v1330_v8 }
0x1722   :  { %1533 = vmatprep.mubr.bf16.mxu1 %v3256_v0  ;;  %2978 = vmatpush3.bf16.msra.mxu1 %v3996_v19 }
0x1723   :  { %2979 = vmatprep.subr.bf16.mxu1 %v3257_v5 }
0x1726   :  { %2980 = vmatpush3.bf16.msra.mxu1 %v4005_v6 }
0x1727   :  { %2981 = vmatprep.subr.bf16.mxu1 %v3257_v5 }
0x1729   :  { %2740 = vmatmul.mubr.msk.bf16.gmra.mrb[24].mxu1 %vm375_vm8, %v1331_v37 }
0x172a   :  { %1543 = vmatprep.mubr.bf16.mxu1 %v3256_v0  ;;  %2982 = vmatpush3.bf16.msra.mxu1 %v4018_v29 }
0x172b   :  { %2983 = vmatprep.subr.bf16.mxu1 %v3257_v5 }
0x172e   :  { %2984 = vmatpush3.bf16.msra.mxu1 %v4030_v11 }
0x172f   :  { %3001 = vmatprep.subr.bf16.mxu1 %v3257_v5 }
0x1731   :  { %2741 = vmatmul.mubr.msk.bf16.gmra.mrb[28].mxu1 %vm375_vm8, %v1332_v26 }
0x1732   :  { %1553 = vmatprep.mubr.bf16.mxu1 %v3256_v0  ;;  %v1580_v0 = vrot.slane %v1564_v63, %v339_v48 }
0x1739   :  { %2742 = vmatmul.mubr.msk.bf16.gmra.mrb[32].mxu1 %vm375_vm8, %v1333_v40 }
0x173a   :  { %2985 = vmatprep.mubr.msk.bf16.mxu1 %vm3258_vm0, %v3257_v5 }
0x17f4   :  { %v1525_v55 = vpop.f32.mrb[20].mxu1 }
0x17f5   :  { %v1569_v17 = vadd.f32 %v1568_v33, %v1525_v55  ;;  %v1527_v15 = vpop.f32.mrb[21].mxu1 }
0x17f6   :  { %v4098_v30 = vadd.f32 %v1580_v0, %v1527_v15  ;;  %v1529_v59 = vpop.f32.mrb[22].mxu1 }
0x17f7   :  { %v4100_v34 = vadd.f32 %v1568_v33, %v1529_v59  ;;  %v1680_v42 = vadd.f32 %v1673_v41, %v1569_v17  ;;  %v1531_v2 = vpop.f32.mrb[23].mxu1 }
0x17f8   :  { %v4102_v18 = vadd.f32 %v1580_v0, %v1531_v2 }
0x17f9   :  { %v1682_v23 = vmul.f32 %v1680_v42, %v3485_v56 }
0x17fb   :  { %3188 = vtanh.f32 %v1682_v23 }
0x17fc   :  { %v1535_v21 = vpop.f32.mrb[24].mxu1 }
0x17fd   :  { %v4105_v46 = vadd.f32 %v1568_v33, %v1535_v21  ;;  %v1537_v45 = vpop.f32.mrb[25].mxu1 }
0x17fe   :  { %v4107_v48 = vadd.f32 %v1580_v0, %v1537_v45  ;;  %v1539_v43 = vpop.f32.mrb[26].mxu1 }
0x17ff   :  { %v4109_v31 = vadd.f32 %v1568_v33, %v1539_v43  ;;  %v1541_v24 = vpop.f32.mrb[27].mxu1 }
0x1800   :  { %v4111_v57 = vadd.f32 %v1580_v0, %v1541_v24 }
0x1804   :  { %v1545_v7 = vpop.f32.mrb[28].mxu1 }
0x1805   :  { %v3189_v27 = vpop.eup %3188  ;;  %v4113_v62 = vadd.f32 %v1568_v33, %v1545_v7  ;;  %v1547_v16 = vpop.f32.mrb[29].mxu1 }
0x1806   :  { %v4115_v20 = vadd.f32 %v1580_v0, %v1547_v16  ;;  %v1549_v4 = vpop.f32.mrb[30].mxu1  ;;  %v1686_v13 = vmul.f32 %v3189_v27, %v3485_v56 }
0x1807   :  { %v4118_v9 = vadd.f32 %v1568_v33, %v1549_v4  ;;  %v1551_v51 = vpop.f32.mrb[31].mxu1 }
0x1808   :  { %v4120_v35 = vadd.f32 %v1580_v0, %v1551_v51  ;;  %v1688_v47 = vadd.f32 %v1686_v13, %v3504_v12 }
0x180a   :  { %1694 = vrot.lane.b32.xlu0 %v1688_v47, %s3261_s3  ;;  %v1690_v40 = vmul.f32 0.0, %v1688_v47 }
0x180c   :  { %v1555_v38 = vpop.f32.mrb[32].mxu1 }
0x180d   :  { %v4124_v50 = vadd.f32 %v1568_v33, %v1555_v38  ;;  %v1557_v44 = vpop.f32.mrb[33].mxu1 }
0x180e   :  { %v1587_v54 = vadd.f32 %v1580_v0, %v1557_v44  ;;  %v1559_v3 = vpop.f32.mrb[34].mxu1 }
0x180f   :  { %v4126_v58 = vadd.f32 %v1568_v33, %v1559_v3  ;;  %v1561_v52 = vpop.f32.mrb[35].mxu1 }
0x1810   :  { %v1588_v28 = vadd.f32 %v1580_v0, %v1561_v52 }
0x1812   :  { %v1681_v8 = vadd.f32 %v1676_v22, %v1588_v28 }
0x1814   :  { %v1683_v10 = vmul.f32 %v1681_v8, %v3485_v56 }
0x1816   :  { %3190 = vtanh.f32 %v1683_v10 }
0x1820   :  { %v3191_v32 = vpop.eup %3190 }
0x1821   :  { %v1687_v37 = vmul.f32 %v3191_v32, %v3485_v56 }
0x1823   :  { %v1689_v39 = vadd.f32 %v1687_v37, %v3504_v12 }
0x1825   :  { %1696 = vrot.lane.b32.xlu1 %v1689_v39, %s3261_s3  ;;  %v1691_v25 = vmul.f32 0.0, %v1689_v39 }
0x187c   :  { %v1695_v49 = vpop.permute.xlu0 %1694 }
0x187d   :  { %v1700_v26 = vmul.f32 %v1695_v49, %v1688_v47 }
0x187f   :  { %1704 = vrot.lane.b32.xlu0 %v1700_v26, %s3262_s14 }
0x1897   :  { %v1697_v53 = vpop.permute.xlu1 %1696 }
0x1898   :  { %v1701_v36 = vmul.f32 %v1697_v53, %v1689_v39 }
0x189a   :  { %1706 = vrot.lane.b32.xlu1 %v1701_v36, %s3262_s14 }
0x18f1   :  { %v1705_v41 = vpop.permute.xlu0 %1704 }
0x18f2   :  { %v1710_v1 = vadd.f32 %v1705_v41, %v1690_v40 }
0x18f4   :  { %3192 = vtanh.f32 %v1710_v1 }
0x18fe   :  { %v3193_v22 = vpop.eup %3192 }
0x18ff   :  { %1716 = vrot.lane.b32.xlu0 %v3193_v22, %s3261_s3 }
0x190c   :  { %v1707_v63 = vpop.permute.xlu1 %1706 }
0x190d   :  { %v1711_v33 = vadd.f32 %v1707_v63, %v1691_v25 }
0x190f   :  { %3194 = vtanh.f32 %v1711_v33  ;;  %v4177_v26 = vsel %vm4630_vm2, %v1711_v33, 0.0 }
0x1919   :  { %v3195_v0 = vpop.eup %3194 }
0x191a   :  { %1718 = vrot.lane.b32.xlu1 %v3195_v0, %s3261_s3 }
0x1971   :  { %v1717_v55 = vpop.permute.xlu0 %1716 }
0x1972   :  { %v1722_v17 = vmul.f32 %v1717_v55, %v1688_v47 }
0x1974   :  { %v4138_v42 = vsel %vm4629_vm1, %v1722_v17, 0.0 }
0x198c   :  { %v1719_v15 = vpop.permute.xlu1 %1718 }
0x198d   :  { %v1723_v59 = vmul.f32 %v1719_v15, %v1689_v39  ;;  %v1726_v39 = vsel %vm4629_vm1, %v1710_v1, 0.0  ;;  %vm4632_vm1 = vcmp.gt.s32.totalorder %v3545_v61, 1 }
0x198f   :  { %v4142_v2 = vsel %vm4630_vm2, %v1723_v59, 0.0  ;;  %vm4634_vm2 = vmmov %vm4632_vm1 }
0x1990   :  { %v1741_v23 = vpack.c.bf16 %v4142_v2, %v4138_v42 }
0x1992   :  { %1745 = vrot.lane.b32.xlu1 %v1741_v23, %s3261_s3  ;;  %1743 = vrot.lane.b32.xlu0 %v1741_v23, %s3262_s14 }
0x1a04   :  { %v1746_v21 = vpop.permute.xlu1 %1745  ;;  %v1744_v45 = vpop.permute.xlu0 %1743 }
0x1a05   :  { %v1749_v43 = vsel %vm375_vm8, %v1744_v45, %v1746_v21 }
0x1a06   :  { %v1751_v24 = vsel %vm3562_vm9, %v1749_v43, 0 }
0x1a07   :  { %2962 = vmatmul.mubr.msk.bf16.vlgmr.msra.gmra.mrb[32].mxu0 %vm404_vm10, %v1751_v24 }
0x1a08   :  { %2966 = vmatpush3.bf16.msra.mxu0 %v3996_v19  ;;  %2973 = vmatprep.mubr.msk.bf16.mxu0 %vm3258_vm0, %v3257_v5 }
0x1a09   :  { %2967 = vmatprep.subr.bf16.mxu0 %v3257_v5 }
0x1a0c   :  { %2968 = vmatpush3.bf16.msra.mxu0 %v4005_v6 }
0x1a0d   :  { %2969 = vmatprep.subr.bf16.mxu0 %v3257_v5 }
0x1a10   :  { %2970 = vmatpush3.bf16.msra.mxu0 %v4018_v29 }
0x1a11   :  { %2971 = vmatprep.subr.bf16.mxu0 %v3257_v5 }
0x1a14   :  { %2972 = vmatpush3.bf16.msra.mxu0 %v4030_v11 }
0x1a15   :  { %2989 = vmatprep.subr.bf16.mxu0 %v3257_v5 }
0x1ada   :  { %v1789_v7 = vpop.f32.mrb[32].mxu0 }
0x1adb   :  { %v1796_v27 = vadd.f32 %v1789_v7, %v4100_v34  ;;  %v2963_v16 = vpop.f32.mrb[33].mxu0 }
0x1adc   :  { %v1792_v4 = vpop.f32.mrb[34].mxu0 }
0x1add   :  { %v1798_v13 = vmul.f32 %v1796_v27, %v3485_v56  ;;  %v1797_v51 = vadd.f32 %v1792_v4, %v1587_v54  ;;  %v2964_v47 = vpop.f32.mrb[35].mxu0 }
0x1adf   :  { %3196 = vtanh.f32 %v1798_v13  ;;  %v1799_v38 = vmul.f32 %v1797_v51, %v3485_v56 }
0x1ae1   :  { %3198 = vtanh.f32 %v1799_v38 }
0x1ae9   :  { %v3197_v44 = vpop.eup %3196 }
0x1aea   :  { %v1802_v3 = vmul.f32 %v3197_v44, %v3485_v56 }
0x1aeb   :  { %v3199_v52 = vpop.eup %3198 }
0x1aec   :  { %v1804_v28 = vadd.f32 %v1802_v3, %v3504_v12  ;;  %v1803_v8 = vmul.f32 %v3199_v52, %v3485_v56 }
0x1aee   :  { %1810 = vrot.lane.b32.xlu0 %v1804_v28, %s3261_s3  ;;  %v1805_v34 = vadd.f32 %v1803_v8, %v3504_v12  ;;  %v1806_v49 = vmul.f32 %v1804_v28, %v1726_v39 }
0x1af0   :  { %1812 = vrot.lane.b32.xlu1 %v1805_v34, %s3261_s3  ;;  %v1807_v40 = vmul.f32 %v1805_v34, %v4177_v26 }
0x1b60   :  { %v1811_v54 = vpop.permute.xlu0 %1810 }
0x1b61   :  { %v1816_v10 = vmul.f32 %v1811_v54, %v1804_v28 }
0x1b62   :  { %v1813_v32 = vpop.permute.xlu1 %1812 }
0x1b63   :  { %v1817_v37 = vmul.f32 %v1813_v32, %v1805_v34  ;;  %1820 = vrot.lane.b32.xlu0 %v1816_v10, %s3262_s14 }
0x1b65   :  { %1822 = vrot.lane.b32.xlu1 %v1817_v37, %s3262_s14 }
0x1bd5   :  { %v1821_v53 = vpop.permute.xlu0 %1820 }
0x1bd6   :  { %v1826_v36 = vadd.f32 %v1821_v53, %v1806_v49 }
0x1bd7   :  { %v1823_v41 = vpop.permute.xlu1 %1822 }
0x1bd8   :  { %3200 = vtanh.f32 %v1826_v36  ;;  %v1827_v22 = vadd.f32 %v1823_v41, %v1807_v40  ;;  %v1842_v10 = vsel %vm2670_vm11, %v1826_v36, %v1726_v39 }
0x1bda   :  { %3202 = vtanh.f32 %v1827_v22  ;;  %v1843_v49 = vsel %vm2671_vm12, %v1827_v22, %v4177_v26 }
0x1be2   :  { %v3201_v25 = vpop.eup %3200 }
0x1be3   :  { %1832 = vrot.lane.b32.xlu0 %v3201_v25, %s3261_s3 }
0x1be4   :  { %v3203_v63 = vpop.eup %3202 }
0x1be5   :  { %1834 = vrot.lane.b32.xlu1 %v3203_v63, %s3261_s3 }
0x1c55   :  { %v1833_v1 = vpop.permute.xlu0 %1832 }
0x1c56   :  { %v4182_v0 = vmul.f32 %v1833_v1, %v1804_v28 }
0x1c57   :  { %v1835_v55 = vpop.permute.xlu1 %1834 }
0x1c58   :  { %v4184_v33 = vmul.f32 %v1835_v55, %v1805_v34  ;;  %v1840_v17 = vsel %vm2670_vm11, %v4182_v0, %v4138_v42 }
0x1c5a   :  { %v1841_v15 = vsel %vm2671_vm12, %v4184_v33, %v4142_v2 }
0x1c5b   :  { %v1858_v59 = vpack.c.bf16 %v1841_v15, %v1840_v17 }
0x1c5d   :  { %1862 = vrot.lane.b32.xlu1 %v1858_v59, %s3261_s3  ;;  %1860 = vrot.lane.b32.xlu0 %v1858_v59, %s3262_s14 }
0x1ccf   :  { %v1863_v23 = vpop.permute.xlu1 %1862  ;;  %v1861_v21 = vpop.permute.xlu0 %1860 }
0x1cd0   :  { %v1866_v45 = vsel %vm375_vm8, %v1861_v21, %v1863_v23 }
0x1cd1   :  { %v1868_v43 = vsel %vm3562_vm9, %v1866_v45, 0 }
0x1cd2   :  { %2974 = vmatmul.mubr.msk.bf16.vlgmr.msra.gmra.mrb[36].mxu0 %vm404_vm10, %v1868_v43 }
0x1cd3   :  { %2990 = vmatpush3.bf16.msra.mxu0 %v3996_v19  ;;  %2997 = vmatprep.mubr.msk.bf16.mxu0 %vm3258_vm0, %v3257_v5 }
0x1cd4   :  { %2991 = vmatprep.subr.bf16.mxu0 %v3257_v5 }
0x1cd7   :  { %2992 = vmatpush3.bf16.msra.mxu0 %v4005_v6 }
0x1cd8   :  { %2993 = vmatprep.subr.bf16.mxu0 %v3257_v5 }
0x1cdb   :  { %2994 = vmatpush3.bf16.msra.mxu0 %v4018_v29 }
0x1cdc   :  { %2995 = vmatprep.subr.bf16.mxu0 %v3257_v5 }
0x1cdf   :  { %2996 = vmatpush3.bf16.msra.mxu0 %v4030_v11 }
0x1ce0   :  { %3013 = vmatprep.subr.bf16.mxu0 %v3257_v5 }
0x1da5   :  { %v1906_v24 = vpop.f32.mrb[36].mxu0 }
0x1da6   :  { %v1913_v7 = vadd.f32 %v1906_v24, %v4105_v46  ;;  %v2975_v27 = vpop.f32.mrb[37].mxu0 }
0x1da7   :  { %v1909_v16 = vpop.f32.mrb[38].mxu0 }
0x1da8   :  { %v1915_v4 = vmul.f32 %v1913_v7, %v3485_v56  ;;  %v1914_v13 = vadd.f32 %v1909_v16, %v4120_v35  ;;  %v2976_v51 = vpop.f32.mrb[39].mxu0 }
0x1daa   :  { %3204 = vtanh.f32 %v1915_v4  ;;  %v1916_v47 = vmul.f32 %v1914_v13, %v3485_v56 }
0x1dac   :  { %3206 = vtanh.f32 %v1916_v47 }
0x1db4   :  { %v3205_v38 = vpop.eup %3204 }
0x1db5   :  { %v1919_v44 = vmul.f32 %v3205_v38, %v3485_v56 }
0x1db6   :  { %v3207_v3 = vpop.eup %3206 }
0x1db7   :  { %v1921_v52 = vadd.f32 %v1919_v44, %v3504_v12  ;;  %v1920_v28 = vmul.f32 %v3207_v3, %v3485_v56 }
0x1db9   :  { %1927 = vrot.lane.b32.xlu0 %v1921_v52, %s3261_s3  ;;  %v1922_v46 = vadd.f32 %v1920_v28, %v3504_v12  ;;  %v1923_v32 = vmul.f32 %v1921_v52, %v1842_v10 }
0x1dbb   :  { %1929 = vrot.lane.b32.xlu1 %v1922_v46, %s3261_s3  ;;  %v1924_v40 = vmul.f32 %v1922_v46, %v1843_v49 }
0x1e2b   :  { %v1928_v35 = vpop.permute.xlu0 %1927 }
0x1e2c   :  { %v1933_v8 = vmul.f32 %v1928_v35, %v1921_v52 }
0x1e2d   :  { %v1930_v34 = vpop.permute.xlu1 %1929 }
0x1e2e   :  { %v1934_v54 = vmul.f32 %v1930_v34, %v1922_v46  ;;  %1937 = vrot.lane.b32.xlu0 %v1933_v8, %s3262_s14 }
0x1e30   :  { %1939 = vrot.lane.b32.xlu1 %v1934_v54, %s3262_s14 }
0x1ea0   :  { %v1938_v37 = vpop.permute.xlu0 %1937 }
0x1ea1   :  { %v1943_v53 = vadd.f32 %v1938_v37, %v1923_v32 }
0x1ea2   :  { %v1940_v41 = vpop.permute.xlu1 %1939 }
0x1ea3   :  { %3208 = vtanh.f32 %v1943_v53  ;;  %v1944_v25 = vadd.f32 %v1940_v41, %v1924_v40  ;;  %v1959_v8 = vsel %vm2672_vm13, %v1943_v53, %v1842_v10 }
0x1ea5   :  { %3210 = vtanh.f32 %v1944_v25  ;;  %v1960_v32 = vsel %vm2673_vm14, %v1944_v25, %v1843_v49 }
0x1ead   :  { %v3209_v63 = vpop.eup %3208 }
0x1eae   :  { %1949 = vrot.lane.b32.xlu0 %v3209_v63, %s3261_s3 }
0x1eaf   :  { %v3211_v1 = vpop.eup %3210 }
0x1eb0   :  { %1951 = vrot.lane.b32.xlu1 %v3211_v1, %s3261_s3 }
0x1f20   :  { %v1950_v55 = vpop.permute.xlu0 %1949 }
0x1f21   :  { %v4229_v39 = vmul.f32 %v1950_v55, %v1921_v52 }
0x1f22   :  { %v1952_v36 = vpop.permute.xlu1 %1951 }
0x1f23   :  { %v4231_v59 = vmul.f32 %v1952_v36, %v1922_v46  ;;  %v1957_v26 = vsel %vm2672_vm13, %v4229_v39, %v1840_v17 }
0x1f25   :  { %v1958_v22 = vsel %vm2673_vm14, %v4231_v59, %v1841_v15 }
0x1f26   :  { %v1975_v23 = vpack.c.bf16 %v1958_v22, %v1957_v26 }
0x1f28   :  { %1979 = vrot.lane.b32.xlu1 %v1975_v23, %s3261_s3  ;;  %1977 = vrot.lane.b32.xlu0 %v1975_v23, %s3262_s14 }
0x1f9a   :  { %v1980_v21 = vpop.permute.xlu1 %1979  ;;  %v1978_v45 = vpop.permute.xlu0 %1977 }
0x1f9b   :  { %v1983_v43 = vsel %vm375_vm8, %v1978_v45, %v1980_v21 }
0x1f9c   :  { %v1985_v24 = vsel %vm3562_vm9, %v1983_v43, 0 }
0x1f9d   :  { %2986 = vmatmul.mubr.msk.bf16.vlgmr.msra.gmra.mrb[36].mxu1 %vm404_vm10, %v1985_v24 }
0x1f9e   :  { %3002 = vmatpush3.bf16.msra.mxu1 %v3996_v19  ;;  %3009 = vmatprep.mubr.msk.bf16.mxu1 %vm3258_vm0, %v3257_v5 }
0x1f9f   :  { %3003 = vmatprep.subr.bf16.mxu1 %v3257_v5 }
0x1fa2   :  { %3004 = vmatpush3.bf16.msra.mxu1 %v4005_v6 }
0x1fa3   :  { %3005 = vmatprep.subr.bf16.mxu1 %v3257_v5 }
0x1fa6   :  { %3006 = vmatpush3.bf16.msra.mxu1 %v4018_v29 }
0x1fa7   :  { %3007 = vmatprep.subr.bf16.mxu1 %v3257_v5 }
0x1faa   :  { %3008 = vmatpush3.bf16.msra.mxu1 %v4030_v11 }
0x1fab   :  { %3025 = vmatprep.subr.bf16.mxu1 %v3257_v5 }
0x2070   :  { %v2023_v17 = vpop.f32.mrb[36].mxu1 }
0x2071   :  { %v2030_v15 = vadd.f32 %v2023_v17, %v4109_v31  ;;  %v2987_v7 = vpop.f32.mrb[37].mxu1 }
0x2072   :  { %v2026_v27 = vpop.f32.mrb[38].mxu1 }
0x2073   :  { %v2032_v16 = vmul.f32 %v2030_v15, %v3485_v56  ;;  %v2031_v4 = vadd.f32 %v2026_v27, %v4115_v20  ;;  %v2988_v13 = vpop.f32.mrb[39].mxu1 }
0x2075   :  { %3212 = vtanh.f32 %v2032_v16  ;;  %v2033_v51 = vmul.f32 %v2031_v4, %v3485_v56 }
0x2077   :  { %3214 = vtanh.f32 %v2033_v51 }
0x207f   :  { %v3213_v47 = vpop.eup %3212 }
0x2080   :  { %v2036_v38 = vmul.f32 %v3213_v47, %v3485_v56 }
0x2081   :  { %v3215_v44 = vpop.eup %3214 }
0x2082   :  { %v2038_v3 = vadd.f32 %v2036_v38, %v3504_v12  ;;  %v2037_v52 = vmul.f32 %v3215_v44, %v3485_v56 }
0x2084   :  { %2044 = vrot.lane.b32.xlu0 %v2038_v3, %s3261_s3  ;;  %v2039_v31 = vadd.f32 %v2037_v52, %v3504_v12  ;;  %v2040_v34 = vmul.f32 %v2038_v3, %v1959_v8 }
0x2086   :  { %2046 = vrot.lane.b32.xlu1 %v2039_v31, %s3261_s3  ;;  %v2041_v40 = vmul.f32 %v2039_v31, %v1960_v32 }
0x20f6   :  { %v2045_v20 = vpop.permute.xlu0 %2044 }
0x20f7   :  { %v2050_v28 = vmul.f32 %v2045_v20, %v2038_v3 }
0x20f8   :  { %v2047_v46 = vpop.permute.xlu1 %2046 }
0x20f9   :  { %v2051_v35 = vmul.f32 %v2047_v46, %v2039_v31  ;;  %2054 = vrot.lane.b32.xlu0 %v2050_v28, %s3262_s14 }
0x20fb   :  { %2056 = vrot.lane.b32.xlu1 %v2051_v35, %s3262_s14 }
0x216b   :  { %v2055_v54 = vpop.permute.xlu0 %2054 }
0x216c   :  { %v2060_v37 = vadd.f32 %v2055_v54, %v2040_v34 }
0x216d   :  { %v2057_v41 = vpop.permute.xlu1 %2056 }
0x216e   :  { %3216 = vtanh.f32 %v2060_v37  ;;  %v2061_v63 = vadd.f32 %v2057_v41, %v2041_v40  ;;  %v2076_v28 = vsel %vm2674_vm15, %v2060_v37, %v1959_v8 }
0x2170   :  { %3218 = vtanh.f32 %v2061_v63  ;;  %v2077_v34 = vsel %vm2675_vm3, %v2061_v63, %v1960_v32 }
0x2178   :  { %v3217_v1 = vpop.eup %3216 }
0x2179   :  { %2066 = vrot.lane.b32.xlu0 %v3217_v1, %s3261_s3 }
0x217a   :  { %v3219_v55 = vpop.eup %3218 }
0x217b   :  { %2068 = vrot.lane.b32.xlu1 %v3219_v55, %s3261_s3 }
0x21eb   :  { %v2067_v36 = vpop.permute.xlu0 %2066 }
0x21ec   :  { %v4273_v23 = vmul.f32 %v2067_v36, %v2038_v3 }
0x21ed   :  { %v2069_v10 = vpop.permute.xlu1 %2068 }
0x21ee   :  { %v4275_v53 = vmul.f32 %v2069_v10, %v2039_v31  ;;  %v2074_v49 = vsel %vm2674_vm15, %v4273_v23, %v1957_v26 }
0x21f0   :  { %v2075_v25 = vsel %vm2675_vm3, %v4275_v53, %v1958_v22 }
0x21f1   :  { %v2092_v21 = vpack.c.bf16 %v2075_v25, %v2074_v49 }
0x21f3   :  { %2096 = vrot.lane.b32.xlu1 %v2092_v21, %s3261_s3  ;;  %2094 = vrot.lane.b32.xlu0 %v2092_v21, %s3262_s14 }
0x2265   :  { %v2097_v45 = vpop.permute.xlu1 %2096  ;;  %v2095_v43 = vpop.permute.xlu0 %2094 }
0x2266   :  { %v2100_v24 = vsel %vm375_vm8, %v2095_v43, %v2097_v45 }
0x2267   :  { %v2102_v17 = vsel %vm3562_vm9, %v2100_v24, 0 }
0x2268   :  { %2998 = vmatmul.mubr.msk.bf16.vlgmr.msra.gmra.mrb[40].mxu0 %vm404_vm10, %v2102_v17 }
0x2269   :  { %3014 = vmatpush3.bf16.msra.mxu0 %v3996_v19  ;;  %3021 = vmatprep.mubr.msk.bf16.mxu0 %vm3258_vm0, %v3257_v5 }
0x226a   :  { %3015 = vmatprep.subr.bf16.mxu0 %v3257_v5 }
0x226d   :  { %3016 = vmatpush3.bf16.msra.mxu0 %v4005_v6 }
0x226e   :  { %3017 = vmatprep.subr.bf16.mxu0 %v3257_v5 }
0x2271   :  { %3018 = vmatpush3.bf16.msra.mxu0 %v4018_v29 }
0x2272   :  { %3019 = vmatprep.subr.bf16.mxu0 %v3257_v5 }
0x2275   :  { %3020 = vmatpush3.bf16.msra.mxu0 %v4030_v11 }
0x2276   :  { %3037 = vmatprep.subr.bf16.mxu0 %v3257_v5 }
0x233b   :  { %v2140_v26 = vpop.f32.mrb[40].mxu0 }
0x233c   :  { %v2147_v22 = vadd.f32 %v2140_v26, %v4113_v62  ;;  %v2999_v15 = vpop.f32.mrb[41].mxu0 }
0x233d   :  { %v2143_v7 = vpop.f32.mrb[42].mxu0 }
0x233e   :  { %v2149_v27 = vmul.f32 %v2147_v22, %v3485_v56  ;;  %v2148_v16 = vadd.f32 %v2143_v7, %v4111_v57  ;;  %v3000_v4 = vpop.f32.mrb[43].mxu0 }
0x2340   :  { %3220 = vtanh.f32 %v2149_v27  ;;  %v2150_v13 = vmul.f32 %v2148_v16, %v3485_v56 }
0x2342   :  { %3222 = vtanh.f32 %v2150_v13 }
0x234a   :  { %v3221_v51 = vpop.eup %3220 }
0x234b   :  { %v2153_v47 = vmul.f32 %v3221_v51, %v3485_v56 }
0x234c   :  { %v3223_v38 = vpop.eup %3222 }
0x234d   :  { %v2155_v44 = vadd.f32 %v2153_v47, %v3504_v12  ;;  %v2154_v3 = vmul.f32 %v3223_v38, %v3485_v56 }
0x234f   :  { %2161 = vrot.lane.b32.xlu0 %v2155_v44, %s3261_s3  ;;  %v2156_v62 = vadd.f32 %v2154_v3, %v3504_v12  ;;  %v2157_v46 = vmul.f32 %v2155_v44, %v2076_v28 }
0x2351   :  { %2163 = vrot.lane.b32.xlu1 %v2156_v62, %s3261_s3  ;;  %v2158_v40 = vmul.f32 %v2156_v62, %v2077_v34 }
0x23c1   :  { %v2162_v57 = vpop.permute.xlu0 %2161 }
0x23c2   :  { %v2167_v52 = vmul.f32 %v2162_v57, %v2155_v44 }
0x23c3   :  { %v2164_v31 = vpop.permute.xlu1 %2163 }
0x23c4   :  { %v2168_v20 = vmul.f32 %v2164_v31, %v2156_v62  ;;  %2171 = vrot.lane.b32.xlu0 %v2167_v52, %s3262_s14 }
0x23c6   :  { %2173 = vrot.lane.b32.xlu1 %v2168_v20, %s3262_s14 }
0x2436   :  { %v2172_v35 = vpop.permute.xlu0 %2171 }
0x2437   :  { %v2177_v54 = vadd.f32 %v2172_v35, %v2157_v46 }
0x2438   :  { %v2174_v41 = vpop.permute.xlu1 %2173 }
0x2439   :  { %3224 = vtanh.f32 %v2177_v54  ;;  %v2178_v1 = vadd.f32 %v2174_v41, %v2158_v40 }
0x243b   :  { %3226 = vtanh.f32 %v2178_v1  ;;  %v2194_v57 = vsel %vm2677_vm5, %v2178_v1, %v2077_v34 }
0x2443   :  { %v3225_v55 = vpop.eup %3224 }
0x2444   :  { %2183 = vrot.lane.b32.xlu0 %v3225_v55, %s3261_s3 }
0x2445   :  { %v3227_v36 = vpop.eup %3226 }
0x2446   :  { %2185 = vrot.lane.b32.xlu1 %v3227_v36, %s3261_s3 }
0x24b6   :  { %v2184_v10 = vpop.permute.xlu0 %2183 }
0x24b7   :  { %v4317_v21 = vmul.f32 %v2184_v10, %v2155_v44  ;;  %v2193_v44 = vsel %vm2676_vm4, %v2177_v54, %v2076_v28 }
0x24b8   :  { %v2186_v8 = vpop.permute.xlu1 %2185 }
0x24b9   :  { %v4319_v37 = vmul.f32 %v2186_v8, %v2156_v62  ;;  %v2191_v32 = vsel %vm2676_vm4, %v4317_v21, %v2074_v49 }
0x24bb   :  { %v2192_v63 = vsel %vm2677_vm5, %v4319_v37, %v2075_v25 }
0x24bc   :  { %v2209_v45 = vpack.c.bf16 %v2192_v63, %v2191_v32 }
0x24be   :  { %2213 = vrot.lane.b32.xlu1 %v2209_v45, %s3261_s3  ;;  %2211 = vrot.lane.b32.xlu0 %v2209_v45, %s3262_s14 }
0x2530   :  { %v2214_v43 = vpop.permute.xlu1 %2213  ;;  %v2212_v24 = vpop.permute.xlu0 %2211 }
0x2531   :  { %v2217_v17 = vsel %vm375_vm8, %v2212_v24, %v2214_v43 }
0x2532   :  { %v2219_v26 = vsel %vm3562_vm9, %v2217_v17, 0 }
0x2533   :  { %3010 = vmatmul.mubr.msk.bf16.vlgmr.msra.gmra.mrb[40].mxu1 %vm404_vm10, %v2219_v26 }
0x2534   :  { %3026 = vmatpush3.bf16.msra.mxu1 %v3996_v19  ;;  %3033 = vmatprep.mubr.msk.bf16.mxu1 %vm3258_vm0, %v3257_v5 }
0x2535   :  { %3027 = vmatprep.subr.bf16.mxu1 %v3257_v5 }
0x2538   :  { %3028 = vmatpush3.bf16.msra.mxu1 %v4005_v6 }
0x2539   :  { %3029 = vmatprep.subr.bf16.mxu1 %v3257_v5 }
0x253c   :  { %3030 = vmatpush3.bf16.msra.mxu1 %v4018_v29 }
0x253d   :  { %3031 = vmatprep.subr.bf16.mxu1 %v3257_v5 }
0x2540   :  { %3032 = vmatpush3.bf16.msra.mxu1 %v4030_v11 }
0x2606   :  { %v2257_v49 = vpop.f32.mrb[40].mxu1 }
0x2607   :  { %v2264_v25 = vadd.f32 %v2257_v49, %v4118_v9  ;;  %v3011_v22 = vpop.f32.mrb[41].mxu1 }
0x2608   :  { %v2260_v19 = vpop.f32.mrb[42].mxu1 }
0x2609   :  { %v2266_v15 = vmul.f32 %v2264_v25, %v3485_v56  ;;  %v2265_v7 = vadd.f32 %v2260_v19, %v4107_v48  ;;  %v3012_v27 = vpop.f32.mrb[43].mxu1 }
0x260b   :  { %3228 = vtanh.f32 %v2266_v15  ;;  %v2267_v6 = vmul.f32 %v2265_v7, %v3485_v56 }
0x260d   :  { %3230 = vtanh.f32 %v2267_v6 }
0x2615   :  { %v3229_v16 = vpop.eup %3228 }
0x2616   :  { %v2270_v29 = vmul.f32 %v3229_v16, %v3485_v56 }
0x2617   :  { %v3231_v4 = vpop.eup %3230 }
0x2618   :  { %v2272_v11 = vadd.f32 %v2270_v29, %v3504_v12  ;;  %v2271_v13 = vmul.f32 %v3231_v4, %v3485_v56 }
0x261a   :  { %2278 = vrot.lane.b32.xlu0 %v2272_v11, %s3261_s3  ;;  %v2273_v9 = vadd.f32 %v2271_v13, %v3504_v12  ;;  %v2274_v3 = vmul.f32 %v2272_v11, %v2193_v44 }
0x261c   :  { %2280 = vrot.lane.b32.xlu1 %v2273_v9, %s3261_s3  ;;  %v2275_v31 = vmul.f32 %v2273_v9, %v2194_v57 }
0x268c   :  { %v2279_v48 = vpop.permute.xlu0 %2278 }
0x268d   :  { %v2284_v51 = vmul.f32 %v2279_v48, %v2272_v11 }
0x268e   :  { %v2281_v47 = vpop.permute.xlu1 %2280 }
0x268f   :  { %v2285_v38 = vmul.f32 %v2281_v47, %v2273_v9  ;;  %2288 = vrot.lane.b32.xlu0 %v2284_v51, %s3262_s14 }
0x2691   :  { %2290 = vrot.lane.b32.xlu1 %v2285_v38, %s3262_s14 }
0x2701   :  { %v2289_v62 = vpop.permute.xlu0 %2288 }
0x2702   :  { %v2294_v52 = vadd.f32 %v2289_v62, %v2274_v3 }
0x2703   :  { %v2291_v20 = vpop.permute.xlu1 %2290 }
0x2704   :  { %3232 = vtanh.f32 %v2294_v52  ;;  %v2295_v46 = vadd.f32 %v2291_v20, %v2275_v31 }
0x2706   :  { %3234 = vtanh.f32 %v2295_v46  ;;  %v2311_v48 = vsel %vm2679_vm7, %v2295_v46, %v2194_v57 }
0x270e   :  { %v3233_v35 = vpop.eup %3232 }
0x270f   :  { %2300 = vrot.lane.b32.xlu0 %v3233_v35, %s3261_s3 }
0x2710   :  { %v3235_v40 = vpop.eup %3234 }
0x2711   :  { %2302 = vrot.lane.b32.xlu1 %v3235_v40, %s3261_s3 }
0x2781   :  { %v2301_v41 = vpop.permute.xlu0 %2300 }
0x2782   :  { %v4360_v55 = vmul.f32 %v2301_v41, %v2272_v11  ;;  %v2310_v11 = vsel %vm2678_vm6, %v2294_v52, %v2193_v44 }
0x2783   :  { %v2303_v28 = vpop.permute.xlu1 %2302 }
0x2784   :  { %v4362_v54 = vmul.f32 %v2303_v28, %v2273_v9  ;;  %v2308_v34 = vsel %vm2678_vm6, %v4360_v55, %v2191_v32 }
0x2786   :  { %v2309_v1 = vsel %vm2679_vm7, %v4362_v54, %v2192_v63 }
0x2787   :  { %v2326_v36 = vpack.c.bf16 %v2309_v1, %v2308_v34 }
0x2789   :  { %2330 = vrot.lane.b32.xlu1 %v2326_v36, %s3261_s3  ;;  %2328 = vrot.lane.b32.xlu0 %v2326_v36, %s3262_s14 }
0x27fb   :  { %v2331_v10 = vpop.permute.xlu1 %2330  ;;  %v2329_v8 = vpop.permute.xlu0 %2328 }
0x27fc   :  { %v2334_v45 = vsel %vm375_vm8, %v2329_v8, %v2331_v10 }
0x27fd   :  { %v2336_v43 = vsel %vm3562_vm9, %v2334_v45, 0 }
0x27fe   :  { %3022 = vmatmul.mubr.msk.bf16.vlgmr.msra.gmra.mrb[44].mxu0 %vm404_vm10, %v2336_v43 }
0x27ff   :  { %3045 = vmatprep.mubr.msk.bf16.mxu0 %vm3258_vm0, %v3257_v5  ;;  %vm4631_vm0 = vcmp.gt.s32.totalorder %v3543_v60, 6 }
0x28d1   :  { %v2374_v32 = vpop.f32.mrb[44].mxu0 }
0x28d2   :  { %v2381_v63 = vadd.f32 %v2374_v32, %v4124_v50  ;;  %v3023_v24 = vpop.f32.mrb[45].mxu0 }
0x28d3   :  { %v2377_v17 = vpop.f32.mrb[46].mxu0 }
0x28d4   :  { %v2383_v26 = vmul.f32 %v2381_v63, %v3485_v56  ;;  %v2382_v49 = vadd.f32 %v2377_v17, %v4102_v18  ;;  %v3024_v25 = vpop.f32.mrb[47].mxu0 }
0x28d6   :  { %3236 = vtanh.f32 %v2383_v26  ;;  %v2384_v22 = vmul.f32 %v2382_v49, %v3485_v56 }
0x28d8   :  { %3238 = vtanh.f32 %v2384_v22 }
0x28e0   :  { %v3237_v19 = vpop.eup %3236 }
0x28e1   :  { %v2387_v15 = vmul.f32 %v3237_v19, %v3485_v56 }
0x28e2   :  { %v3239_v7 = vpop.eup %3238 }
0x28e3   :  { %v2389_v27 = vadd.f32 %v2387_v15, %v3504_v12  ;;  %v2388_v6 = vmul.f32 %v3239_v7, %v3485_v56 }
0x28e5   :  { %2395 = vrot.lane.b32.xlu0 %v2389_v27, %s3261_s3  ;;  %v2390_v50 = vadd.f32 %v2388_v6, %v3504_v12  ;;  %v2391_v13 = vmul.f32 %v2389_v27, %v2310_v11 }
0x28e7   :  { %2397 = vrot.lane.b32.xlu1 %v2390_v50, %s3261_s3  ;;  %v2392_v47 = vmul.f32 %v2390_v50, %v2311_v48 }
0x2957   :  { %v2396_v18 = vpop.permute.xlu0 %2395 }
0x2958   :  { %v2401_v16 = vmul.f32 %v2396_v18, %v2389_v27 }
0x2959   :  { %v2398_v29 = vpop.permute.xlu1 %2397 }
0x295a   :  { %v2402_v4 = vmul.f32 %v2398_v29, %v2390_v50  ;;  %2405 = vrot.lane.b32.xlu0 %v2401_v16, %s3262_s14 }
0x295c   :  { %2407 = vrot.lane.b32.xlu1 %v2402_v4, %s3262_s14 }
0x29cc   :  { %v2406_v9 = vpop.permute.xlu0 %2405 }
0x29cd   :  { %v2411_v51 = vadd.f32 %v2406_v9, %v2391_v13  ;;  %v3121_v13 = vld [vmem:[%s4615_s8 + $0x8] sm:$0xff]   ;;  %v3122_v9 = vld [vmem:[%s4615_s8 + $0x10] sm:$0xff]  }
0x29ce   :  { %v2408_v38 = vpop.permute.xlu1 %2407 }
0x29cf   :  { %3240 = vtanh.f32 %v2411_v51  ;;  %v2412_v3 = vadd.f32 %v2408_v38, %v2392_v47 }
0x29d1   :  { %3242 = vtanh.f32 %v2412_v3 }
0x29d9   :  { %v3241_v62 = vpop.eup %3240 }
0x29da   :  { %2417 = vrot.lane.b32.xlu0 %v3241_v62, %s3261_s3 }
0x29db   :  { %v3243_v31 = vpop.eup %3242 }
0x29dc   :  { %2419 = vrot.lane.b32.xlu1 %v3243_v31, %s3261_s3 }
0x2a4c   :  { %v2418_v20 = vpop.permute.xlu0 %2417 }
0x2a4d   :  { %v4396_v35 = vmul.f32 %v2418_v20, %v2389_v27  ;;  %v1844_v20 = vsel %vm2670_vm11, %v4182_v0, 0.0  ;;  %v2079_v0 = vsel %vm2675_vm3, %v4275_v53, 0.0  ;;  %vm4638_vm11 = vcmp.gt.s32.totalorder %v3543_v60, 6 }
0x2a4e   :  { %v2420_v44 = vpop.permute.xlu1 %2419  ;;  %vm1737_vm3 = vcmask 523520  }
0x2a4f   :  { %v4398_v52 = vmul.f32 %v2420_v44, %v2390_v50  ;;  %v4403_v57 = vsel %vm4631_vm0, %v4396_v35, %v2308_v34  ;;  %v1845_v44 = vsel %vm2671_vm12, %v4184_v33, 0.0  ;;  %v2195_v33 = vsel %vm2676_vm4, %v4317_v21, 0.0  ;;  %vm4639_vm12 = vmmov %vm4634_vm2 }
0x2a50   :  { %v2429_v53 = vsel %vm4638_vm11, %v4396_v35, 0.0 }
0x2a51   :  { %v4408_v46 = vsel %vm4632_vm1, %v4398_v52, %v2309_v1  ;;  %vm4636_vm1 = vcmp.gt.s32.totalorder %v3545_v61, 0  ;;  %v2430_v21 = vsel %vm4639_vm12, %v4398_v52, 0.0 }
0x2a52   :  { %v2443_v40 = vpack.c.bf16 %v4408_v46, %v4403_v57 }
0x2a54   :  { %2447 = vrot.lane.b32.xlu1 %v2443_v40, %s3261_s3  ;;  %2445 = vrot.lane.b32.xlu0 %v2443_v40, %s3262_s14 }
0x2ac6   :  { %v2448_v41 = vpop.permute.xlu1 %2447  ;;  %v2446_v28 = vpop.permute.xlu0 %2445 }
0x2ac7   :  { %v2451_v36 = vsel %vm375_vm8, %v2446_v28, %v2448_v41 }
0x2ac8   :  { %v2453_v34 = vsel %vm3562_vm9, %v2451_v36, 0  ;;  %vm4633_vm9 = vmmov %vm4631_vm0  ;;  %vm4635_vm0 = vcmp.gt.s32.totalorder %v3543_v60, 7 }
0x2ac9   :  { %3034 = vmatmul.mubr.msk.bf16.vlgmr.msra.gmra.mrb[44].mxu1 %vm404_vm10, %v2453_v34  ;;  %v2427_v7 = vsel %vm4633_vm9, %v2411_v51, %v2310_v11  ;;  %v3120_v11 = vld [vmem:[%s4615_s8] sm:$0xff]   ;;  %vm4637_vm9 = vmmov %vm4635_vm0 }
0x2aca   :  { %3038 = vmatpush3.bf16.msra.mxu0 %v3120_v11 }
0x2acb   :  { %3039 = vmatprep.subr.bf16.mxu0 %v3257_v5 }
0x2ace   :  { %3040 = vmatpush3.bf16.msra.mxu0 %v3121_v13 }
0x2acf   :  { %3041 = vmatprep.subr.bf16.mxu0 %v3257_v5 }
0x2ad2   :  { %3042 = vmatpush3.bf16.msra.mxu0 %v3122_v9 }
0x2ad3   :  { %3043 = vmatprep.subr.bf16.mxu0 %v3257_v5 }
0x2b9c   :  { %v2491_v10 = vpop.f32.mrb[44].mxu1 }
0x2b9d   :  { %v2498_v1 = vadd.f32 %v2491_v10, %v4126_v58  ;;  %v3035_v8 = vpop.f32.mrb[45].mxu1 }
0x2b9e   :  { %v2494_v45 = vpop.f32.mrb[46].mxu1 }
0x2b9f   :  { %v2500_v43 = vmul.f32 %v2498_v1, %v3485_v56  ;;  %v2499_v32 = vadd.f32 %v2494_v45, %v4098_v30  ;;  %v3036_v63 = vpop.f32.mrb[47].mxu1 }
0x2ba1   :  { %3244 = vtanh.f32 %v2500_v43  ;;  %v2501_v24 = vmul.f32 %v2499_v32, %v3485_v56 }
0x2ba3   :  { %3246 = vtanh.f32 %v2501_v24 }
0x2bab   :  { %v3245_v17 = vpop.eup %3244 }
0x2bac   :  { %v2504_v14 = vmul.f32 %v3245_v17, %v3485_v56 }
0x2bad   :  { %v3247_v26 = vpop.eup %3246 }
0x2bae   :  { %v2506_v49 = vadd.f32 %v2504_v14, %v3504_v12  ;;  %v2505_v25 = vmul.f32 %v3247_v26, %v3485_v56  ;;  %v4434_v56 = vsel %vm4634_vm2, %v2412_v3, %v2311_v48  ;;  %v3123_v48 = vld [vmem:[%s4615_s8 + $0x18] sm:$0xff]   ;;  %s3264_s8 = smov 96  }
0x2baf   :  { %3044 = vmatpush3.bf16.msra.mxu0 %v3123_v48 }
0x2bb0   :  { %2512 = vrot.lane.b32.xlu0 %v2506_v49, %s3261_s3  ;;  %v2507_v58 = vadd.f32 %v2505_v25, %v3504_v12  ;;  %v2508_v27 = vmul.f32 %v2506_v49, %v2427_v7  ;;  %v2754_v25 = vld [vmem:[%s4617_s9] ss:$0 sm:$0xff] }
0x2bb2   :  { %2514 = vrot.lane.b32.xlu1 %v2507_v58, %s3261_s3  ;;  %v2509_v50 = vmul.f32 %v2507_v58, %v4434_v56 }
0x2c22   :  { %v2513_v30 = vpop.permute.xlu0 %2512 }
0x2c23   :  { %v2518_v22 = vmul.f32 %v2513_v30, %v2506_v49 }
0x2c24   :  { %v2515_v19 = vpop.permute.xlu1 %2514 }
0x2c25   :  { %v2519_v15 = vmul.f32 %v2515_v19, %v2507_v58  ;;  %2522 = vrot.lane.b32.xlu0 %v2518_v22, %s3262_s14 }
0x2c27   :  { %2524 = vrot.lane.b32.xlu1 %v2519_v15, %s3262_s14 }
0x2c97   :  { %v2523_v6 = vpop.permute.xlu0 %2522 }
0x2c98   :  { %v2528_v12 = vadd.f32 %v2523_v6, %v2508_v27 }
0x2c99   :  { %v2525_v18 = vpop.permute.xlu1 %2524 }
0x2c9a   :  { %3248 = vtanh.f32 %v2528_v12  ;;  %v4437_v16 = vadd.f32 %v2525_v18, %v2509_v50  ;;  %v2544_v5 = vsel %vm4637_vm9, %v2528_v12, %v2427_v7 }
0x2c9c   :  { %3250 = vtanh.f32 %v4437_v16 }
0x2ca4   :  { %v3249_v29 = vpop.eup %3248 }
0x2ca5   :  { %2534 = vrot.lane.b32.xlu0 %v3249_v29, %s3261_s3 }
0x2ca6   :  { %v3251_v4 = vpop.eup %3250 }
0x2ca7   :  { %2536 = vrot.lane.b32.xlu1 %v3251_v4, %s3261_s3 }
0x2d17   :  { %v2535_v51 = vpop.permute.xlu0 %2534 }
0x2d18   :  { %v2540_v47 = vmul.f32 %v2535_v51, %v2506_v49 }
0x2d19   :  { %v2537_v38 = vpop.permute.xlu1 %2536 }
0x2d1a   :  { %v2541_v3 = vmul.f32 %v2537_v38, %v2507_v58  ;;  %v2542_v62 = vsel %vm4635_vm0, %v2540_v47, %v4403_v57  ;;  %v1961_v57 = vsel %vm2672_vm13, %v4229_v39, 0.0  ;;  %v2196_v39 = vsel %vm2677_vm5, %v4319_v37, 0.0  ;;  %vm4640_vm13 = vmmov %vm4635_vm0 }
0x2d1b   :  { %2559 = vrot.lane.b32.xlu0 %v2542_v62, %s3262_s14  ;;  %v2546_v37 = vsel %vm4640_vm13, %v2540_v47, 0.0 }
0x2d1c   :  { %v2543_v31 = vsel %vm4636_vm1, %v2541_v3, %v4408_v46 }
0x2d1d   :  { %2563 = vrot.lane.b32.xlu1 %v2543_v31, %s3261_s3 }
0x2d1f   :  { %2568 = vrot.lane.b32.xlu0 %v2544_v5, %s3264_s8 }
0x2d21   :  { %1729 = vrot.lane.b32.xlu1 %v4138_v42, %s3262_s14  ;;  %v1962_v42 = vsel %vm2673_vm14, %v4231_v59, 0.0  ;;  %v2312_v59 = vsel %vm2678_vm6, %v4360_v55, 0.0  ;;  %vm4641_vm14 = vmmov %vm4636_vm1 }
0x2d22   :  { %v2547_v55 = vsel %vm4641_vm14, %v2541_v3, 0.0 }
0x2d23   :  { %1734 = vrot.lane.b32.xlu0 %v4142_v2, %s3261_s3  ;;  %v2078_v2 = vsel %vm2674_vm15, %v4273_v23, 0.0  ;;  %v2313_v23 = vsel %vm2679_vm7, %v4362_v54, 0.0  ;;  %vm4642_vm15 = vmmov %vm4636_vm1 }
0x2d24   :  { %v2545_v52 = vsel %vm4642_vm15, %v4437_v16, %v4434_v56 }
0x2d25   :  { %1847 = vrot.lane.b32.xlu1 %v1844_v20, %s3262_s14 }
0x2d27   :  { %1852 = vrot.lane.b32.xlu0 %v1845_v44, %s3261_s3 }
0x2d29   :  { %1964 = vrot.lane.b32.xlu1 %v1961_v57, %s3262_s14 }
0x2d2b   :  { %1969 = vrot.lane.b32.xlu0 %v1962_v42, %s3261_s3 }
0x2d2d   :  { %2081 = vrot.lane.b32.xlu1 %v2078_v2, %s3262_s14 }
0x2d2f   :  { %2086 = vrot.lane.b32.xlu0 %v2079_v0, %s3261_s3 }
0x2d31   :  { %2198 = vrot.lane.b32.xlu1 %v2195_v33, %s3262_s14 }
0x2d33   :  { %2203 = vrot.lane.b32.xlu0 %v2196_v39, %s3261_s3 }
0x2d35   :  { %2315 = vrot.lane.b32.xlu1 %v2312_v59, %s3262_s14 }
0x2d37   :  { %2320 = vrot.lane.b32.xlu0 %v2313_v23, %s3261_s3 }
0x2d39   :  { %2432 = vrot.lane.b32.xlu1 %v2429_v53, %s3262_s14 }
0x2d3b   :  { %2437 = vrot.lane.b32.xlu0 %v2430_v21, %s3261_s3 }
0x2d3d   :  { %2549 = vrot.lane.b32.xlu1 %v2546_v37, %s3262_s14 }
0x2d3f   :  { %2554 = vrot.lane.b32.xlu0 %v2547_v55, %s3261_s3 }
0x2d8d   :  { %v2560_v54 = vpop.permute.xlu0 %2559 }
0x2d8f   :  { %v2564_v35 = vpop.permute.xlu1 %2563 }
0x2d90   :  { %v2566_v40 = vsel %vm375_vm8, %v2560_v54, %v2564_v35 }
0x2d91   :  { %v2569_v46 = vpop.permute.xlu0 %2568 }
0x2d92   :  { %v2571_v60 = vsel %vm375_vm8, %v2569_v46, %v2545_v52 }
0x2d93   :  { %v2572_v41 = vpack.c.bf16 %v2571_v60, %v2566_v40  ;;  %v1730_v28 = vpop.permute.xlu1 %1729 }
0x2d94   :  { %1732 = vst.msk [vmem:[%s4616_s10] sm:$0xff] %vm375_vm8, %v1730_v28 }
0x2d95   :  { %v1735_v36 = vpop.permute.xlu0 %1734  ;;  %3046 = vmatmul.mubr.msk.bf16.vlgmr.msra.gmra.mrb[48].mxu0 %vm404_vm10, %v2572_v41 }
0x2d96   :  { %1738 = vst.msk [vmem:[%s4616_s10 + $0x38] sm:$0xff] %vm1737_vm3, %v1735_v36 }
0x2d97   :  { %v1848_v61 = vpop.permute.xlu1 %1847 }
0x2d98   :  { %1850 = vst.msk [vmem:[%s4616_s10 + $0x8] sm:$0xff] %vm375_vm8, %v1848_v61 }
0x2d99   :  { %v1853_v34 = vpop.permute.xlu0 %1852 }
0x2d9a   :  { %1855 = vst.msk [vmem:[%s4616_s10 + $0x30] sm:$0xff] %vm1737_vm3, %v1853_v34 }
0x2d9b   :  { %v1965_v10 = vpop.permute.xlu1 %1964 }
0x2d9c   :  { %1967 = vst.msk [vmem:[%s4616_s10 + $0x10] sm:$0xff] %vm375_vm8, %v1965_v10 }
0x2d9d   :  { %v1970_v1 = vpop.permute.xlu0 %1969 }
0x2d9e   :  { %1972 = vst.msk [vmem:[%s4616_s10 + $0x28] sm:$0xff] %vm1737_vm3, %v1970_v1 }
0x2d9f   :  { %v2082_v8 = vpop.permute.xlu1 %2081 }
0x2da0   :  { %2084 = vst.msk [vmem:[%s4616_s10 + $0x18] sm:$0xff] %vm375_vm8, %v2082_v8 }
0x2da1   :  { %v2087_v45 = vpop.permute.xlu0 %2086 }
0x2da2   :  { %2089 = vst.msk [vmem:[%s4616_s10 + $0x20] sm:$0xff] %vm1737_vm3, %v2087_v45 }
0x2da3   :  { %v2199_v43 = vpop.permute.xlu1 %2198 }
0x2da4   :  { %2201 = vst.msk [vmem:[%s4616_s10 + $0x20] sm:$0xff] %vm375_vm8, %v2199_v43 }
0x2da5   :  { %v2204_v32 = vpop.permute.xlu0 %2203 }
0x2da6   :  { %2206 = vst.msk [vmem:[%s4616_s10 + $0x18] sm:$0xff] %vm1737_vm3, %v2204_v32 }
0x2da7   :  { %v2316_v63 = vpop.permute.xlu1 %2315 }
0x2da8   :  { %2318 = vst.msk [vmem:[%s4616_s10 + $0x28] sm:$0xff] %vm375_vm8, %v2316_v63 }
0x2da9   :  { %v2321_v24 = vpop.permute.xlu0 %2320 }
0x2daa   :  { %2323 = vst.msk [vmem:[%s4616_s10 + $0x10] sm:$0xff] %vm1737_vm3, %v2321_v24 }
0x2dab   :  { %v2433_v17 = vpop.permute.xlu1 %2432 }
0x2dac   :  { %2435 = vst.msk [vmem:[%s4616_s10 + $0x30] sm:$0xff] %vm375_vm8, %v2433_v17 }
0x2dad   :  { %v2438_v14 = vpop.permute.xlu0 %2437 }
0x2dae   :  { %2440 = vst.msk [vmem:[%s4616_s10 + $0x8] sm:$0xff] %vm1737_vm3, %v2438_v14 }
0x2daf   :  { %v2550_v26 = vpop.permute.xlu1 %2549 }
0x2db0   :  { %2552 = vst.msk [vmem:[%s4616_s10 + $0x38] sm:$0xff] %vm375_vm8, %v2550_v26 }
0x2db1   :  { %v2555_v49 = vpop.permute.xlu0 %2554 }
0x2db2   :  { %2557 = vst.msk [vmem:[%s4616_s10] sm:$0xff] %vm1737_vm3, %v2555_v49 }
0x2e68   :  { %v2649_v58 = vpop.f32.mrb[48].mxu0 }
0x2e69   :  { %v2650_v30 = vadd.f32 %v2754_v25, %v2649_v58  ;;  %v3047_v22 = vpop.f32.mrb[49].mxu0 }
0x2e6a   :  { %v2652_v19 = vpop.f32.mrb[50].mxu0 }
0x2e6b   :  { %3252 = vtanh.f32 %v2650_v30  ;;  %v2653_v15 = vadd.f32 %v2754_v25, %v2652_v19  ;;  %v3048_v7 = vpop.f32.mrb[51].mxu0 }
0x2e6d   :  { %3254 = vtanh.f32 %v2653_v15 }
0x2e75   :  { %v3253_v27 = vpop.eup %3252 }
0x2e76   :  { %2658 = vst.msk [vmem:[%s4618_s11] sm:$0xff] %vm375_vm8, %v3253_v27 }
0x2e77   :  { %v3255_v6 = vpop.eup %3254 }
0x2e78   :  { %2659 = vst.msk [vmem:[%s4618_s11 + $0x8] sm:$0xff] %vm375_vm8, %v3255_v6 }

</bundles_post_ra>
